<compile_context>
chip_gen: v7x
topology: tpu7x:2x2x1
jax: 0.10.0
libtpu: 0.0.40
codegen_flags: <defaults>
</compile_context>

<pallas_src>
import math
import functools

import jax
import jax.numpy as jnp
from jax.experimental import pallas as pl
from jax.experimental.pallas import tpu as pltpu


# ---------------------------------------------------------------------------
# small helpers
# ---------------------------------------------------------------------------

def _round_up(n, m):
    return ((n + m - 1) // m) * m


@functools.lru_cache(maxsize=None)
def _vmem_limit_bytes():
    cap = 64 * 1024 * 1024
    try:
        info = pltpu.get_tpu_info()
        cap = int(getattr(info, "vmem_capacity_bytes", cap))
    except Exception:
        pass
    # leave ~16 MiB headroom; caps at ~100 MiB on 128 MiB parts, ~48 MiB on v7x
    return int(min(max(cap - 16 * 1024 * 1024, 32 * 1024 * 1024),
                   100 * 1024 * 1024))


def _compiler_params(semantics):
    return pltpu.CompilerParams(dimension_semantics=semantics,
                                vmem_limit_bytes=_vmem_limit_bytes())


def _row_tile(rows, row_bytes, max_tile=1024, budget=2 * 1024 * 1024):
    t = budget // max(1, row_bytes)
    t = max(8, min(max_tile, t))
    t = min(t, _round_up(rows, 8))
    return _round_up(t, 8)


# ---------------------------------------------------------------------------
# LayerNorm kernels (VideoNorm): LN over the full (C*H*W) feature per frame.
# ---------------------------------------------------------------------------

def _ln_kernel(x_ref, g_ref, b_ref, o_ref):
    x = x_ref[...].astype(jnp.float32)
    mu = jnp.mean(x, axis=-1, keepdims=True)
    var = jnp.mean(jnp.square(x - mu), axis=-1, keepdims=True)
    y = (x - mu) * jax.lax.rsqrt(var + 1e-5)
    o_ref[...] = (y * g_ref[...] + b_ref[...]).astype(o_ref.dtype)


def _ln_res_kernel(x_ref, g_ref, b_ref, r_ref, o_ref):
    x = x_ref[...].astype(jnp.float32)
    mu = jnp.mean(x, axis=-1, keepdims=True)
    var = jnp.mean(jnp.square(x - mu), axis=-1, keepdims=True)
    y = (x - mu) * jax.lax.rsqrt(var + 1e-5)
    o_ref[...] = (y * g_ref[...] + b_ref[...]
                  + r_ref[...].astype(jnp.float32)).astype(o_ref.dtype)


def _ln_res_ln_kernel(x_ref, g1_ref, b1_ref, r_ref, g2_ref, b2_ref,
                      h_ref, a_ref):
    # h = LN(x; g1, b1) + res   (residual stream, f32)
    # a = LN(h; g2, b2)         (feeds the next conv, bf16)
    x = x_ref[...].astype(jnp.float32)
    mu = jnp.mean(x, axis=-1, keepdims=True)
    var = jnp.mean(jnp.square(x - mu), axis=-1, keepdims=True)
    y = (x - mu) * jax.lax.rsqrt(var + 1e-5)
    h = y * g1_ref[...] + b1_ref[...] + r_ref[...].astype(jnp.float32)
    h_ref[...] = h.astype(h_ref.dtype)
    mu2 = jnp.mean(h, axis=-1, keepdims=True)
    var2 = jnp.mean(jnp.square(h - mu2), axis=-1, keepdims=True)
    a = (h - mu2) * jax.lax.rsqrt(var2 + 1e-5)
    a_ref[...] = (a * g2_ref[...] + b2_ref[...]).astype(a_ref.dtype)


def ln_pallas(x2d, gamma, beta, out_dtype=jnp.bfloat16):
    R, D = x2d.shape
    tr = _row_tile(R, D * 4)
    Rp = _round_up(R, tr)
    pad = Rp - R
    xp = jnp.pad(x2d, ((0, pad), (0, 0))) if pad else x2d
    out = pl.pallas_call(
        _ln_kernel,
        out_shape=jax.ShapeDtypeStruct((Rp, D), out_dtype),
        grid=(Rp // tr,),
        in_specs=[pl.BlockSpec((tr, D), lambda i: (i, 0)),
                  pl.BlockSpec((1, D), lambda i: (0, 0)),
                  pl.BlockSpec((1, D), lambda i: (0, 0))],
        out_specs=pl.BlockSpec((tr, D), lambda i: (i, 0)),
        compiler_params=_compiler_params(("parallel",)),
    )(xp, gamma.reshape(1, D).astype(jnp.float32),
      beta.reshape(1, D).astype(jnp.float32))
    return out[:R] if pad else out


def ln_res_pallas(x2d, gamma, beta, residual, out_dtype=jnp.float32):
    R, D = x2d.shape
    tr = _row_tile(R, D * 4)
    Rp = _round_up(R, tr)
    pad = Rp - R
    xp = jnp.pad(x2d, ((0, pad), (0, 0))) if pad else x2d
    rp = jnp.pad(residual, ((0, pad), (0, 0))) if pad else residual
    out = pl.pallas_call(
        _ln_res_kernel,
        out_shape=jax.ShapeDtypeStruct((Rp, D), out_dtype),
        grid=(Rp // tr,),
        in_specs=[pl.BlockSpec((tr, D), lambda i: (i, 0)),
                  pl.BlockSpec((1, D), lambda i: (0, 0)),
                  pl.BlockSpec((1, D), lambda i: (0, 0)),
                  pl.BlockSpec((tr, D), lambda i: (i, 0))],
        out_specs=pl.BlockSpec((tr, D), lambda i: (i, 0)),
        compiler_params=_compiler_params(("parallel",)),
    )(xp, gamma.reshape(1, D).astype(jnp.float32),
      beta.reshape(1, D).astype(jnp.float32), rp)
    return out[:R] if pad else out


def ln_res_ln_pallas(x2d, g1, b1, residual, g2, b2):
    R, D = x2d.shape
    tr = _row_tile(R, D * 4)
    Rp = _round_up(R, tr)
    pad = Rp - R
    xp = jnp.pad(x2d, ((0, pad), (0, 0))) if pad else x2d
    rp = jnp.pad(residual, ((0, pad), (0, 0))) if pad else residual
    h, a = pl.pallas_call(
        _ln_res_ln_kernel,
        out_shape=(jax.ShapeDtypeStruct((Rp, D), jnp.float32),
                   jax.ShapeDtypeStruct((Rp, D), jnp.bfloat16)),
        grid=(Rp // tr,),
        in_specs=[pl.BlockSpec((tr, D), lambda i: (i, 0)),
                  pl.BlockSpec((1, D), lambda i: (0, 0)),
                  pl.BlockSpec((1, D), lambda i: (0, 0)),
                  pl.BlockSpec((tr, D), lambda i: (i, 0)),
                  pl.BlockSpec((1, D), lambda i: (0, 0)),
                  pl.BlockSpec((1, D), lambda i: (0, 0))],
        out_specs=(pl.BlockSpec((tr, D), lambda i: (i, 0)),
                   pl.BlockSpec((tr, D), lambda i: (i, 0))),
        compiler_params=_compiler_params(("parallel",)),
    )(xp, g1.reshape(1, D).astype(jnp.float32),
      b1.reshape(1, D).astype(jnp.float32), rp,
      g2.reshape(1, D).astype(jnp.float32),
      b2.reshape(1, D).astype(jnp.float32))
    if pad:
        h, a = h[:R], a[:R]
    return h, a


# ---------------------------------------------------------------------------
# Per-frame (kh, kw, 1) Conv3d as shifted-tap GEMMs (no im2col matrix in HBM).
# ---------------------------------------------------------------------------

def _conv_frame_kernel(*refs, kh, kw, W, N, pw, swish):
    if swish:
        x_ref, w_ref, b_ref, m_ref, beta_ref, o_ref = refs
    else:
        x_ref, w_ref, b_ref, m_ref, o_ref = refs
    # x_ref: (1, Cin, Lp) bf16 padded flat frame; w_ref: (kh*kw, Cout, Cin) bf16
    # b_ref: (Cout, 1) f32; m_ref: (kw, N) f32 column-wrap masks
    total = None
    for dx in range(kw):
        part = None
        for dy in range(kh):
            s = dy * W + dx
            xs = x_ref[0, :, s:s + N]                         # (Cin, N)
            contrib = jnp.dot(w_ref[dy * kw + dx], xs,
                              preferred_element_type=jnp.float32)  # (Cout, N)
            part = contrib if part is None else part + contrib
        if dx != pw:
            part = part * m_ref[dx:dx + 1]                    # zero wrapped cols
        total = part if total is None else total + part
    total = total + b_ref[...]
    if swish:
        beta = beta_ref[0]
        total = total * jax.nn.sigmoid(total * beta)
    o_ref[0] = total.astype(o_ref.dtype)


def conv_frames_pallas(xf, wtap, bias, masks, *, H, W, kh, kw,
                       swish_beta=None, out_dtype=jnp.bfloat16):
    """xf: (BT, Cin, Lp) bf16 padded flat frames -> (BT, Cout, N) lane-dense."""
    BT, Cin, Lp = xf.shape
    ntap, Cout, _ = wtap.shape
    N = H * W
    pw = kw // 2

    kernel = functools.partial(_conv_frame_kernel, kh=kh, kw=kw, W=W, N=N,
                               pw=pw, swish=swish_beta is not None)
    in_specs = [
        pl.BlockSpec((1, Cin, Lp), lambda i: (i, 0, 0)),
        pl.BlockSpec((ntap, Cout, Cin), lambda i: (0, 0, 0)),
        pl.BlockSpec((Cout, 1), lambda i: (0, 0)),
        pl.BlockSpec((kw, N), lambda i: (0, 0)),
    ]
    args = [xf, wtap,
            bias.reshape(Cout, 1).astype(jnp.float32),
            masks.astype(jnp.float32)]
    if swish_beta is not None:
        in_specs.append(pl.BlockSpec(memory_space=pltpu.MemorySpace.SMEM))
        args.append(jnp.reshape(swish_beta, (1,)).astype(jnp.float32))

    # TODO(synk): for very large frames (H*W*Cin beyond a few MiB) tile the N
    # axis / process several frames per grid step to rebalance VMEM on v7x.
    return pl.pallas_call(
        kernel,
        out_shape=jax.ShapeDtypeStruct((BT, Cout, N), out_dtype),
        grid=(BT,),
        in_specs=in_specs,
        out_specs=pl.BlockSpec((1, Cout, N), lambda i: (i, 0, 0)),
        compiler_params=_compiler_params(("parallel",)),
    )(*args)


def conv_tap_weights(weight):
    """PyTorch Conv3d weight (Cout, Cin, kh, kw, 1) -> (kh*kw, Cout, Cin) bf16."""
    Cout, Cin, kh, kw, _ = weight.shape
    assert kh % 2 == 1 and kw % 2 == 1, "only odd kernels ('same' padding)"
    w = jnp.transpose(weight[..., 0], (2, 3, 0, 1)).reshape(kh * kw, Cout, Cin)
    return w.astype(jnp.bfloat16), kh, kw


def pad_frames(xf3, H, W, ph, pw):
    """(BT, C, H*W) -> (BT, C, Lp) bf16 with zero rows top/bottom + pw end pads."""
    BT, C, _ = xf3.shape
    x4 = xf3.reshape(BT, C, H, W)
    x4 = jnp.pad(x4, ((0, 0), (0, 0), (ph, ph), (0, 0)))
    flat = x4.reshape(BT, C, (H + 2 * ph) * W)
    flat = jnp.pad(flat, ((0, 0), (0, 0), (pw, pw)))
    return flat.astype(jnp.bfloat16)


def column_masks(W, N, kw):
    """(kw, N) f32: zero output columns whose horizontal tap wrapped rows."""
    pw = kw // 2
    w_idx = jnp.arange(N, dtype=jnp.int32) % W
    rows = []
    for dx in range(kw):
        d = dx - pw
        rows.append(((w_idx + d >= 0) & (w_idx + d < W)).astype(jnp.float32))
    return jnp.stack(rows, axis=0)


# ---------------------------------------------------------------------------
# FrameAttention core
# ---------------------------------------------------------------------------

def _mix_heads(w_ref, s, HT):
    # out[g] = sum_h w[g, h] * s[h]; weights come off the SMEM scalar path.
    # TODO(synk): for HT >= ~32 switch to an MXU contraction instead of the
    # unrolled scalar-broadcast accumulation.
    rows = []
    for g in range(HT):
        acc = w_ref[g, 0] * s[0]
        for h in range(1, HT):
            acc = acc + w_ref[g, h] * s[h]
        rows.append(acc)
    return jnp.stack(rows, axis=0)


def _attention_kernel(q_ref, k_ref, v_ref, bias_ref, wbs_ref, was_ref, o_ref,
                      *, HT, TQ, T, inv_scale):
    qi = pl.program_id(1)
    qb = q_ref[0]                                   # (HT, TQ, N) bf16
    kb = k_ref[0]                                   # (HT, T, N)
    vb = v_ref[0]

    s = jnp.einsum('hqn,hkn->hqk', qb, kb,
                   preferred_element_type=jnp.float32)         # (HT, TQ, T)
    # ALiBi bias added BEFORE scaling (as in the reference), then scale.
    s = (s + bias_ref[...]) * inv_scale

    # Replicates the reference quirk: masked_fill on tril(ones) (incl. the
    # diagonal), i.e. the LOWER triangle is masked to -1e18.
    row = jax.lax.broadcasted_iota(jnp.int32, (TQ, T), 0) + qi * TQ
    col = jax.lax.broadcasted_iota(jnp.int32, (TQ, T), 1)
    s = jnp.where(col <= row, jnp.float32(-1e18), s)

    s = _mix_heads(wbs_ref, s, HT)                  # head_talk_bs
    m = jnp.max(s, axis=-1, keepdims=True)
    e = jnp.exp(s - m)
    d = jnp.sum(e, axis=-1, keepdims=True)
    p = e / d                                       # exact divide (ref parity)
    p = _mix_heads(was_ref, p, HT)                  # head_talk_as

    o = jnp.einsum('hqk,hkn->hqn', p.astype(vb.dtype), vb,
                   preferred_element_type=jnp.float32)          # (HT, TQ, N)
    o_ref[0] = o.astype(o_ref.dtype)


def attention_pallas(qkv, bias, w_bs, w_as, *, HT):
    """qkv: (B, 3*HT, T, N) bf16 (q/k/v are contiguous head slices);
    bias: (HT, T, T) f32; w_bs/w_as: (HT, HT) f32 head-talk weights."""
    B, _, T, N = qkv.shape
    inv_scale = 1.0 / math.sqrt(N)
    TQ = T if (T <= 128 or T % 128 != 0) else 128
    n_qt = T // TQ

    kernel = functools.partial(_attention_kernel, HT=HT, TQ=TQ, T=T,
                               inv_scale=inv_scale)
    return pl.pallas_call(
        kernel,
        out_shape=jax.ShapeDtypeStruct((B, HT, T, N), jnp.bfloat16),
        grid=(B, n_qt),
        in_specs=[
            pl.BlockSpec((1, HT, TQ, N), lambda b, qi: (b, 0, qi, 0)),  # q
            pl.BlockSpec((1, HT, T, N), lambda b, qi: (b, 1, 0, 0)),    # k
            pl.BlockSpec((1, HT, T, N), lambda b, qi: (b, 2, 0, 0)),    # v
            pl.BlockSpec((HT, TQ, T), lambda b, qi: (0, qi, 0)),        # alibi
            pl.BlockSpec(memory_space=pltpu.MemorySpace.SMEM),          # w_bs
            pl.BlockSpec(memory_space=pltpu.MemorySpace.SMEM),          # w_as
        ],
        out_specs=pl.BlockSpec((1, HT, TQ, N), lambda b, qi: (b, 0, qi, 0)),
        compiler_params=_compiler_params(("parallel", "parallel")),
    )(qkv, qkv, qkv, bias,
      w_bs.astype(jnp.float32), w_as.astype(jnp.float32))


def _alibi_slopes(heads):
    def pow2(n):
        start = 2 ** (-2 ** (-(math.log2(n) - 3)))
        return [start * start ** i for i in range(n)]
    if math.log2(heads).is_integer():
        return pow2(heads)
    c = 2 ** math.floor(math.log2(heads))
    return pow2(c) + pow2(2 * c)[0::2][:heads - c]


def alibi_bias(nheads, total_heads, T):
    slopes = jnp.asarray(_alibi_slopes(nheads), jnp.float32)[:, None, None]
    idx = jnp.arange(T)
    base = -jnp.abs(idx[None, None, :] - idx[None, :, None]).astype(jnp.float32)
    bias = slopes * base                                   # (nheads, T, T)
    return jnp.pad(bias, ((0, total_heads - nheads), (0, 0), (0, 0)))


# ---------------------------------------------------------------------------
# JAX glue (frame layout, parameter repacking, module composition)
# ---------------------------------------------------------------------------

def to_frames(x):
    B, C, H, W, T = x.shape
    return jnp.transpose(x, (0, 4, 1, 2, 3)).reshape(B * T, C, H * W
                                                     ).astype(jnp.float32)


def from_frames(xf, B, C, H, W, T):
    return jnp.transpose(xf.reshape(B, T, C, H, W), (0, 2, 3, 4, 1))


def ln_flat_params(g, b):
    # PyTorch LayerNorm((H, W, C)) params -> flat (C*H*W) in (c, h, w) order.
    return (jnp.transpose(g, (2, 0, 1)).reshape(-1),
            jnp.transpose(b, (2, 0, 1)).reshape(-1))


def frame_ffn(a_frames, w1, b1, w2, b2, beta, masks, H, W):
    wt1, kh, kw = conv_tap_weights(w1)
    wt2, _, _ = conv_tap_weights(w2)
    ph, pw = kh // 2, kw // 2
    h = conv_frames_pallas(pad_frames(a_frames, H, W, ph, pw), wt1, b1, masks,
                           H=H, W=W, kh=kh, kw=kw, swish_beta=beta,
                           out_dtype=jnp.bfloat16)
    return conv_frames_pallas(pad_frames(h, H, W, ph, pw), wt2, b2, masks,
                              H=H, W=W, kh=kh, kw=kw, out_dtype=jnp.bfloat16)


def frame_attention(a_frames, p, nheads, masks, B, T, H, W):
    BT, C, N = a_frames.shape
    HT = nheads * C

    wq, kh, kw = conv_tap_weights(p['q_w'])
    wk, _, _ = conv_tap_weights(p['k_w'])
    wv, _, _ = conv_tap_weights(p['v_w'])
    wqkv = jnp.concatenate([wq, wk, wv], axis=1)            # (taps, 3HT, Cin)
    ph, pw = kh // 2, kw // 2

    qkv = conv_frames_pallas(pad_frames(a_frames, H, W, ph, pw), wqkv,
                             jnp.zeros((3 * HT,), jnp.float32), masks,
                             H=H, W=W, kh=kh, kw=kw,
                             out_dtype=jnp.bfloat16)         # (BT, 3HT, N)

    # ONE layout transpose into the attention layout; q/k/v stay contiguous
    # head slices of this single tensor.
    qkv4 = jnp.transpose(qkv.reshape(B, T, 3 * HT, N), (0, 2, 1, 3))

    bias = alibi_bias(nheads, HT, T)                         # (HT, T, T) f32
    att = attention_pallas(qkv4, bias, p['bs_w'], p['as_w'], HT=HT)

    att_f = jnp.transpose(att, (0, 2, 1, 3)).reshape(BT, HT, N)
    wproj, khp, kwp = conv_tap_weights(p['proj_w'])
    return conv_frames_pallas(pad_frames(att_f, H, W, khp // 2, kwp // 2),
                              wproj, p['proj_b'], masks,
                              H=H, W=W, kh=khp, kw=kwp,
                              out_dtype=jnp.bfloat16)        # (BT, C, N)


def block_forward(x, params, nheads, expansion):
    B, C, H, W, T = x.shape
    N = H * W
    D = C * N
    BT = B * T
    p = params

    xf = to_frames(x)                                  # (BT, C, N) f32
    x2 = xf.reshape(BT, D)

    kw = int(p['ffn1_w1'].shape[3])
    masks = column_masks(W, N, kw)

    g_pre1, b_pre1 = ln_flat_params(p['prenorm1_g'], p['prenorm1_b'])
    g_pre2, b_pre2 = ln_flat_params(p['prenorm2_g'], p['prenorm2_b'])
    g_pre3, b_pre3 = ln_flat_params(p['prenorm3_g'], p['prenorm3_b'])
    g_post2, b_post2 = ln_flat_params(p['postnorm2_g'], p['postnorm2_b'])
    g_post3, b_post3 = ln_flat_params(p['postnorm3_g'], p['postnorm3_b'])

    # --- FFN1 branch:  h2 = prenorm2(ffn1(prenorm1(x))) + x ; a2 = prenorm2(h2)
    a1 = ln_pallas(x2, g_pre1, b_pre1, out_dtype=jnp.bfloat16)
    f1 = frame_ffn(a1.reshape(BT, C, N), p['ffn1_w1'], p['ffn1_b1'],
                   p['ffn1_w2'], p['ffn1_b2'], p['ffn1_beta'], masks, H, W)
    h2, a2 = ln_res_ln_pallas(f1.reshape(BT, D), g_pre2, b_pre2, x2,
                              g_pre2, b_pre2)

    # --- Attention: h3 = postnorm2(attn(a2)) + h2 ; a3 = prenorm3(h3)
    ao = frame_attention(a2.reshape(BT, C, N), p, nheads, masks, B, T, H, W)
    h3, a3 = ln_res_ln_pallas(ao.reshape(BT, D), g_post2, b_post2, h2,
                              g_pre3, b_pre3)

    # --- FFN2 branch: out = postnorm3(ffn2(a3)) + h3
    f2 = frame_ffn(a3.reshape(BT, C, N), p['ffn2_w1'], p['ffn2_b1'],
                   p['ffn2_w2'], p['ffn2_b2'], p['ffn2_beta'], masks, H, W)
    out = ln_res_pallas(f2.reshape(BT, D), g_post3, b_post3, h3,
                        out_dtype=jnp.float32)

    return from_frames(out.reshape(BT, C, N), B, C, H, W, T)


def init_params(key, nheads, expansion, C, kh, kw, H, W):
    HT = nheads * C
    Cmid = C * expansion
    keys = jax.random.split(key, 16)

    def w(k, shape, scale=0.1):
        return scale * jax.random.normal(k, shape, jnp.float32)

    p = {
        'q_w': w(keys[0], (HT, C, kh, kw, 1)),
        'k_w': w(keys[1], (HT, C, kh, kw, 1)),
        'v_w': w(keys[2], (HT, C, kh, kw, 1)),
        'proj_w': w(keys[3], (C, HT, kh, kw, 1)),
        'proj_b': w(keys[4], (C,)),
        'bs_w': w(keys[5], (HT, HT)),
        'as_w': w(keys[6], (HT, HT)),
        'ffn1_w1': w(keys[7], (Cmid, C, kh, kw, 1)),
        'ffn1_b1': w(keys[8], (Cmid,)),
        'ffn1_w2': w(keys[9], (C, Cmid, kh, kw, 1)),
        'ffn1_b2': w(keys[10], (C,)),
        'ffn1_beta': jnp.ones((1,), jnp.float32),
        'ffn2_w1': w(keys[11], (Cmid, C, kh, kw, 1)),
        'ffn2_b1': w(keys[12], (Cmid,)),
        'ffn2_w2': w(keys[13], (C, Cmid, kh, kw, 1)),
        'ffn2_b2': w(keys[14], (C,)),
        'ffn2_beta': jnp.ones((1,), jnp.float32),
    }
    for name in ('prenorm1', 'prenorm2', 'prenorm3', 'postnorm2', 'postnorm3'):
        p[f'{name}_g'] = jnp.ones((H, W, C), jnp.float32)   # LayerNorm defaults
        p[f'{name}_b'] = jnp.zeros((H, W, C), jnp.float32)
    return p


if __name__ == "__main__":
    B, C, H, W, T = 2, 4, 8, 8, 8          # size = (H, W); spatial kernel (3, 3)
    nheads, expansion, ksz = 2, 2, (3, 3)

    key = jax.random.PRNGKey(0)
    kx, kp = jax.random.split(key)
    x = jax.random.normal(kx, (B, C, H, W, T), jnp.float32)
    params = init_params(kp, nheads, expansion, C, ksz[0], ksz[1], H, W)

    fwd = jax.jit(functools.partial(block_forward, nheads=nheads,
                                    expansion=expansion))
    out = jax.block_until_ready(fwd(x, params))

    assert out.shape == (B, C, H, W, T)
    assert bool(jnp.all(jnp.isfinite(out)))
    print("KERNEL_OK")
</pallas_src>

<mosaic_0001>
module attributes {stable_mosaic.version = 11 : i64} {
  func.func @_ln_kernel(%arg0: i32, %arg1: memref<16x256xf32, #tpu.memory_space<vmem>>, %arg2: memref<1x256xf32, #tpu.memory_space<vmem>>, %arg3: memref<1x256xf32, #tpu.memory_space<vmem>>, %arg4: memref<16x256xbf16, #tpu.memory_space<vmem>>) attributes {dimension_semantics = [#tpu.dimension_semantics<parallel>], iteration_bounds = array<i64: 1>, scalar_prefetch = 0 : i64, scratch_operands = 0 : i64, tpu.core_type = #tpu.core_type<tc>, window_params = [{transform_indices = @transform_0, window_bounds = array<i64: 16, 256>}, {pipeline_mode = #tpu.pipeline_mode<synchronous>, transform_indices = @transform_1, window_bounds = array<i64: 1, 256>}, {pipeline_mode = #tpu.pipeline_mode<synchronous>, transform_indices = @transform_2, window_bounds = array<i64: 1, 256>}, {transform_indices = @transform_3, window_bounds = array<i64: 16, 256>}]} {
    %c0 = arith.constant 0 : index
    %c0_0 = arith.constant 0 : index
    %0 = vector.load %arg1[%c0, %c0_0] : memref<16x256xf32, #tpu.memory_space<vmem>>, vector<16x256xf32>
    %cst = arith.constant dense<0.000000e+00> : vector<16xf32>
    %1 = vector.multi_reduction <add>, %0, %cst [1] : vector<16x256xf32> to vector<16xf32>
    %2 = vector.shape_cast %1 : vector<16xf32> to vector<16x1xf32>
    %cst_1 = arith.constant 2.560000e+02 : f32
    %3 = vector.broadcast %cst_1 : f32 to vector<16x1xf32>
    %4 = arith.divf %2, %3 : vector<16x1xf32>
    %5 = vector.broadcast %4 : vector<16x1xf32> to vector<16x256xf32>
    %6 = arith.subf %0, %5 : vector<16x256xf32>
    %7 = arith.mulf %6, %6 : vector<16x256xf32>
    %cst_2 = arith.constant dense<0.000000e+00> : vector<16xf32>
    %8 = vector.multi_reduction <add>, %7, %cst_2 [1] : vector<16x256xf32> to vector<16xf32>
    %9 = vector.shape_cast %8 : vector<16xf32> to vector<16x1xf32>
    %cst_3 = arith.constant 2.560000e+02 : f32
    %10 = vector.broadcast %cst_3 : f32 to vector<16x1xf32>
    %11 = arith.divf %9, %10 : vector<16x1xf32>
    %12 = vector.broadcast %4 : vector<16x1xf32> to vector<16x256xf32>
    %13 = arith.subf %0, %12 : vector<16x256xf32>
    %cst_4 = arith.constant 9.99999974E-6 : f32
    %14 = vector.broadcast %cst_4 : f32 to vector<16x1xf32>
    %15 = arith.addf %11, %14 : vector<16x1xf32>
    %16 = math.rsqrt %15 : vector<16x1xf32>
    %17 = vector.broadcast %16 : vector<16x1xf32> to vector<16x256xf32>
    %18 = arith.mulf %13, %17 : vector<16x256xf32>
    %c0_5 = arith.constant 0 : index
    %c0_6 = arith.constant 0 : index
    %19 = vector.load %arg2[%c0_5, %c0_6] : memref<1x256xf32, #tpu.memory_space<vmem>>, vector<1x256xf32>
    %20 = vector.broadcast %19 : vector<1x256xf32> to vector<16x256xf32>
    %21 = arith.mulf %18, %20 : vector<16x256xf32>
    %c0_7 = arith.constant 0 : index
    %c0_8 = arith.constant 0 : index
    %22 = vector.load %arg3[%c0_7, %c0_8] : memref<1x256xf32, #tpu.memory_space<vmem>>, vector<1x256xf32>
    %23 = vector.broadcast %22 : vector<1x256xf32> to vector<16x256xf32>
    %24 = arith.addf %21, %23 : vector<16x256xf32>
    %25 = arith.truncf %24 : vector<16x256xf32> to vector<16x256xbf16>
    %c0_9 = arith.constant 0 : index
    %c0_10 = arith.constant 0 : index
    %26 = vector.load %arg4[%c0_9, %c0_10] : memref<16x256xbf16, #tpu.memory_space<vmem>>, vector<16x256xbf16>
    tpu.vector_store %arg4[%c0_9, %c0_10], %25 {strides = array<i32>} : memref<16x256xbf16, #tpu.memory_space<vmem>>, vector<16x256xbf16>,
    return
  }
  func.func @transform_0(%arg0: i32) -> (i32, i32) {
    %c0_i32 = arith.constant 0 : i32
    %c0_i32_0 = arith.constant 0 : i32
    return %arg0, %c0_i32 : i32, i32
  }
  func.func @transform_1(%arg0: i32) -> (i32, i32) {
    %c0_i32 = arith.constant 0 : i32
    %c0_i32_0 = arith.constant 0 : i32
    %c0_i32_1 = arith.constant 0 : i32
    return %c0_i32, %c0_i32_0 : i32, i32
  }
  func.func @transform_2(%arg0: i32) -> (i32, i32) {
    %c0_i32 = arith.constant 0 : i32
    %c0_i32_0 = arith.constant 0 : i32
    %c0_i32_1 = arith.constant 0 : i32
    return %c0_i32, %c0_i32_0 : i32, i32
  }
  func.func @transform_3(%arg0: i32) -> (i32, i32) {
    %c0_i32 = arith.constant 0 : i32
    %c0_i32_0 = arith.constant 0 : i32
    return %arg0, %c0_i32 : i32, i32
  }
}

module attributes {stable_mosaic.version = 11 : i64} {
  func.func @_conv_frame_kernel(%arg0: i32, %arg1: memref<1x4x82xbf16, #tpu.memory_space<vmem>>, %arg2: memref<9x8x4xbf16, #tpu.memory_space<vmem>>, %arg3: memref<8x1xf32, #tpu.memory_space<vmem>>, %arg4: memref<3x64xf32, #tpu.memory_space<vmem>>, %arg5: memref<1xf32, #tpu.memory_space<smem>>, %arg6: memref<1x8x64xbf16, #tpu.memory_space<vmem>>) attributes {dimension_semantics = [#tpu.dimension_semantics<parallel>], iteration_bounds = array<i64: 16>, scalar_prefetch = 0 : i64, scratch_operands = 0 : i64, tpu.core_type = #tpu.core_type<tc>, window_params = [{transform_indices = @transform_0, window_bounds = array<i64: 1, 4, 82>}, {pipeline_mode = #tpu.pipeline_mode<synchronous>, transform_indices = @transform_1, window_bounds = array<i64: 9, 8, 4>}, {pipeline_mode = #tpu.pipeline_mode<synchronous>, transform_indices = @transform_2, window_bounds = array<i64: 8, 1>}, {pipeline_mode = #tpu.pipeline_mode<synchronous>, transform_indices = @transform_3, window_bounds = array<i64: 3, 64>}, {transform_indices = @transform_4, window_bounds = array<i64: 1>}, {transform_indices = @transform_5, window_bounds = array<i64: 1, 8, 64>}]} {
    %c0 = arith.constant 0 : index
    %c0_0 = arith.constant 0 : index
    %c0_1 = arith.constant 0 : index
    %0 = vector.load %arg1[%c0, %c0_0, %c0_1] : memref<1x4x82xbf16, #tpu.memory_space<vmem>>, vector<1x4x64xbf16>
    %1 = vector.shape_cast %0 : vector<1x4x64xbf16> to vector<4x64xbf16>
    %c0_2 = arith.constant 0 : index
    %c0_3 = arith.constant 0 : index
    %c0_4 = arith.constant 0 : index
    %2 = vector.load %arg2[%c0_2, %c0_3, %c0_4] : memref<9x8x4xbf16, #tpu.memory_space<vmem>>, vector<1x8x4xbf16>
    %3 = vector.shape_cast %2 : vector<1x8x4xbf16> to vector<8x4xbf16>
    %cst = arith.constant dense<0.000000e+00> : vector<8x64xf32>
    %4 = tpu.matmul %3, %1, %cst {dimension_numbers = #tpu.dot_dimension_numbers<[1], [0], [0], [1], [0, 0, 1, 1], [], []>} : vector<8x4xbf16>, vector<4x64xbf16>, vector<8x64xf32> -> vector<8x64xf32>
    %c0_5 = arith.constant 0 : index
    %c0_6 = arith.constant 0 : index
    %c8 = arith.constant 8 : index
    %5 = vector.load %arg1[%c0_5, %c0_6, %c8] : memref<1x4x82xbf16, #tpu.memory_space<vmem>>, vector<1x4x64xbf16>
    %6 = vector.shape_cast %5 : vector<1x4x64xbf16> to vector<4x64xbf16>
    %c3 = arith.constant 3 : index
    %c0_7 = arith.constant 0 : index
    %c0_8 = arith.constant 0 : index
    %7 = vector.load %arg2[%c3, %c0_7, %c0_8] : memref<9x8x4xbf16, #tpu.memory_space<vmem>>, vector<1x8x4xbf16>
    %8 = vector.shape_cast %7 : vector<1x8x4xbf16> to vector<8x4xbf16>
    %cst_9 = arith.constant dense<0.000000e+00> : vector<8x64xf32>
    %9 = tpu.matmul %8, %6, %cst_9 {dimension_numbers = #tpu.dot_dimension_numbers<[1], [0], [0], [1], [0, 0, 1, 1], [], []>} : vector<8x4xbf16>, vector<4x64xbf16>, vector<8x64xf32> -> vector<8x64xf32>
    %10 = arith.addf %4, %9 : vector<8x64xf32>
    %c0_10 = arith.constant 0 : index
    %c0_11 = arith.constant 0 : index
    %c16 = arith.constant 16 : index
    %11 = vector.load %arg1[%c0_10, %c0_11, %c16] : memref<1x4x82xbf16, #tpu.memory_space<vmem>>, vector<1x4x64xbf16>
    %12 = vector.shape_cast %11 : vector<1x4x64xbf16> to vector<4x64xbf16>
    %c6 = arith.constant 6 : index
    %c0_12 = arith.constant 0 : index
    %c0_13 = arith.constant 0 : index
    %13 = vector.load %arg2[%c6, %c0_12, %c0_13] : memref<9x8x4xbf16, #tpu.memory_space<vmem>>, vector<1x8x4xbf16>
    %14 = vector.shape_cast %13 : vector<1x8x4xbf16> to vector<8x4xbf16>
    %cst_14 = arith.constant dense<0.000000e+00> : vector<8x64xf32>
    %15 = tpu.matmul %14, %12, %cst_14 {dimension_numbers = #tpu.dot_dimension_numbers<[1], [0], [0], [1], [0, 0, 1, 1], [], []>} : vector<8x4xbf16>, vector<4x64xbf16>, vector<8x64xf32> -> vector<8x64xf32>
    %16 = arith.addf %10, %15 : vector<8x64xf32>
    %c0_15 = arith.constant 0 : index
    %c0_16 = arith.constant 0 : index
    %17 = vector.load %arg4[%c0_15, %c0_16] : memref<3x64xf32, #tpu.memory_space<vmem>>, vector<1x64xf32>
    %18 = vector.broadcast %17 : vector<1x64xf32> to vector<8x64xf32>
    %19 = arith.mulf %16, %18 : vector<8x64xf32>
    %c0_17 = arith.constant 0 : index
    %c0_18 = arith.constant 0 : index
    %c1 = arith.constant 1 : index
    %20 = vector.load %arg1[%c0_17, %c0_18, %c1] : memref<1x4x82xbf16, #tpu.memory_space<vmem>>, vector<1x4x64xbf16>
    %21 = vector.shape_cast %20 : vector<1x4x64xbf16> to vector<4x64xbf16>
    %c1_19 = arith.constant 1 : index
    %c0_20 = arith.constant 0 : index
    %c0_21 = arith.constant 0 : index
    %22 = vector.load %arg2[%c1_19, %c0_20, %c0_21] : memref<9x8x4xbf16, #tpu.memory_space<vmem>>, vector<1x8x4xbf16>
    %23 = vector.shape_cast %22 : vector<1x8x4xbf16> to vector<8x4xbf16>
    %cst_22 = arith.constant dense<0.000000e+00> : vector<8x64xf32>
    %24 = tpu.matmul %23, %21, %cst_22 {dimension_numbers = #tpu.dot_dimension_numbers<[1], [0], [0], [1], [0, 0, 1, 1], [], []>} : vector<8x4xbf16>, vector<4x64xbf16>, vector<8x64xf32> -> vector<8x64xf32>
    %c0_23 = arith.constant 0 : index
    %c0_24 = arith.constant 0 : index
    %c9 = arith.constant 9 : index
    %25 = vector.load %arg1[%c0_23, %c0_24, %c9] : memref<1x4x82xbf16, #tpu.memory_space<vmem>>, vector<1x4x64xbf16>
    %26 = vector.shape_cast %25 : vector<1x4x64xbf16> to vector<4x64xbf16>
    %c4 = arith.constant 4 : index
    %c0_25 = arith.constant 0 : index
    %c0_26 = arith.constant 0 : index
    %27 = vector.load %arg2[%c4, %c0_25, %c0_26] : memref<9x8x4xbf16, #tpu.memory_space<vmem>>, vector<1x8x4xbf16>
    %28 = vector.shape_cast %27 : vector<1x8x4xbf16> to vector<8x4xbf16>
    %cst_27 = arith.constant dense<0.000000e+00> : vector<8x64xf32>
    %29 = tpu.matmul %28, %26, %cst_27 {dimension_numbers = #tpu.dot_dimension_numbers<[1], [0], [0], [1], [0, 0, 1, 1], [], []>} : vector<8x4xbf16>, vector<4x64xbf16>, vector<8x64xf32> -> vector<8x64xf32>
    %30 = arith.addf %24, %29 : vector<8x64xf32>
    %c0_28 = arith.constant 0 : index
    %c0_29 = arith.constant 0 : index
    %c17 = arith.constant 17 : index
    %31 = vector.load %arg1[%c0_28, %c0_29, %c17] : memref<1x4x82xbf16, #tpu.memory_space<vmem>>, vector<1x4x64xbf16>
    %32 = vector.shape_cast %31 : vector<1x4x64xbf16> to vector<4x64xbf16>
    %c7 = arith.constant 7 : index
    %c0_30 = arith.constant 0 : index
    %c0_31 = arith.constant 0 : index
    %33 = vector.load %arg2[%c7, %c0_30, %c0_31] : memref<9x8x4xbf16, #tpu.memory_space<vmem>>, vector<1x8x4xbf16>
    %34 = vector.shape_cast %33 : vector<1x8x4xbf16> to vector<8x4xbf16>
    %cst_32 = arith.constant dense<0.000000e+00> : vector<8x64xf32>
    %35 = tpu.matmul %34, %32, %cst_32 {dimension_numbers = #tpu.dot_dimension_numbers<[1], [0], [0], [1], [0, 0, 1, 1], [], []>} : vector<8x4xbf16>, vector<4x64xbf16>, vector<8x64xf32> -> vector<8x64xf32>
    %36 = arith.addf %30, %35 : vector<8x64xf32>
    %37 = arith.addf %19, %36 : vector<8x64xf32>
    %c0_33 = arith.constant 0 : index
    %c0_34 = arith.constant 0 : index
    %c2 = arith.constant 2 : index
    %38 = vector.load %arg1[%c0_33, %c0_34, %c2] : memref<1x4x82xbf16, #tpu.memory_space<vmem>>, vector<1x4x64xbf16>
    %39 = vector.shape_cast %38 : vector<1x4x64xbf16> to vector<4x64xbf16>
    %c2_35 = arith.constant 2 : index
    %c0_36 = arith.constant 0 : index
    %c0_37 = arith.constant 0 : index
    %40 = vector.load %arg2[%c2_35, %c0_36, %c0_37] : memref<9x8x4xbf16, #tpu.memory_space<vmem>>, vector<1x8x4xbf16>
    %41 = vector.shape_cast %40 : vector<1x8x4xbf16> to vector<8x4xbf16>
    %cst_38 = arith.constant dense<0.000000e+00> : vector<8x64xf32>
    %42 = tpu.matmul %41, %39, %cst_38 {dimension_numbers = #tpu.dot_dimension_numbers<[1], [0], [0], [1], [0, 0, 1, 1], [], []>} : vector<8x4xbf16>, vector<4x64xbf16>, vector<8x64xf32> -> vector<8x64xf32>
    %c0_39 = arith.constant 0 : index
    %c0_40 = arith.constant 0 : index
    %c10 = arith.constant 10 : index
    %43 = vector.load %arg1[%c0_39, %c0_40, %c10] : memref<1x4x82xbf16, #tpu.memory_space<vmem>>, vector<1x4x64xbf16>
    %44 = vector.shape_cast %43 : vector<1x4x64xbf16> to vector<4x64xbf16>
    %c5 = arith.constant 5 : index
    %c0_41 = arith.constant 0 : index
    %c0_42 = arith.constant 0 : index
    %45 = vector.load %arg2[%c5, %c0_41, %c0_42] : memref<9x8x4xbf16, #tpu.memory_space<vmem>>, vector<1x8x4xbf16>
    %46 = vector.shape_cast %45 : vector<1x8x4xbf16> to vector<8x4xbf16>
    %cst_43 = arith.constant dense<0.000000e+00> : vector<8x64xf32>
    %47 = tpu.matmul %46, %44, %cst_43 {dimension_numbers = #tpu.dot_dimension_numbers<[1], [0], [0], [1], [0, 0, 1, 1], [], []>} : vector<8x4xbf16>, vector<4x64xbf16>, vector<8x64xf32> -> vector<8x64xf32>
    %48 = arith.addf %42, %47 : vector<8x64xf32>
    %c0_44 = arith.constant 0 : index
    %c0_45 = arith.constant 0 : index
    %c18 = arith.constant 18 : index
    %49 = vector.load %arg1[%c0_44, %c0_45, %c18] : memref<1x4x82xbf16, #tpu.memory_space<vmem>>, vector<1x4x64xbf16>
    %50 = vector.shape_cast %49 : vector<1x4x64xbf16> to vector<4x64xbf16>
    %c8_46 = arith.constant 8 : index
    %c0_47 = arith.constant 0 : index
    %c0_48 = arith.constant 0 : index
    %51 = vector.load %arg2[%c8_46, %c0_47, %c0_48] : memref<9x8x4xbf16, #tpu.memory_space<vmem>>, vector<1x8x4xbf16>
    %52 = vector.shape_cast %51 : vector<1x8x4xbf16> to vector<8x4xbf16>
    %cst_49 = arith.constant dense<0.000000e+00> : vector<8x64xf32>
    %53 = tpu.matmul %52, %50, %cst_49 {dimension_numbers = #tpu.dot_dimension_numbers<[1], [0], [0], [1], [0, 0, 1, 1], [], []>} : vector<8x4xbf16>, vector<4x64xbf16>, vector<8x64xf32> -> vector<8x64xf32>
    %54 = arith.addf %48, %53 : vector<8x64xf32>
    %c2_50 = arith.constant 2 : index
    %c0_51 = arith.constant 0 : index
    %55 = vector.load %arg4[%c2_50, %c0_51] : memref<3x64xf32, #tpu.memory_space<vmem>>, vector<1x64xf32>
    %56 = vector.broadcast %55 : vector<1x64xf32> to vector<8x64xf32>
    %57 = arith.mulf %54, %56 : vector<8x64xf32>
    %58 = arith.addf %37, %57 : vector<8x64xf32>
    %c0_52 = arith.constant 0 : index
    %c0_53 = arith.constant 0 : index
    %59 = vector.load %arg3[%c0_52, %c0_53] : memref<8x1xf32, #tpu.memory_space<vmem>>, vector<8x1xf32>
    %60 = vector.broadcast %59 : vector<8x1xf32> to vector<8x64xf32>
    %61 = arith.addf %58, %60 : vector<8x64xf32>
    %c0_54 = arith.constant 0 : index
    %62 = memref.load %arg5[%c0_54] : memref<1xf32, #tpu.memory_space<smem>>
    %63 = vector.broadcast %62 : f32 to vector<8x64xf32>
    %64 = arith.mulf %61, %63 : vector<8x64xf32>
    %65 = arith.negf %64 : vector<8x64xf32>
    %66 = math.exp %65 : vector<8x64xf32>
    %cst_55 = arith.constant 1.000000e+00 : f32
    %67 = vector.broadcast %cst_55 : f32 to vector<8x64xf32>
    %68 = arith.addf %67, %66 : vector<8x64xf32>
    %69 = arith.divf %67, %68 : vector<8x64xf32>
    %70 = arith.mulf %61, %69 : vector<8x64xf32>
    %71 = arith.truncf %70 : vector<8x64xf32> to vector<8x64xbf16>
    %c0_56 = arith.constant 0 : index
    %c0_57 = arith.constant 0 : index
    %c0_58 = arith.constant 0 : index
    %72 = vector.load %arg6[%c0_56, %c0_57, %c0_58] : memref<1x8x64xbf16, #tpu.memory_space<vmem>>, vector<1x8x64xbf16>
    %73 = vector.shape_cast %72 : vector<1x8x64xbf16> to vector<8x64xbf16>
    %74 = vector.shape_cast %71 : vector<8x64xbf16> to vector<1x8x64xbf16>
    tpu.vector_store %arg6[%c0_56, %c0_57, %c0_58], %74 {strides = array<i32>} : memref<1x8x64xbf16, #tpu.memory_space<vmem>>, vector<1x8x64xbf16>,
    return
  }
  func.func @transform_0(%arg0: i32) -> (i32, i32, i32) {
    %c0_i32 = arith.constant 0 : i32
    %c0_i32_0 = arith.constant 0 : i32
    %c0_i32_1 = arith.constant 0 : i32
    return %arg0, %c0_i32, %c0_i32_0 : i32, i32, i32
  }
  func.func @transform_1(%arg0: i32) -> (i32, i32, i32) {
    %c0_i32 = arith.constant 0 : i32
    %c0_i32_0 = arith.constant 0 : i32
    %c0_i32_1 = arith.constant 0 : i32
    %c0_i32_2 = arith.constant 0 : i32
    return %c0_i32, %c0_i32_0, %c0_i32_1 : i32, i32, i32
  }
  func.func @transform_2(%arg0: i32) -> (i32, i32) {
    %c0_i32 = arith.constant 0 : i32
    %c0_i32_0 = arith.constant 0 : i32
    %c0_i32_1 = arith.constant 0 : i32
    return %c0_i32, %c0_i32_0 : i32, i32
  }
  func.func @transform_3(%arg0: i32) -> (i32, i32) {
    %c0_i32 = arith.constant 0 : i32
    %c0_i32_0 = arith.constant 0 : i32
    %c0_i32_1 = arith.constant 0 : i32
    return %c0_i32, %c0_i32_0 : i32, i32
  }
  func.func @transform_4(%arg0: i32) -> i32 {
    %c0_i32 = arith.constant 0 : i32
    %c0_i32_0 = arith.constant 0 : i32
    return %c0_i32 : i32
  }
  func.func @transform_5(%arg0: i32) -> (i32, i32, i32) {
    %c0_i32 = arith.constant 0 : i32
    %c0_i32_0 = arith.constant 0 : i32
    %c0_i32_1 = arith.constant 0 : i32
    return %arg0, %c0_i32, %c0_i32_0 : i32, i32, i32
  }
}

module attributes {stable_mosaic.version = 11 : i64} {
  func.func @_conv_frame_kernel(%arg0: i32, %arg1: memref<1x8x82xbf16, #tpu.memory_space<vmem>>, %arg2: memref<9x4x8xbf16, #tpu.memory_space<vmem>>, %arg3: memref<4x1xf32, #tpu.memory_space<vmem>>, %arg4: memref<3x64xf32, #tpu.memory_space<vmem>>, %arg5: memref<1x4x64xbf16, #tpu.memory_space<vmem>>) attributes {dimension_semantics = [#tpu.dimension_semantics<parallel>], iteration_bounds = array<i64: 16>, scalar_prefetch = 0 : i64, scratch_operands = 0 : i64, tpu.core_type = #tpu.core_type<tc>, window_params = [{transform_indices = @transform_0, window_bounds = array<i64: 1, 8, 82>}, {pipeline_mode = #tpu.pipeline_mode<synchronous>, transform_indices = @transform_1, window_bounds = array<i64: 9, 4, 8>}, {pipeline_mode = #tpu.pipeline_mode<synchronous>, transform_indices = @transform_2, window_bounds = array<i64: 4, 1>}, {pipeline_mode = #tpu.pipeline_mode<synchronous>, transform_indices = @transform_3, window_bounds = array<i64: 3, 64>}, {transform_indices = @transform_4, window_bounds = array<i64: 1, 4, 64>}]} {
    %c0 = arith.constant 0 : index
    %c0_0 = arith.constant 0 : index
    %c0_1 = arith.constant 0 : index
    %0 = vector.load %arg1[%c0, %c0_0, %c0_1] : memref<1x8x82xbf16, #tpu.memory_space<vmem>>, vector<1x8x64xbf16>
    %1 = vector.shape_cast %0 : vector<1x8x64xbf16> to vector<8x64xbf16>
    %c0_2 = arith.constant 0 : index
    %c0_3 = arith.constant 0 : index
    %c0_4 = arith.constant 0 : index
    %2 = vector.load %arg2[%c0_2, %c0_3, %c0_4] : memref<9x4x8xbf16, #tpu.memory_space<vmem>>, vector<1x4x8xbf16>
    %3 = vector.shape_cast %2 : vector<1x4x8xbf16> to vector<4x8xbf16>
    %cst = arith.constant dense<0.000000e+00> : vector<4x64xf32>
    %4 = tpu.matmul %3, %1, %cst {dimension_numbers = #tpu.dot_dimension_numbers<[1], [0], [0], [1], [0, 0, 1, 1], [], []>} : vector<4x8xbf16>, vector<8x64xbf16>, vector<4x64xf32> -> vector<4x64xf32>
    %c0_5 = arith.constant 0 : index
    %c0_6 = arith.constant 0 : index
    %c8 = arith.constant 8 : index
    %5 = vector.load %arg1[%c0_5, %c0_6, %c8] : memref<1x8x82xbf16, #tpu.memory_space<vmem>>, vector<1x8x64xbf16>
    %6 = vector.shape_cast %5 : vector<1x8x64xbf16> to vector<8x64xbf16>
    %c3 = arith.constant 3 : index
    %c0_7 = arith.constant 0 : index
    %c0_8 = arith.constant 0 : index
    %7 = vector.load %arg2[%c3, %c0_7, %c0_8] : memref<9x4x8xbf16, #tpu.memory_space<vmem>>, vector<1x4x8xbf16>
    %8 = vector.shape_cast %7 : vector<1x4x8xbf16> to vector<4x8xbf16>
    %cst_9 = arith.constant dense<0.000000e+00> : vector<4x64xf32>
    %9 = tpu.matmul %8, %6, %cst_9 {dimension_numbers = #tpu.dot_dimension_numbers<[1], [0], [0], [1], [0, 0, 1, 1], [], []>} : vector<4x8xbf16>, vector<8x64xbf16>, vector<4x64xf32> -> vector<4x64xf32>
    %10 = arith.addf %4, %9 : vector<4x64xf32>
    %c0_10 = arith.constant 0 : index
    %c0_11 = arith.constant 0 : index
    %c16 = arith.constant 16 : index
    %11 = vector.load %arg1[%c0_10, %c0_11, %c16] : memref<1x8x82xbf16, #tpu.memory_space<vmem>>, vector<1x8x64xbf16>
    %12 = vector.shape_cast %11 : vector<1x8x64xbf16> to vector<8x64xbf16>
    %c6 = arith.constant 6 : index
    %c0_12 = arith.constant 0 : index
    %c0_13 = arith.constant 0 : index
    %13 = vector.load %arg2[%c6, %c0_12, %c0_13] : memref<9x4x8xbf16, #tpu.memory_space<vmem>>, vector<1x4x8xbf16>
    %14 = vector.shape_cast %13 : vector<1x4x8xbf16> to vector<4x8xbf16>
    %cst_14 = arith.constant dense<0.000000e+00> : vector<4x64xf32>
    %15 = tpu.matmul %14, %12, %cst_14 {dimension_numbers = #tpu.dot_dimension_numbers<[1], [0], [0], [1], [0, 0, 1, 1], [], []>} : vector<4x8xbf16>, vector<8x64xbf16>, vector<4x64xf32> -> vector<4x64xf32>
    %16 = arith.addf %10, %15 : vector<4x64xf32>
    %c0_15 = arith.constant 0 : index
    %c0_16 = arith.constant 0 : index
    %17 = vector.load %arg4[%c0_15, %c0_16] : memref<3x64xf32, #tpu.memory_space<vmem>>, vector<1x64xf32>
    %18 = vector.broadcast %17 : vector<1x64xf32> to vector<4x64xf32>
    %19 = arith.mulf %16, %18 : vector<4x64xf32>
    %c0_17 = arith.constant 0 : index
    %c0_18 = arith.constant 0 : index
    %c1 = arith.constant 1 : index
    %20 = vector.load %arg1[%c0_17, %c0_18, %c1] : memref<1x8x82xbf16, #tpu.memory_space<vmem>>, vector<1x8x64xbf16>
    %21 = vector.shape_cast %20 : vector<1x8x64xbf16> to vector<8x64xbf16>
    %c1_19 = arith.constant 1 : index
    %c0_20 = arith.constant 0 : index
    %c0_21 = arith.constant 0 : index
    %22 = vector.load %arg2[%c1_19, %c0_20, %c0_21] : memref<9x4x8xbf16, #tpu.memory_space<vmem>>, vector<1x4x8xbf16>
    %23 = vector.shape_cast %22 : vector<1x4x8xbf16> to vector<4x8xbf16>
    %cst_22 = arith.constant dense<0.000000e+00> : vector<4x64xf32>
    %24 = tpu.matmul %23, %21, %cst_22 {dimension_numbers = #tpu.dot_dimension_numbers<[1], [0], [0], [1], [0, 0, 1, 1], [], []>} : vector<4x8xbf16>, vector<8x64xbf16>, vector<4x64xf32> -> vector<4x64xf32>
    %c0_23 = arith.constant 0 : index
    %c0_24 = arith.constant 0 : index
    %c9 = arith.constant 9 : index
    %25 = vector.load %arg1[%c0_23, %c0_24, %c9] : memref<1x8x82xbf16, #tpu.memory_space<vmem>>, vector<1x8x64xbf16>
    %26 = vector.shape_cast %25 : vector<1x8x64xbf16> to vector<8x64xbf16>
    %c4 = arith.constant 4 : index
    %c0_25 = arith.constant 0 : index
    %c0_26 = arith.constant 0 : index
    %27 = vector.load %arg2[%c4, %c0_25, %c0_26] : memref<9x4x8xbf16, #tpu.memory_space<vmem>>, vector<1x4x8xbf16>
    %28 = vector.shape_cast %27 : vector<1x4x8xbf16> to vector<4x8xbf16>
    %cst_27 = arith.constant dense<0.000000e+00> : vector<4x64xf32>
    %29 = tpu.matmul %28, %26, %cst_27 {dimension_numbers = #tpu.dot_dimension_numbers<[1], [0], [0], [1], [0, 0, 1, 1], [], []>} : vector<4x8xbf16>, vector<8x64xbf16>, vector<4x64xf32> -> vector<4x64xf32>
    %30 = arith.addf %24, %29 : vector<4x64xf32>
    %c0_28 = arith.constant 0 : index
    %c0_29 = arith.constant 0 : index
    %c17 = arith.constant 17 : index
    %31 = vector.load %arg1[%c0_28, %c0_29, %c17] : memref<1x8x82xbf16, #tpu.memory_space<vmem>>, vector<1x8x64xbf16>
    %32 = vector.shape_cast %31 : vector<1x8x64xbf16> to vector<8x64xbf16>
    %c7 = arith.constant 7 : index
    %c0_30 = arith.constant 0 : index
    %c0_31 = arith.constant 0 : index
    %33 = vector.load %arg2[%c7, %c0_30, %c0_31] : memref<9x4x8xbf16, #tpu.memory_space<vmem>>, vector<1x4x8xbf16>
    %34 = vector.shape_cast %33 : vector<1x4x8xbf16> to vector<4x8xbf16>
    %cst_32 = arith.constant dense<0.000000e+00> : vector<4x64xf32>
    %35 = tpu.matmul %34, %32, %cst_32 {dimension_numbers = #tpu.dot_dimension_numbers<[1], [0], [0], [1], [0, 0, 1, 1], [], []>} : vector<4x8xbf16>, vector<8x64xbf16>, vector<4x64xf32> -> vector<4x64xf32>
    %36 = arith.addf %30, %35 : vector<4x64xf32>
    %37 = arith.addf %19, %36 : vector<4x64xf32>
    %c0_33 = arith.constant 0 : index
    %c0_34 = arith.constant 0 : index
    %c2 = arith.constant 2 : index
    %38 = vector.load %arg1[%c0_33, %c0_34, %c2] : memref<1x8x82xbf16, #tpu.memory_space<vmem>>, vector<1x8x64xbf16>
    %39 = vector.shape_cast %38 : vector<1x8x64xbf16> to vector<8x64xbf16>
    %c2_35 = arith.constant 2 : index
    %c0_36 = arith.constant 0 : index
    %c0_37 = arith.constant 0 : index
    %40 = vector.load %arg2[%c2_35, %c0_36, %c0_37] : memref<9x4x8xbf16, #tpu.memory_space<vmem>>, vector<1x4x8xbf16>
    %41 = vector.shape_cast %40 : vector<1x4x8xbf16> to vector<4x8xbf16>
    %cst_38 = arith.constant dense<0.000000e+00> : vector<4x64xf32>
    %42 = tpu.matmul %41, %39, %cst_38 {dimension_numbers = #tpu.dot_dimension_numbers<[1], [0], [0], [1], [0, 0, 1, 1], [], []>} : vector<4x8xbf16>, vector<8x64xbf16>, vector<4x64xf32> -> vector<4x64xf32>
    %c0_39 = arith.constant 0 : index
    %c0_40 = arith.constant 0 : index
    %c10 = arith.constant 10 : index
    %43 = vector.load %arg1[%c0_39, %c0_40, %c10] : memref<1x8x82xbf16, #tpu.memory_space<vmem>>, vector<1x8x64xbf16>
    %44 = vector.shape_cast %43 : vector<1x8x64xbf16> to vector<8x64xbf16>
    %c5 = arith.constant 5 : index
    %c0_41 = arith.constant 0 : index
    %c0_42 = arith.constant 0 : index
    %45 = vector.load %arg2[%c5, %c0_41, %c0_42] : memref<9x4x8xbf16, #tpu.memory_space<vmem>>, vector<1x4x8xbf16>
    %46 = vector.shape_cast %45 : vector<1x4x8xbf16> to vector<4x8xbf16>
    %cst_43 = arith.constant dense<0.000000e+00> : vector<4x64xf32>
    %47 = tpu.matmul %46, %44, %cst_43 {dimension_numbers = #tpu.dot_dimension_numbers<[1], [0], [0], [1], [0, 0, 1, 1], [], []>} : vector<4x8xbf16>, vector<8x64xbf16>, vector<4x64xf32> -> vector<4x64xf32>
    %48 = arith.addf %42, %47 : vector<4x64xf32>
    %c0_44 = arith.constant 0 : index
    %c0_45 = arith.constant 0 : index
    %c18 = arith.constant 18 : index
    %49 = vector.load %arg1[%c0_44, %c0_45, %c18] : memref<1x8x82xbf16, #tpu.memory_space<vmem>>, vector<1x8x64xbf16>
    %50 = vector.shape_cast %49 : vector<1x8x64xbf16> to vector<8x64xbf16>
    %c8_46 = arith.constant 8 : index
    %c0_47 = arith.constant 0 : index
    %c0_48 = arith.constant 0 : index
    %51 = vector.load %arg2[%c8_46, %c0_47, %c0_48] : memref<9x4x8xbf16, #tpu.memory_space<vmem>>, vector<1x4x8xbf16>
    %52 = vector.shape_cast %51 : vector<1x4x8xbf16> to vector<4x8xbf16>
    %cst_49 = arith.constant dense<0.000000e+00> : vector<4x64xf32>
    %53 = tpu.matmul %52, %50, %cst_49 {dimension_numbers = #tpu.dot_dimension_numbers<[1], [0], [0], [1], [0, 0, 1, 1], [], []>} : vector<4x8xbf16>, vector<8x64xbf16>, vector<4x64xf32> -> vector<4x64xf32>
    %54 = arith.addf %48, %53 : vector<4x64xf32>
    %c2_50 = arith.constant 2 : index
    %c0_51 = arith.constant 0 : index
    %55 = vector.load %arg4[%c2_50, %c0_51] : memref<3x64xf32, #tpu.memory_space<vmem>>, vector<1x64xf32>
    %56 = vector.broadcast %55 : vector<1x64xf32> to vector<4x64xf32>
    %57 = arith.mulf %54, %56 : vector<4x64xf32>
    %58 = arith.addf %37, %57 : vector<4x64xf32>
    %c0_52 = arith.constant 0 : index
    %c0_53 = arith.constant 0 : index
    %59 = vector.load %arg3[%c0_52, %c0_53] : memref<4x1xf32, #tpu.memory_space<vmem>>, vector<4x1xf32>
    %60 = vector.broadcast %59 : vector<4x1xf32> to vector<4x64xf32>
    %61 = arith.addf %58, %60 : vector<4x64xf32>
    %62 = arith.truncf %61 : vector<4x64xf32> to vector<4x64xbf16>
    %c0_54 = arith.constant 0 : index
    %c0_55 = arith.constant 0 : index
    %c0_56 = arith.constant 0 : index
    %63 = vector.load %arg5[%c0_54, %c0_55, %c0_56] : memref<1x4x64xbf16, #tpu.memory_space<vmem>>, vector<1x4x64xbf16>
    %64 = vector.shape_cast %63 : vector<1x4x64xbf16> to vector<4x64xbf16>
    %65 = vector.shape_cast %62 : vector<4x64xbf16> to vector<1x4x64xbf16>
    tpu.vector_store %arg5[%c0_54, %c0_55, %c0_56], %65 {strides = array<i32>} : memref<1x4x64xbf16, #tpu.memory_space<vmem>>, vector<1x4x64xbf16>,
    return
  }
  func.func @transform_0(%arg0: i32) -> (i32, i32, i32) {
    %c0_i32 = arith.constant 0 : i32
    %c0_i32_0 = arith.constant 0 : i32
    %c0_i32_1 = arith.constant 0 : i32
    return %arg0, %c0_i32, %c0_i32_0 : i32, i32, i32
  }
  func.func @transform_1(%arg0: i32) -> (i32, i32, i32) {
    %c0_i32 = arith.constant 0 : i32
    %c0_i32_0 = arith.constant 0 : i32
    %c0_i32_1 = arith.constant 0 : i32
    %c0_i32_2 = arith.constant 0 : i32
    return %c0_i32, %c0_i32_0, %c0_i32_1 : i32, i32, i32
  }
  func.func @transform_2(%arg0: i32) -> (i32, i32) {
    %c0_i32 = arith.constant 0 : i32
    %c0_i32_0 = arith.constant 0 : i32
    %c0_i32_1 = arith.constant 0 : i32
    return %c0_i32, %c0_i32_0 : i32, i32
  }
  func.func @transform_3(%arg0: i32) -> (i32, i32) {
    %c0_i32 = arith.constant 0 : i32
    %c0_i32_0 = arith.constant 0 : i32
    %c0_i32_1 = arith.constant 0 : i32
    return %c0_i32, %c0_i32_0 : i32, i32
  }
  func.func @transform_4(%arg0: i32) -> (i32, i32, i32) {
    %c0_i32 = arith.constant 0 : i32
    %c0_i32_0 = arith.constant 0 : i32
    %c0_i32_1 = arith.constant 0 : i32
    return %arg0, %c0_i32, %c0_i32_0 : i32, i32, i32
  }
}

module attributes {stable_mosaic.version = 11 : i64} {
  func.func @_ln_res_ln_kernel(%arg0: i32, %arg1: memref<16x256xbf16, #tpu.memory_space<vmem>>, %arg2: memref<1x256xf32, #tpu.memory_space<vmem>>, %arg3: memref<1x256xf32, #tpu.memory_space<vmem>>, %arg4: memref<16x256xf32, #tpu.memory_space<vmem>>, %arg5: memref<1x256xf32, #tpu.memory_space<vmem>>, %arg6: memref<1x256xf32, #tpu.memory_space<vmem>>, %arg7: memref<16x256xf32, #tpu.memory_space<vmem>>, %arg8: memref<16x256xbf16, #tpu.memory_space<vmem>>) attributes {dimension_semantics = [#tpu.dimension_semantics<parallel>], iteration_bounds = array<i64: 1>, scalar_prefetch = 0 : i64, scratch_operands = 0 : i64, tpu.core_type = #tpu.core_type<tc>, window_params = [{transform_indices = @transform_0, window_bounds = array<i64: 16, 256>}, {pipeline_mode = #tpu.pipeline_mode<synchronous>, transform_indices = @transform_1, window_bounds = array<i64: 1, 256>}, {pipeline_mode = #tpu.pipeline_mode<synchronous>, transform_indices = @transform_2, window_bounds = array<i64: 1, 256>}, {transform_indices = @transform_3, window_bounds = array<i64: 16, 256>}, {pipeline_mode = #tpu.pipeline_mode<synchronous>, transform_indices = @transform_4, window_bounds = array<i64: 1, 256>}, {pipeline_mode = #tpu.pipeline_mode<synchronous>, transform_indices = @transform_5, window_bounds = array<i64: 1, 256>}, {transform_indices = @transform_6, window_bounds = array<i64: 16, 256>}, {transform_indices = @transform_7, window_bounds = array<i64: 16, 256>}]} {
    %c0 = arith.constant 0 : index
    %c0_0 = arith.constant 0 : index
    %0 = vector.load %arg1[%c0, %c0_0] : memref<16x256xbf16, #tpu.memory_space<vmem>>, vector<16x256xbf16>
    %1 = arith.extf %0 : vector<16x256xbf16> to vector<16x256xf32>
    %cst = arith.constant dense<0.000000e+00> : vector<16xf32>
    %2 = vector.multi_reduction <add>, %1, %cst [1] : vector<16x256xf32> to vector<16xf32>
    %3 = vector.shape_cast %2 : vector<16xf32> to vector<16x1xf32>
    %cst_1 = arith.constant 2.560000e+02 : f32
    %4 = vector.broadcast %cst_1 : f32 to vector<16x1xf32>
    %5 = arith.divf %3, %4 : vector<16x1xf32>
    %6 = vector.broadcast %5 : vector<16x1xf32> to vector<16x256xf32>
    %7 = arith.subf %1, %6 : vector<16x256xf32>
    %8 = arith.mulf %7, %7 : vector<16x256xf32>
    %cst_2 = arith.constant dense<0.000000e+00> : vector<16xf32>
    %9 = vector.multi_reduction <add>, %8, %cst_2 [1] : vector<16x256xf32> to vector<16xf32>
    %10 = vector.shape_cast %9 : vector<16xf32> to vector<16x1xf32>
    %cst_3 = arith.constant 2.560000e+02 : f32
    %11 = vector.broadcast %cst_3 : f32 to vector<16x1xf32>
    %12 = arith.divf %10, %11 : vector<16x1xf32>
    %13 = vector.broadcast %5 : vector<16x1xf32> to vector<16x256xf32>
    %14 = arith.subf %1, %13 : vector<16x256xf32>
    %cst_4 = arith.constant 9.99999974E-6 : f32
    %15 = vector.broadcast %cst_4 : f32 to vector<16x1xf32>
    %16 = arith.addf %12, %15 : vector<16x1xf32>
    %17 = math.rsqrt %16 : vector<16x1xf32>
    %18 = vector.broadcast %17 : vector<16x1xf32> to vector<16x256xf32>
    %19 = arith.mulf %14, %18 : vector<16x256xf32>
    %c0_5 = arith.constant 0 : index
    %c0_6 = arith.constant 0 : index
    %20 = vector.load %arg2[%c0_5, %c0_6] : memref<1x256xf32, #tpu.memory_space<vmem>>, vector<1x256xf32>
    %21 = vector.broadcast %20 : vector<1x256xf32> to vector<16x256xf32>
    %22 = arith.mulf %19, %21 : vector<16x256xf32>
    %c0_7 = arith.constant 0 : index
    %c0_8 = arith.constant 0 : index
    %23 = vector.load %arg3[%c0_7, %c0_8] : memref<1x256xf32, #tpu.memory_space<vmem>>, vector<1x256xf32>
    %24 = vector.broadcast %23 : vector<1x256xf32> to vector<16x256xf32>
    %25 = arith.addf %22, %24 : vector<16x256xf32>
    %c0_9 = arith.constant 0 : index
    %c0_10 = arith.constant 0 : index
    %26 = vector.load %arg4[%c0_9, %c0_10] : memref<16x256xf32, #tpu.memory_space<vmem>>, vector<16x256xf32>
    %27 = arith.addf %25, %26 : vector<16x256xf32>
    %c0_11 = arith.constant 0 : index
    %c0_12 = arith.constant 0 : index
    %28 = vector.load %arg7[%c0_11, %c0_12] : memref<16x256xf32, #tpu.memory_space<vmem>>, vector<16x256xf32>
    tpu.vector_store %arg7[%c0_11, %c0_12], %27 {strides = array<i32>} : memref<16x256xf32, #tpu.memory_space<vmem>>, vector<16x256xf32>,
    %cst_13 = arith.constant dense<0.000000e+00> : vector<16xf32>
    %29 = vector.multi_reduction <add>, %27, %cst_13 [1] : vector<16x256xf32> to vector<16xf32>
    %30 = vector.shape_cast %29 : vector<16xf32> to vector<16x1xf32>
    %cst_14 = arith.constant 2.560000e+02 : f32
    %31 = vector.broadcast %cst_14 : f32 to vector<16x1xf32>
    %32 = arith.divf %30, %31 : vector<16x1xf32>
    %33 = vector.broadcast %32 : vector<16x1xf32> to vector<16x256xf32>
    %34 = arith.subf %27, %33 : vector<16x256xf32>
    %35 = arith.mulf %34, %34 : vector<16x256xf32>
    %cst_15 = arith.constant dense<0.000000e+00> : vector<16xf32>
    %36 = vector.multi_reduction <add>, %35, %cst_15 [1] : vector<16x256xf32> to vector<16xf32>
    %37 = vector.shape_cast %36 : vector<16xf32> to vector<16x1xf32>
    %cst_16 = arith.constant 2.560000e+02 : f32
    %38 = vector.broadcast %cst_16 : f32 to vector<16x1xf32>
    %39 = arith.divf %37, %38 : vector<16x1xf32>
    %40 = vector.broadcast %32 : vector<16x1xf32> to vector<16x256xf32>
    %41 = arith.subf %27, %40 : vector<16x256xf32>
    %cst_17 = arith.constant 9.99999974E-6 : f32
    %42 = vector.broadcast %cst_17 : f32 to vector<16x1xf32>
    %43 = arith.addf %39, %42 : vector<16x1xf32>
    %44 = math.rsqrt %43 : vector<16x1xf32>
    %45 = vector.broadcast %44 : vector<16x1xf32> to vector<16x256xf32>
    %46 = arith.mulf %41, %45 : vector<16x256xf32>
    %c0_18 = arith.constant 0 : index
    %c0_19 = arith.constant 0 : index
    %47 = vector.load %arg5[%c0_18, %c0_19] : memref<1x256xf32, #tpu.memory_space<vmem>>, vector<1x256xf32>
    %48 = vector.broadcast %47 : vector<1x256xf32> to vector<16x256xf32>
    %49 = arith.mulf %46, %48 : vector<16x256xf32>
    %c0_20 = arith.constant 0 : index
    %c0_21 = arith.constant 0 : index
    %50 = vector.load %arg6[%c0_20, %c0_21] : memref<1x256xf32, #tpu.memory_space<vmem>>, vector<1x256xf32>
    %51 = vector.broadcast %50 : vector<1x256xf32> to vector<16x256xf32>
    %52 = arith.addf %49, %51 : vector<16x256xf32>
    %53 = arith.truncf %52 : vector<16x256xf32> to vector<16x256xbf16>
    %c0_22 = arith.constant 0 : index
    %c0_23 = arith.constant 0 : index
    %54 = vector.load %arg8[%c0_22, %c0_23] : memref<16x256xbf16, #tpu.memory_space<vmem>>, vector<16x256xbf16>
    tpu.vector_store %arg8[%c0_22, %c0_23], %53 {strides = array<i32>} : memref<16x256xbf16, #tpu.memory_space<vmem>>, vector<16x256xbf16>,
    return
  }
  func.func @transform_0(%arg0: i32) -> (i32, i32) {
    %c0_i32 = arith.constant 0 : i32
    %c0_i32_0 = arith.constant 0 : i32
    return %arg0, %c0_i32 : i32, i32
  }
  func.func @transform_1(%arg0: i32) -> (i32, i32) {
    %c0_i32 = arith.constant 0 : i32
    %c0_i32_0 = arith.constant 0 : i32
    %c0_i32_1 = arith.constant 0 : i32
    return %c0_i32, %c0_i32_0 : i32, i32
  }
  func.func @transform_2(%arg0: i32) -> (i32, i32) {
    %c0_i32 = arith.constant 0 : i32
    %c0_i32_0 = arith.constant 0 : i32
    %c0_i32_1 = arith.constant 0 : i32
    return %c0_i32, %c0_i32_0 : i32, i32
  }
  func.func @transform_3(%arg0: i32) -> (i32, i32) {
    %c0_i32 = arith.constant 0 : i32
    %c0_i32_0 = arith.constant 0 : i32
    return %arg0, %c0_i32 : i32, i32
  }
  func.func @transform_4(%arg0: i32) -> (i32, i32) {
    %c0_i32 = arith.constant 0 : i32
    %c0_i32_0 = arith.constant 0 : i32
    %c0_i32_1 = arith.constant 0 : i32
    return %c0_i32, %c0_i32_0 : i32, i32
  }
  func.func @transform_5(%arg0: i32) -> (i32, i32) {
    %c0_i32 = arith.constant 0 : i32
    %c0_i32_0 = arith.constant 0 : i32
    %c0_i32_1 = arith.constant 0 : i32
    return %c0_i32, %c0_i32_0 : i32, i32
  }
  func.func @transform_6(%arg0: i32) -> (i32, i32) {
    %c0_i32 = arith.constant 0 : i32
    %c0_i32_0 = arith.constant 0 : i32
    return %arg0, %c0_i32 : i32, i32
  }
  func.func @transform_7(%arg0: i32) -> (i32, i32) {
    %c0_i32 = arith.constant 0 : i32
    %c0_i32_0 = arith.constant 0 : i32
    return %arg0, %c0_i32 : i32, i32
  }
}

module attributes {stable_mosaic.version = 11 : i64} {
  func.func @_conv_frame_kernel(%arg0: i32, %arg1: memref<1x4x82xbf16, #tpu.memory_space<vmem>>, %arg2: memref<9x24x4xbf16, #tpu.memory_space<vmem>>, %arg3: memref<24x1xf32, #tpu.memory_space<vmem>>, %arg4: memref<3x64xf32, #tpu.memory_space<vmem>>, %arg5: memref<1x24x64xbf16, #tpu.memory_space<vmem>>) attributes {dimension_semantics = [#tpu.dimension_semantics<parallel>], iteration_bounds = array<i64: 16>, scalar_prefetch = 0 : i64, scratch_operands = 0 : i64, tpu.core_type = #tpu.core_type<tc>, window_params = [{transform_indices = @transform_0, window_bounds = array<i64: 1, 4, 82>}, {pipeline_mode = #tpu.pipeline_mode<synchronous>, transform_indices = @transform_1, window_bounds = array<i64: 9, 24, 4>}, {pipeline_mode = #tpu.pipeline_mode<synchronous>, transform_indices = @transform_2, window_bounds = array<i64: 24, 1>}, {pipeline_mode = #tpu.pipeline_mode<synchronous>, transform_indices = @transform_3, window_bounds = array<i64: 3, 64>}, {transform_indices = @transform_4, window_bounds = array<i64: 1, 24, 64>}]} {
    %c0 = arith.constant 0 : index
    %c0_0 = arith.constant 0 : index
    %c0_1 = arith.constant 0 : index
    %0 = vector.load %arg1[%c0, %c0_0, %c0_1] : memref<1x4x82xbf16, #tpu.memory_space<vmem>>, vector<1x4x64xbf16>
    %1 = vector.shape_cast %0 : vector<1x4x64xbf16> to vector<4x64xbf16>
    %c0_2 = arith.constant 0 : index
    %c0_3 = arith.constant 0 : index
    %c0_4 = arith.constant 0 : index
    %2 = vector.load %arg2[%c0_2, %c0_3, %c0_4] : memref<9x24x4xbf16, #tpu.memory_space<vmem>>, vector<1x24x4xbf16>
    %3 = vector.shape_cast %2 : vector<1x24x4xbf16> to vector<24x4xbf16>
    %cst = arith.constant dense<0.000000e+00> : vector<24x64xf32>
    %4 = tpu.matmul %3, %1, %cst {dimension_numbers = #tpu.dot_dimension_numbers<[1], [0], [0], [1], [0, 0, 1, 1], [], []>} : vector<24x4xbf16>, vector<4x64xbf16>, vector<24x64xf32> -> vector<24x64xf32>
    %c0_5 = arith.constant 0 : index
    %c0_6 = arith.constant 0 : index
    %c8 = arith.constant 8 : index
    %5 = vector.load %arg1[%c0_5, %c0_6, %c8] : memref<1x4x82xbf16, #tpu.memory_space<vmem>>, vector<1x4x64xbf16>
    %6 = vector.shape_cast %5 : vector<1x4x64xbf16> to vector<4x64xbf16>
    %c3 = arith.constant 3 : index
    %c0_7 = arith.constant 0 : index
    %c0_8 = arith.constant 0 : index
    %7 = vector.load %arg2[%c3, %c0_7, %c0_8] : memref<9x24x4xbf16, #tpu.memory_space<vmem>>, vector<1x24x4xbf16>
    %8 = vector.shape_cast %7 : vector<1x24x4xbf16> to vector<24x4xbf16>
    %cst_9 = arith.constant dense<0.000000e+00> : vector<24x64xf32>
    %9 = tpu.matmul %8, %6, %cst_9 {dimension_numbers = #tpu.dot_dimension_numbers<[1], [0], [0], [1], [0, 0, 1, 1], [], []>} : vector<24x4xbf16>, vector<4x64xbf16>, vector<24x64xf32> -> vector<24x64xf32>
    %10 = arith.addf %4, %9 : vector<24x64xf32>
    %c0_10 = arith.constant 0 : index
    %c0_11 = arith.constant 0 : index
    %c16 = arith.constant 16 : index
    %11 = vector.load %arg1[%c0_10, %c0_11, %c16] : memref<1x4x82xbf16, #tpu.memory_space<vmem>>, vector<1x4x64xbf16>
    %12 = vector.shape_cast %11 : vector<1x4x64xbf16> to vector<4x64xbf16>
    %c6 = arith.constant 6 : index
    %c0_12 = arith.constant 0 : index
    %c0_13 = arith.constant 0 : index
    %13 = vector.load %arg2[%c6, %c0_12, %c0_13] : memref<9x24x4xbf16, #tpu.memory_space<vmem>>, vector<1x24x4xbf16>
    %14 = vector.shape_cast %13 : vector<1x24x4xbf16> to vector<24x4xbf16>
    %cst_14 = arith.constant dense<0.000000e+00> : vector<24x64xf32>
    %15 = tpu.matmul %14, %12, %cst_14 {dimension_numbers = #tpu.dot_dimension_numbers<[1], [0], [0], [1], [0, 0, 1, 1], [], []>} : vector<24x4xbf16>, vector<4x64xbf16>, vector<24x64xf32> -> vector<24x64xf32>
    %16 = arith.addf %10, %15 : vector<24x64xf32>
    %c0_15 = arith.constant 0 : index
    %c0_16 = arith.constant 0 : index
    %17 = vector.load %arg4[%c0_15, %c0_16] : memref<3x64xf32, #tpu.memory_space<vmem>>, vector<1x64xf32>
    %18 = vector.broadcast %17 : vector<1x64xf32> to vector<24x64xf32>
    %19 = arith.mulf %16, %18 : vector<24x64xf32>
    %c0_17 = arith.constant 0 : index
    %c0_18 = arith.constant 0 : index
    %c1 = arith.constant 1 : index
    %20 = vector.load %arg1[%c0_17, %c0_18, %c1] : memref<1x4x82xbf16, #tpu.memory_space<vmem>>, vector<1x4x64xbf16>
    %21 = vector.shape_cast %20 : vector<1x4x64xbf16> to vector<4x64xbf16>
    %c1_19 = arith.constant 1 : index
    %c0_20 = arith.constant 0 : index
    %c0_21 = arith.constant 0 : index
    %22 = vector.load %arg2[%c1_19, %c0_20, %c0_21] : memref<9x24x4xbf16, #tpu.memory_space<vmem>>, vector<1x24x4xbf16>
    %23 = vector.shape_cast %22 : vector<1x24x4xbf16> to vector<24x4xbf16>
    %cst_22 = arith.constant dense<0.000000e+00> : vector<24x64xf32>
    %24 = tpu.matmul %23, %21, %cst_22 {dimension_numbers = #tpu.dot_dimension_numbers<[1], [0], [0], [1], [0, 0, 1, 1], [], []>} : vector<24x4xbf16>, vector<4x64xbf16>, vector<24x64xf32> -> vector<24x64xf32>
    %c0_23 = arith.constant 0 : index
    %c0_24 = arith.constant 0 : index
    %c9 = arith.constant 9 : index
    %25 = vector.load %arg1[%c0_23, %c0_24, %c9] : memref<1x4x82xbf16, #tpu.memory_space<vmem>>, vector<1x4x64xbf16>
    %26 = vector.shape_cast %25 : vector<1x4x64xbf16> to vector<4x64xbf16>
    %c4 = arith.constant 4 : index
    %c0_25 = arith.constant 0 : index
    %c0_26 = arith.constant 0 : index
    %27 = vector.load %arg2[%c4, %c0_25, %c0_26] : memref<9x24x4xbf16, #tpu.memory_space<vmem>>, vector<1x24x4xbf16>
    %28 = vector.shape_cast %27 : vector<1x24x4xbf16> to vector<24x4xbf16>
    %cst_27 = arith.constant dense<0.000000e+00> : vector<24x64xf32>
    %29 = tpu.matmul %28, %26, %cst_27 {dimension_numbers = #tpu.dot_dimension_numbers<[1], [0], [0], [1], [0, 0, 1, 1], [], []>} : vector<24x4xbf16>, vector<4x64xbf16>, vector<24x64xf32> -> vector<24x64xf32>
    %30 = arith.addf %24, %29 : vector<24x64xf32>
    %c0_28 = arith.constant 0 : index
    %c0_29 = arith.constant 0 : index
    %c17 = arith.constant 17 : index
    %31 = vector.load %arg1[%c0_28, %c0_29, %c17] : memref<1x4x82xbf16, #tpu.memory_space<vmem>>, vector<1x4x64xbf16>
    %32 = vector.shape_cast %31 : vector<1x4x64xbf16> to vector<4x64xbf16>
    %c7 = arith.constant 7 : index
    %c0_30 = arith.constant 0 : index
    %c0_31 = arith.constant 0 : index
    %33 = vector.load %arg2[%c7, %c0_30, %c0_31] : memref<9x24x4xbf16, #tpu.memory_space<vmem>>, vector<1x24x4xbf16>
    %34 = vector.shape_cast %33 : vector<1x24x4xbf16> to vector<24x4xbf16>
    %cst_32 = arith.constant dense<0.000000e+00> : vector<24x64xf32>
    %35 = tpu.matmul %34, %32, %cst_32 {dimension_numbers = #tpu.dot_dimension_numbers<[1], [0], [0], [1], [0, 0, 1, 1], [], []>} : vector<24x4xbf16>, vector<4x64xbf16>, vector<24x64xf32> -> vector<24x64xf32>
    %36 = arith.addf %30, %35 : vector<24x64xf32>
    %37 = arith.addf %19, %36 : vector<24x64xf32>
    %c0_33 = arith.constant 0 : index
    %c0_34 = arith.constant 0 : index
    %c2 = arith.constant 2 : index
    %38 = vector.load %arg1[%c0_33, %c0_34, %c2] : memref<1x4x82xbf16, #tpu.memory_space<vmem>>, vector<1x4x64xbf16>
    %39 = vector.shape_cast %38 : vector<1x4x64xbf16> to vector<4x64xbf16>
    %c2_35 = arith.constant 2 : index
    %c0_36 = arith.constant 0 : index
    %c0_37 = arith.constant 0 : index
    %40 = vector.load %arg2[%c2_35, %c0_36, %c0_37] : memref<9x24x4xbf16, #tpu.memory_space<vmem>>, vector<1x24x4xbf16>
    %41 = vector.shape_cast %40 : vector<1x24x4xbf16> to vector<24x4xbf16>
    %cst_38 = arith.constant dense<0.000000e+00> : vector<24x64xf32>
    %42 = tpu.matmul %41, %39, %cst_38 {dimension_numbers = #tpu.dot_dimension_numbers<[1], [0], [0], [1], [0, 0, 1, 1], [], []>} : vector<24x4xbf16>, vector<4x64xbf16>, vector<24x64xf32> -> vector<24x64xf32>
    %c0_39 = arith.constant 0 : index
    %c0_40 = arith.constant 0 : index
    %c10 = arith.constant 10 : index
    %43 = vector.load %arg1[%c0_39, %c0_40, %c10] : memref<1x4x82xbf16, #tpu.memory_space<vmem>>, vector<1x4x64xbf16>
    %44 = vector.shape_cast %43 : vector<1x4x64xbf16> to vector<4x64xbf16>
    %c5 = arith.constant 5 : index
    %c0_41 = arith.constant 0 : index
    %c0_42 = arith.constant 0 : index
    %45 = vector.load %arg2[%c5, %c0_41, %c0_42] : memref<9x24x4xbf16, #tpu.memory_space<vmem>>, vector<1x24x4xbf16>
    %46 = vector.shape_cast %45 : vector<1x24x4xbf16> to vector<24x4xbf16>
    %cst_43 = arith.constant dense<0.000000e+00> : vector<24x64xf32>
    %47 = tpu.matmul %46, %44, %cst_43 {dimension_numbers = #tpu.dot_dimension_numbers<[1], [0], [0], [1], [0, 0, 1, 1], [], []>} : vector<24x4xbf16>, vector<4x64xbf16>, vector<24x64xf32> -> vector<24x64xf32>
    %48 = arith.addf %42, %47 : vector<24x64xf32>
    %c0_44 = arith.constant 0 : index
    %c0_45 = arith.constant 0 : index
    %c18 = arith.constant 18 : index
    %49 = vector.load %arg1[%c0_44, %c0_45, %c18] : memref<1x4x82xbf16, #tpu.memory_space<vmem>>, vector<1x4x64xbf16>
    %50 = vector.shape_cast %49 : vector<1x4x64xbf16> to vector<4x64xbf16>
    %c8_46 = arith.constant 8 : index
    %c0_47 = arith.constant 0 : index
    %c0_48 = arith.constant 0 : index
    %51 = vector.load %arg2[%c8_46, %c0_47, %c0_48] : memref<9x24x4xbf16, #tpu.memory_space<vmem>>, vector<1x24x4xbf16>
    %52 = vector.shape_cast %51 : vector<1x24x4xbf16> to vector<24x4xbf16>
    %cst_49 = arith.constant dense<0.000000e+00> : vector<24x64xf32>
    %53 = tpu.matmul %52, %50, %cst_49 {dimension_numbers = #tpu.dot_dimension_numbers<[1], [0], [0], [1], [0, 0, 1, 1], [], []>} : vector<24x4xbf16>, vector<4x64xbf16>, vector<24x64xf32> -> vector<24x64xf32>
    %54 = arith.addf %48, %53 : vector<24x64xf32>
    %c2_50 = arith.constant 2 : index
    %c0_51 = arith.constant 0 : index
    %55 = vector.load %arg4[%c2_50, %c0_51] : memref<3x64xf32, #tpu.memory_space<vmem>>, vector<1x64xf32>
    %56 = vector.broadcast %55 : vector<1x64xf32> to vector<24x64xf32>
    %57 = arith.mulf %54, %56 : vector<24x64xf32>
    %58 = arith.addf %37, %57 : vector<24x64xf32>
    %c0_52 = arith.constant 0 : index
    %c0_53 = arith.constant 0 : index
    %59 = vector.load %arg3[%c0_52, %c0_53] : memref<24x1xf32, #tpu.memory_space<vmem>>, vector<24x1xf32>
    %60 = vector.broadcast %59 : vector<24x1xf32> to vector<24x64xf32>
    %61 = arith.addf %58, %60 : vector<24x64xf32>
    %62 = arith.truncf %61 : vector<24x64xf32> to vector<24x64xbf16>
    %c0_54 = arith.constant 0 : index
    %c0_55 = arith.constant 0 : index
    %c0_56 = arith.constant 0 : index
    %63 = vector.load %arg5[%c0_54, %c0_55, %c0_56] : memref<1x24x64xbf16, #tpu.memory_space<vmem>>, vector<1x24x64xbf16>
    %64 = vector.shape_cast %63 : vector<1x24x64xbf16> to vector<24x64xbf16>
    %65 = vector.shape_cast %62 : vector<24x64xbf16> to vector<1x24x64xbf16>
    tpu.vector_store %arg5[%c0_54, %c0_55, %c0_56], %65 {strides = array<i32>} : memref<1x24x64xbf16, #tpu.memory_space<vmem>>, vector<1x24x64xbf16>,
    return
  }
  func.func @transform_0(%arg0: i32) -> (i32, i32, i32) {
    %c0_i32 = arith.constant 0 : i32
    %c0_i32_0 = arith.constant 0 : i32
    %c0_i32_1 = arith.constant 0 : i32
    return %arg0, %c0_i32, %c0_i32_0 : i32, i32, i32
  }
  func.func @transform_1(%arg0: i32) -> (i32, i32, i32) {
    %c0_i32 = arith.constant 0 : i32
    %c0_i32_0 = arith.constant 0 : i32
    %c0_i32_1 = arith.constant 0 : i32
    %c0_i32_2 = arith.constant 0 : i32
    return %c0_i32, %c0_i32_0, %c0_i32_1 : i32, i32, i32
  }
  func.func @transform_2(%arg0: i32) -> (i32, i32) {
    %c0_i32 = arith.constant 0 : i32
    %c0_i32_0 = arith.constant 0 : i32
    %c0_i32_1 = arith.constant 0 : i32
    return %c0_i32, %c0_i32_0 : i32, i32
  }
  func.func @transform_3(%arg0: i32) -> (i32, i32) {
    %c0_i32 = arith.constant 0 : i32
    %c0_i32_0 = arith.constant 0 : i32
    %c0_i32_1 = arith.constant 0 : i32
    return %c0_i32, %c0_i32_0 : i32, i32
  }
  func.func @transform_4(%arg0: i32) -> (i32, i32, i32) {
    %c0_i32 = arith.constant 0 : i32
    %c0_i32_0 = arith.constant 0 : i32
    %c0_i32_1 = arith.constant 0 : i32
    return %arg0, %c0_i32, %c0_i32_0 : i32, i32, i32
  }
}

module attributes {stable_mosaic.version = 11 : i64} {
  func.func @_attention_kernel(%arg0: i32, %arg1: i32, %arg2: memref<1x8x8x64xbf16, #tpu.memory_space<vmem>>, %arg3: memref<1x8x8x64xbf16, #tpu.memory_space<vmem>>, %arg4: memref<1x8x8x64xbf16, #tpu.memory_space<vmem>>, %arg5: memref<8x8x8xf32, #tpu.memory_space<vmem>>, %arg6: memref<8x8xf32, #tpu.memory_space<smem>>, %arg7: memref<8x8xf32, #tpu.memory_space<smem>>, %arg8: memref<1x8x8x64xbf16, #tpu.memory_space<vmem>>) attributes {dimension_semantics = [#tpu.dimension_semantics<parallel>, #tpu.dimension_semantics<parallel>], iteration_bounds = array<i64: 2, 1>, scalar_prefetch = 0 : i64, scratch_operands = 0 : i64, tpu.core_type = #tpu.core_type<tc>, window_params = [{transform_indices = @transform_0, window_bounds = array<i64: 1, 8, 8, 64>}, {transform_indices = @transform_1, window_bounds = array<i64: 1, 8, 8, 64>}, {transform_indices = @transform_2, window_bounds = array<i64: 1, 8, 8, 64>}, {transform_indices = @transform_3, window_bounds = array<i64: 8, 8, 8>}, {transform_indices = @transform_4, window_bounds = array<i64: 8, 8>}, {transform_indices = @transform_5, window_bounds = array<i64: 8, 8>}, {transform_indices = @transform_6, window_bounds = array<i64: 1, 8, 8, 64>}]} {
    %c0 = arith.constant 0 : index
    %c0_0 = arith.constant 0 : index
    %c0_1 = arith.constant 0 : index
    %c0_2 = arith.constant 0 : index
    %0 = vector.load %arg2[%c0, %c0_0, %c0_1, %c0_2] : memref<1x8x8x64xbf16, #tpu.memory_space<vmem>>, vector<1x8x8x64xbf16>
    %1 = vector.shape_cast %0 : vector<1x8x8x64xbf16> to vector<8x8x64xbf16>
    %c0_3 = arith.constant 0 : index
    %c0_4 = arith.constant 0 : index
    %c0_5 = arith.constant 0 : index
    %c0_6 = arith.constant 0 : index
    %2 = vector.load %arg3[%c0_3, %c0_4, %c0_5, %c0_6] : memref<1x8x8x64xbf16, #tpu.memory_space<vmem>>, vector<1x8x8x64xbf16>
    %3 = vector.shape_cast %2 : vector<1x8x8x64xbf16> to vector<8x8x64xbf16>
    %c0_7 = arith.constant 0 : index
    %c0_8 = arith.constant 0 : index
    %c0_9 = arith.constant 0 : index
    %c0_10 = arith.constant 0 : index
    %4 = vector.load %arg4[%c0_7, %c0_8, %c0_9, %c0_10] : memref<1x8x8x64xbf16, #tpu.memory_space<vmem>>, vector<1x8x8x64xbf16>
    %5 = vector.shape_cast %4 : vector<1x8x8x64xbf16> to vector<8x8x64xbf16>
    "tpu.trace_start"() <{level = 10 : i32, message = "hqn,hkn->hqk"}> : () -> ()
    %cst = arith.constant dense<0.000000e+00> : vector<8x8x8xf32>
    %6 = tpu.matmul %1, %3, %cst {dimension_numbers = #tpu.dot_dimension_numbers<[2], [2], [1], [1], [0, 0, 0, 1, 1, 1], [0], [0]>} : vector<8x8x64xbf16>, vector<8x8x64xbf16>, vector<8x8x8xf32> -> vector<8x8x8xf32>
    "tpu.trace_stop"() : () -> ()
    %c0_11 = arith.constant 0 : index
    %c0_12 = arith.constant 0 : index
    %c0_13 = arith.constant 0 : index
    %7 = vector.load %arg5[%c0_11, %c0_12, %c0_13] : memref<8x8x8xf32, #tpu.memory_space<vmem>>, vector<8x8x8xf32>
    %8 = arith.addf %6, %7 : vector<8x8x8xf32>
    %cst_14 = arith.constant 1.250000e-01 : f32
    %9 = vector.broadcast %cst_14 : f32 to vector<8x8x8xf32>
    %10 = arith.mulf %8, %9 : vector<8x8x8xf32>
    %11 = tpu.iota {dimensions = array<i32: 0>} : vector<8x8xi32>
    %c8_i32 = arith.constant 8 : i32
    %12 = arith.muli %arg1, %c8_i32 : i32
    %13 = vector.broadcast %12 : i32 to vector<8x8xi32>
    %14 = arith.addi %11, %13 : vector<8x8xi32>
    %15 = tpu.iota {dimensions = array<i32: 1>} : vector<8x8xi32>
    %16 = arith.cmpi sle, %15, %14 : vector<8x8xi32>
    %cst_15 = arith.constant -9.99999984E+17 : f32
    %17 = vector.shape_cast %16 : vector<8x8xi1> to vector<1x8x8xi1>
    %18 = vector.broadcast %17 : vector<1x8x8xi1> to vector<8x8x8xi1>
    %19 = vector.broadcast %cst_15 : f32 to vector<8x8x8xf32>
    %20 = arith.select %18, %19, %10 : vector<8x8x8xi1>, vector<8x8x8xf32>
    %c0_16 = arith.constant 0 : index
    %c0_17 = arith.constant 0 : index
    %21 = memref.load %arg6[%c0_16, %c0_17] : memref<8x8xf32, #tpu.memory_space<smem>>
    %22 = vector.extract_strided_slice %20 {offsets = [0, 0, 0], sizes = [1, 8, 8], strides = [1, 1, 1]} : vector<8x8x8xf32> to vector<1x8x8xf32>
    %23 = vector.shape_cast %22 : vector<1x8x8xf32> to vector<8x8xf32>
    %24 = vector.broadcast %21 : f32 to vector<8x8xf32>
    %25 = arith.mulf %24, %23 : vector<8x8xf32>
    %c0_18 = arith.constant 0 : index
    %c1 = arith.constant 1 : index
    %26 = memref.load %arg6[%c0_18, %c1] : memref<8x8xf32, #tpu.memory_space<smem>>
    %27 = vector.extract_strided_slice %20 {offsets = [1, 0, 0], sizes = [1, 8, 8], strides = [1, 1, 1]} : vector<8x8x8xf32> to vector<1x8x8xf32>
    %28 = vector.shape_cast %27 : vector<1x8x8xf32> to vector<8x8xf32>
    %29 = vector.broadcast %26 : f32 to vector<8x8xf32>
    %30 = arith.mulf %29, %28 : vector<8x8xf32>
    %31 = arith.addf %25, %30 : vector<8x8xf32>
    %c0_19 = arith.constant 0 : index
    %c2 = arith.constant 2 : index
    %32 = memref.load %arg6[%c0_19, %c2] : memref<8x8xf32, #tpu.memory_space<smem>>
    %33 = vector.extract_strided_slice %20 {offsets = [2, 0, 0], sizes = [1, 8, 8], strides = [1, 1, 1]} : vector<8x8x8xf32> to vector<1x8x8xf32>
    %34 = vector.shape_cast %33 : vector<1x8x8xf32> to vector<8x8xf32>
    %35 = vector.broadcast %32 : f32 to vector<8x8xf32>
    %36 = arith.mulf %35, %34 : vector<8x8xf32>
    %37 = arith.addf %31, %36 : vector<8x8xf32>
    %c0_20 = arith.constant 0 : index
    %c3 = arith.constant 3 : index
    %38 = memref.load %arg6[%c0_20, %c3] : memref<8x8xf32, #tpu.memory_space<smem>>
    %39 = vector.extract_strided_slice %20 {offsets = [3, 0, 0], sizes = [1, 8, 8], strides = [1, 1, 1]} : vector<8x8x8xf32> to vector<1x8x8xf32>
    %40 = vector.shape_cast %39 : vector<1x8x8xf32> to vector<8x8xf32>
    %41 = vector.broadcast %38 : f32 to vector<8x8xf32>
    %42 = arith.mulf %41, %40 : vector<8x8xf32>
    %43 = arith.addf %37, %42 : vector<8x8xf32>
    %c0_21 = arith.constant 0 : index
    %c4 = arith.constant 4 : index
    %44 = memref.load %arg6[%c0_21, %c4] : memref<8x8xf32, #tpu.memory_space<smem>>
    %45 = vector.extract_strided_slice %20 {offsets = [4, 0, 0], sizes = [1, 8, 8], strides = [1, 1, 1]} : vector<8x8x8xf32> to vector<1x8x8xf32>
    %46 = vector.shape_cast %45 : vector<1x8x8xf32> to vector<8x8xf32>
    %47 = vector.broadcast %44 : f32 to vector<8x8xf32>
    %48 = arith.mulf %47, %46 : vector<8x8xf32>
    %49 = arith.addf %43, %48 : vector<8x8xf32>
    %c0_22 = arith.constant 0 : index
    %c5 = arith.constant 5 : index
    %50 = memref.load %arg6[%c0_22, %c5] : memref<8x8xf32, #tpu.memory_space<smem>>
    %51 = vector.extract_strided_slice %20 {offsets = [5, 0, 0], sizes = [1, 8, 8], strides = [1, 1, 1]} : vector<8x8x8xf32> to vector<1x8x8xf32>
    %52 = vector.shape_cast %51 : vector<1x8x8xf32> to vector<8x8xf32>
    %53 = vector.broadcast %50 : f32 to vector<8x8xf32>
    %54 = arith.mulf %53, %52 : vector<8x8xf32>
    %55 = arith.addf %49, %54 : vector<8x8xf32>
    %c0_23 = arith.constant 0 : index
    %c6 = arith.constant 6 : index
    %56 = memref.load %arg6[%c0_23, %c6] : memref<8x8xf32, #tpu.memory_space<smem>>
    %57 = vector.extract_strided_slice %20 {offsets = [6, 0, 0], sizes = [1, 8, 8], strides = [1, 1, 1]} : vector<8x8x8xf32> to vector<1x8x8xf32>
    %58 = vector.shape_cast %57 : vector<1x8x8xf32> to vector<8x8xf32>
    %59 = vector.broadcast %56 : f32 to vector<8x8xf32>
    %60 = arith.mulf %59, %58 : vector<8x8xf32>
    %61 = arith.addf %55, %60 : vector<8x8xf32>
    %c0_24 = arith.constant 0 : index
    %c7 = arith.constant 7 : index
    %62 = memref.load %arg6[%c0_24, %c7] : memref<8x8xf32, #tpu.memory_space<smem>>
    %63 = vector.extract_strided_slice %20 {offsets = [7, 0, 0], sizes = [1, 8, 8], strides = [1, 1, 1]} : vector<8x8x8xf32> to vector<1x8x8xf32>
    %64 = vector.shape_cast %63 : vector<1x8x8xf32> to vector<8x8xf32>
    %65 = vector.broadcast %62 : f32 to vector<8x8xf32>
    %66 = arith.mulf %65, %64 : vector<8x8xf32>
    %67 = arith.addf %61, %66 : vector<8x8xf32>
    %c1_25 = arith.constant 1 : index
    %c0_26 = arith.constant 0 : index
    %68 = memref.load %arg6[%c1_25, %c0_26] : memref<8x8xf32, #tpu.memory_space<smem>>
    %69 = vector.extract_strided_slice %20 {offsets = [0, 0, 0], sizes = [1, 8, 8], strides = [1, 1, 1]} : vector<8x8x8xf32> to vector<1x8x8xf32>
    %70 = vector.shape_cast %69 : vector<1x8x8xf32> to vector<8x8xf32>
    %71 = vector.broadcast %68 : f32 to vector<8x8xf32>
    %72 = arith.mulf %71, %70 : vector<8x8xf32>
    %c1_27 = arith.constant 1 : index
    %c1_28 = arith.constant 1 : index
    %73 = memref.load %arg6[%c1_27, %c1_28] : memref<8x8xf32, #tpu.memory_space<smem>>
    %74 = vector.extract_strided_slice %20 {offsets = [1, 0, 0], sizes = [1, 8, 8], strides = [1, 1, 1]} : vector<8x8x8xf32> to vector<1x8x8xf32>
    %75 = vector.shape_cast %74 : vector<1x8x8xf32> to vector<8x8xf32>
    %76 = vector.broadcast %73 : f32 to vector<8x8xf32>
    %77 = arith.mulf %76, %75 : vector<8x8xf32>
    %78 = arith.addf %72, %77 : vector<8x8xf32>
    %c1_29 = arith.constant 1 : index
    %c2_30 = arith.constant 2 : index
    %79 = memref.load %arg6[%c1_29, %c2_30] : memref<8x8xf32, #tpu.memory_space<smem>>
    %80 = vector.extract_strided_slice %20 {offsets = [2, 0, 0], sizes = [1, 8, 8], strides = [1, 1, 1]} : vector<8x8x8xf32> to vector<1x8x8xf32>
    %81 = vector.shape_cast %80 : vector<1x8x8xf32> to vector<8x8xf32>
    %82 = vector.broadcast %79 : f32 to vector<8x8xf32>
    %83 = arith.mulf %82, %81 : vector<8x8xf32>
    %84 = arith.addf %78, %83 : vector<8x8xf32>
    %c1_31 = arith.constant 1 : index
    %c3_32 = arith.constant 3 : index
    %85 = memref.load %arg6[%c1_31, %c3_32] : memref<8x8xf32, #tpu.memory_space<smem>>
    %86 = vector.extract_strided_slice %20 {offsets = [3, 0, 0], sizes = [1, 8, 8], strides = [1, 1, 1]} : vector<8x8x8xf32> to vector<1x8x8xf32>
    %87 = vector.shape_cast %86 : vector<1x8x8xf32> to vector<8x8xf32>
    %88 = vector.broadcast %85 : f32 to vector<8x8xf32>
    %89 = arith.mulf %88, %87 : vector<8x8xf32>
    %90 = arith.addf %84, %89 : vector<8x8xf32>
    %c1_33 = arith.constant 1 : index
    %c4_34 = arith.constant 4 : index
    %91 = memref.load %arg6[%c1_33, %c4_34] : memref<8x8xf32, #tpu.memory_space<smem>>
    %92 = vector.extract_strided_slice %20 {offsets = [4, 0, 0], sizes = [1, 8, 8], strides = [1, 1, 1]} : vector<8x8x8xf32> to vector<1x8x8xf32>
    %93 = vector.shape_cast %92 : vector<1x8x8xf32> to vector<8x8xf32>
    %94 = vector.broadcast %91 : f32 to vector<8x8xf32>
    %95 = arith.mulf %94, %93 : vector<8x8xf32>
    %96 = arith.addf %90, %95 : vector<8x8xf32>
    %c1_35 = arith.constant 1 : index
    %c5_36 = arith.constant 5 : index
    %97 = memref.load %arg6[%c1_35, %c5_36] : memref<8x8xf32, #tpu.memory_space<smem>>
    %98 = vector.extract_strided_slice %20 {offsets = [5, 0, 0], sizes = [1, 8, 8], strides = [1, 1, 1]} : vector<8x8x8xf32> to vector<1x8x8xf32>
    %99 = vector.shape_cast %98 : vector<1x8x8xf32> to vector<8x8xf32>
    %100 = vector.broadcast %97 : f32 to vector<8x8xf32>
    %101 = arith.mulf %100, %99 : vector<8x8xf32>
    %102 = arith.addf %96, %101 : vector<8x8xf32>
    %c1_37 = arith.constant 1 : index
    %c6_38 = arith.constant 6 : index
    %103 = memref.load %arg6[%c1_37, %c6_38] : memref<8x8xf32, #tpu.memory_space<smem>>
    %104 = vector.extract_strided_slice %20 {offsets = [6, 0, 0], sizes = [1, 8, 8], strides = [1, 1, 1]} : vector<8x8x8xf32> to vector<1x8x8xf32>
    %105 = vector.shape_cast %104 : vector<1x8x8xf32> to vector<8x8xf32>
    %106 = vector.broadcast %103 : f32 to vector<8x8xf32>
    %107 = arith.mulf %106, %105 : vector<8x8xf32>
    %108 = arith.addf %102, %107 : vector<8x8xf32>
    %c1_39 = arith.constant 1 : index
    %c7_40 = arith.constant 7 : index
    %109 = memref.load %arg6[%c1_39, %c7_40] : memref<8x8xf32, #tpu.memory_space<smem>>
    %110 = vector.extract_strided_slice %20 {offsets = [7, 0, 0], sizes = [1, 8, 8], strides = [1, 1, 1]} : vector<8x8x8xf32> to vector<1x8x8xf32>
    %111 = vector.shape_cast %110 : vector<1x8x8xf32> to vector<8x8xf32>
    %112 = vector.broadcast %109 : f32 to vector<8x8xf32>
    %113 = arith.mulf %112, %111 : vector<8x8xf32>
    %114 = arith.addf %108, %113 : vector<8x8xf32>
    %c2_41 = arith.constant 2 : index
    %c0_42 = arith.constant 0 : index
    %115 = memref.load %arg6[%c2_41, %c0_42] : memref<8x8xf32, #tpu.memory_space<smem>>
    %116 = vector.extract_strided_slice %20 {offsets = [0, 0, 0], sizes = [1, 8, 8], strides = [1, 1, 1]} : vector<8x8x8xf32> to vector<1x8x8xf32>
    %117 = vector.shape_cast %116 : vector<1x8x8xf32> to vector<8x8xf32>
    %118 = vector.broadcast %115 : f32 to vector<8x8xf32>
    %119 = arith.mulf %118, %117 : vector<8x8xf32>
    %c2_43 = arith.constant 2 : index
    %c1_44 = arith.constant 1 : index
    %120 = memref.load %arg6[%c2_43, %c1_44] : memref<8x8xf32, #tpu.memory_space<smem>>
    %121 = vector.extract_strided_slice %20 {offsets = [1, 0, 0], sizes = [1, 8, 8], strides = [1, 1, 1]} : vector<8x8x8xf32> to vector<1x8x8xf32>
    %122 = vector.shape_cast %121 : vector<1x8x8xf32> to vector<8x8xf32>
    %123 = vector.broadcast %120 : f32 to vector<8x8xf32>
    %124 = arith.mulf %123, %122 : vector<8x8xf32>
    %125 = arith.addf %119, %124 : vector<8x8xf32>
    %c2_45 = arith.constant 2 : index
    %c2_46 = arith.constant 2 : index
    %126 = memref.load %arg6[%c2_45, %c2_46] : memref<8x8xf32, #tpu.memory_space<smem>>
    %127 = vector.extract_strided_slice %20 {offsets = [2, 0, 0], sizes = [1, 8, 8], strides = [1, 1, 1]} : vector<8x8x8xf32> to vector<1x8x8xf32>
    %128 = vector.shape_cast %127 : vector<1x8x8xf32> to vector<8x8xf32>
    %129 = vector.broadcast %126 : f32 to vector<8x8xf32>
    %130 = arith.mulf %129, %128 : vector<8x8xf32>
    %131 = arith.addf %125, %130 : vector<8x8xf32>
    %c2_47 = arith.constant 2 : index
    %c3_48 = arith.constant 3 : index
    %132 = memref.load %arg6[%c2_47, %c3_48] : memref<8x8xf32, #tpu.memory_space<smem>>
    %133 = vector.extract_strided_slice %20 {offsets = [3, 0, 0], sizes = [1, 8, 8], strides = [1, 1, 1]} : vector<8x8x8xf32> to vector<1x8x8xf32>
    %134 = vector.shape_cast %133 : vector<1x8x8xf32> to vector<8x8xf32>
    %135 = vector.broadcast %132 : f32 to vector<8x8xf32>
    %136 = arith.mulf %135, %134 : vector<8x8xf32>
    %137 = arith.addf %131, %136 : vector<8x8xf32>
    %c2_49 = arith.constant 2 : index
    %c4_50 = arith.constant 4 : index
    %138 = memref.load %arg6[%c2_49, %c4_50] : memref<8x8xf32, #tpu.memory_space<smem>>
    %139 = vector.extract_strided_slice %20 {offsets = [4, 0, 0], sizes = [1, 8, 8], strides = [1, 1, 1]} : vector<8x8x8xf32> to vector<1x8x8xf32>
    %140 = vector.shape_cast %139 : vector<1x8x8xf32> to vector<8x8xf32>
    %141 = vector.broadcast %138 : f32 to vector<8x8xf32>
    %142 = arith.mulf %141, %140 : vector<8x8xf32>
    %143 = arith.addf %137, %142 : vector<8x8xf32>
    %c2_51 = arith.constant 2 : index
    %c5_52 = arith.constant 5 : index
    %144 = memref.load %arg6[%c2_51, %c5_52] : memref<8x8xf32, #tpu.memory_space<smem>>
    %145 = vector.extract_strided_slice %20 {offsets = [5, 0, 0], sizes = [1, 8, 8], strides = [1, 1, 1]} : vector<8x8x8xf32> to vector<1x8x8xf32>
    %146 = vector.shape_cast %145 : vector<1x8x8xf32> to vector<8x8xf32>
    %147 = vector.broadcast %144 : f32 to vector<8x8xf32>
    %148 = arith.mulf %147, %146 : vector<8x8xf32>
    %149 = arith.addf %143, %148 : vector<8x8xf32>
    %c2_53 = arith.constant 2 : index
    %c6_54 = arith.constant 6 : index
    %150 = memref.load %arg6[%c2_53, %c6_54] : memref<8x8xf32, #tpu.memory_space<smem>>
    %151 = vector.extract_strided_slice %20 {offsets = [6, 0, 0], sizes = [1, 8, 8], strides = [1, 1, 1]} : vector<8x8x8xf32> to vector<1x8x8xf32>
    %152 = vector.shape_cast %151 : vector<1x8x8xf32> to vector<8x8xf32>
    %153 = vector.broadcast %150 : f32 to vector<8x8xf32>
    %154 = arith.mulf %153, %152 : vector<8x8xf32>
    %155 = arith.addf %149, %154 : vector<8x8xf32>
    %c2_55 = arith.constant 2 : index
    %c7_56 = arith.constant 7 : index
    %156 = memref.load %arg6[%c2_55, %c7_56] : memref<8x8xf32, #tpu.memory_space<smem>>
    %157 = vector.extract_strided_slice %20 {offsets = [7, 0, 0], sizes = [1, 8, 8], strides = [1, 1, 1]} : vector<8x8x8xf32> to vector<1x8x8xf32>
    %158 = vector.shape_cast %157 : vector<1x8x8xf32> to vector<8x8xf32>
    %159 = vector.broadcast %156 : f32 to vector<8x8xf32>
    %160 = arith.mulf %159, %158 : vector<8x8xf32>
    %161 = arith.addf %155, %160 : vector<8x8xf32>
    %c3_57 = arith.constant 3 : index
    %c0_58 = arith.constant 0 : index
    %162 = memref.load %arg6[%c3_57, %c0_58] : memref<8x8xf32, #tpu.memory_space<smem>>
    %163 = vector.extract_strided_slice %20 {offsets = [0, 0, 0], sizes = [1, 8, 8], strides = [1, 1, 1]} : vector<8x8x8xf32> to vector<1x8x8xf32>
    %164 = vector.shape_cast %163 : vector<1x8x8xf32> to vector<8x8xf32>
    %165 = vector.broadcast %162 : f32 to vector<8x8xf32>
    %166 = arith.mulf %165, %164 : vector<8x8xf32>
    %c3_59 = arith.constant 3 : index
    %c1_60 = arith.constant 1 : index
    %167 = memref.load %arg6[%c3_59, %c1_60] : memref<8x8xf32, #tpu.memory_space<smem>>
    %168 = vector.extract_strided_slice %20 {offsets = [1, 0, 0], sizes = [1, 8, 8], strides = [1, 1, 1]} : vector<8x8x8xf32> to vector<1x8x8xf32>
    %169 = vector.shape_cast %168 : vector<1x8x8xf32> to vector<8x8xf32>
    %170 = vector.broadcast %167 : f32 to vector<8x8xf32>
    %171 = arith.mulf %170, %169 : vector<8x8xf32>
    %172 = arith.addf %166, %171 : vector<8x8xf32>
    %c3_61 = arith.constant 3 : index
    %c2_62 = arith.constant 2 : index
    %173 = memref.load %arg6[%c3_61, %c2_62] : memref<8x8xf32, #tpu.memory_space<smem>>
    %174 = vector.extract_strided_slice %20 {offsets = [2, 0, 0], sizes = [1, 8, 8], strides = [1, 1, 1]} : vector<8x8x8xf32> to vector<1x8x8xf32>
    %175 = vector.shape_cast %174 : vector<1x8x8xf32> to vector<8x8xf32>
    %176 = vector.broadcast %173 : f32 to vector<8x8xf32>
    %177 = arith.mulf %176, %175 : vector<8x8xf32>
    %178 = arith.addf %172, %177 : vector<8x8xf32>
    %c3_63 = arith.constant 3 : index
    %c3_64 = arith.constant 3 : index
    %179 = memref.load %arg6[%c3_63, %c3_64] : memref<8x8xf32, #tpu.memory_space<smem>>
    %180 = vector.extract_strided_slice %20 {offsets = [3, 0, 0], sizes = [1, 8, 8], strides = [1, 1, 1]} : vector<8x8x8xf32> to vector<1x8x8xf32>
    %181 = vector.shape_cast %180 : vector<1x8x8xf32> to vector<8x8xf32>
    %182 = vector.broadcast %179 : f32 to vector<8x8xf32>
    %183 = arith.mulf %182, %181 : vector<8x8xf32>
    %184 = arith.addf %178, %183 : vector<8x8xf32>
    %c3_65 = arith.constant 3 : index
    %c4_66 = arith.constant 4 : index
    %185 = memref.load %arg6[%c3_65, %c4_66] : memref<8x8xf32, #tpu.memory_space<smem>>
    %186 = vector.extract_strided_slice %20 {offsets = [4, 0, 0], sizes = [1, 8, 8], strides = [1, 1, 1]} : vector<8x8x8xf32> to vector<1x8x8xf32>
    %187 = vector.shape_cast %186 : vector<1x8x8xf32> to vector<8x8xf32>
    %188 = vector.broadcast %185 : f32 to vector<8x8xf32>
    %189 = arith.mulf %188, %187 : vector<8x8xf32>
    %190 = arith.addf %184, %189 : vector<8x8xf32>
    %c3_67 = arith.constant 3 : index
    %c5_68 = arith.constant 5 : index
    %191 = memref.load %arg6[%c3_67, %c5_68] : memref<8x8xf32, #tpu.memory_space<smem>>
    %192 = vector.extract_strided_slice %20 {offsets = [5, 0, 0], sizes = [1, 8, 8], strides = [1, 1, 1]} : vector<8x8x8xf32> to vector<1x8x8xf32>
    %193 = vector.shape_cast %192 : vector<1x8x8xf32> to vector<8x8xf32>
    %194 = vector.broadcast %191 : f32 to vector<8x8xf32>
    %195 = arith.mulf %194, %193 : vector<8x8xf32>
    %196 = arith.addf %190, %195 : vector<8x8xf32>
    %c3_69 = arith.constant 3 : index
    %c6_70 = arith.constant 6 : index
    %197 = memref.load %arg6[%c3_69, %c6_70] : memref<8x8xf32, #tpu.memory_space<smem>>
    %198 = vector.extract_strided_slice %20 {offsets = [6, 0, 0], sizes = [1, 8, 8], strides = [1, 1, 1]} : vector<8x8x8xf32> to vector<1x8x8xf32>
    %199 = vector.shape_cast %198 : vector<1x8x8xf32> to vector<8x8xf32>
    %200 = vector.broadcast %197 : f32 to vector<8x8xf32>
    %201 = arith.mulf %200, %199 : vector<8x8xf32>
    %202 = arith.addf %196, %201 : vector<8x8xf32>
    %c3_71 = arith.constant 3 : index
    %c7_72 = arith.constant 7 : index
    %203 = memref.load %arg6[%c3_71, %c7_72] : memref<8x8xf32, #tpu.memory_space<smem>>
    %204 = vector.extract_strided_slice %20 {offsets = [7, 0, 0], sizes = [1, 8, 8], strides = [1, 1, 1]} : vector<8x8x8xf32> to vector<1x8x8xf32>
    %205 = vector.shape_cast %204 : vector<1x8x8xf32> to vector<8x8xf32>
    %206 = vector.broadcast %203 : f32 to vector<8x8xf32>
    %207 = arith.mulf %206, %205 : vector<8x8xf32>
    %208 = arith.addf %202, %207 : vector<8x8xf32>
    %c4_73 = arith.constant 4 : index
    %c0_74 = arith.constant 0 : index
    %209 = memref.load %arg6[%c4_73, %c0_74] : memref<8x8xf32, #tpu.memory_space<smem>>
    %210 = vector.extract_strided_slice %20 {offsets = [0, 0, 0], sizes = [1, 8, 8], strides = [1, 1, 1]} : vector<8x8x8xf32> to vector<1x8x8xf32>
    %211 = vector.shape_cast %210 : vector<1x8x8xf32> to vector<8x8xf32>
    %212 = vector.broadcast %209 : f32 to vector<8x8xf32>
    %213 = arith.mulf %212, %211 : vector<8x8xf32>
    %c4_75 = arith.constant 4 : index
    %c1_76 = arith.constant 1 : index
    %214 = memref.load %arg6[%c4_75, %c1_76] : memref<8x8xf32, #tpu.memory_space<smem>>
    %215 = vector.extract_strided_slice %20 {offsets = [1, 0, 0], sizes = [1, 8, 8], strides = [1, 1, 1]} : vector<8x8x8xf32> to vector<1x8x8xf32>
    %216 = vector.shape_cast %215 : vector<1x8x8xf32> to vector<8x8xf32>
    %217 = vector.broadcast %214 : f32 to vector<8x8xf32>
    %218 = arith.mulf %217, %216 : vector<8x8xf32>
    %219 = arith.addf %213, %218 : vector<8x8xf32>
    %c4_77 = arith.constant 4 : index
    %c2_78 = arith.constant 2 : index
    %220 = memref.load %arg6[%c4_77, %c2_78] : memref<8x8xf32, #tpu.memory_space<smem>>
    %221 = vector.extract_strided_slice %20 {offsets = [2, 0, 0], sizes = [1, 8, 8], strides = [1, 1, 1]} : vector<8x8x8xf32> to vector<1x8x8xf32>
    %222 = vector.shape_cast %221 : vector<1x8x8xf32> to vector<8x8xf32>
    %223 = vector.broadcast %220 : f32 to vector<8x8xf32>
    %224 = arith.mulf %223, %222 : vector<8x8xf32>
    %225 = arith.addf %219, %224 : vector<8x8xf32>
    %c4_79 = arith.constant 4 : index
    %c3_80 = arith.constant 3 : index
    %226 = memref.load %arg6[%c4_79, %c3_80] : memref<8x8xf32, #tpu.memory_space<smem>>
    %227 = vector.extract_strided_slice %20 {offsets = [3, 0, 0], sizes = [1, 8, 8], strides = [1, 1, 1]} : vector<8x8x8xf32> to vector<1x8x8xf32>
    %228 = vector.shape_cast %227 : vector<1x8x8xf32> to vector<8x8xf32>
    %229 = vector.broadcast %226 : f32 to vector<8x8xf32>
    %230 = arith.mulf %229, %228 : vector<8x8xf32>
    %231 = arith.addf %225, %230 : vector<8x8xf32>
    %c4_81 = arith.constant 4 : index
    %c4_82 = arith.constant 4 : index
    %232 = memref.load %arg6[%c4_81, %c4_82] : memref<8x8xf32, #tpu.memory_space<smem>>
    %233 = vector.extract_strided_slice %20 {offsets = [4, 0, 0], sizes = [1, 8, 8], strides = [1, 1, 1]} : vector<8x8x8xf32> to vector<1x8x8xf32>
    %234 = vector.shape_cast %233 : vector<1x8x8xf32> to vector<8x8xf32>
    %235 = vector.broadcast %232 : f32 to vector<8x8xf32>
    %236 = arith.mulf %235, %234 : vector<8x8xf32>
    %237 = arith.addf %231, %236 : vector<8x8xf32>
    %c4_83 = arith.constant 4 : index
    %c5_84 = arith.constant 5 : index
    %238 = memref.load %arg6[%c4_83, %c5_84] : memref<8x8xf32, #tpu.memory_space<smem>>
    %239 = vector.extract_strided_slice %20 {offsets = [5, 0, 0], sizes = [1, 8, 8], strides = [1, 1, 1]} : vector<8x8x8xf32> to vector<1x8x8xf32>
    %240 = vector.shape_cast %239 : vector<1x8x8xf32> to vector<8x8xf32>
    %241 = vector.broadcast %238 : f32 to vector<8x8xf32>
    %242 = arith.mulf %241, %240 : vector<8x8xf32>
    %243 = arith.addf %237, %242 : vector<8x8xf32>
    %c4_85 = arith.constant 4 : index
    %c6_86 = arith.constant 6 : index
    %244 = memref.load %arg6[%c4_85, %c6_86] : memref<8x8xf32, #tpu.memory_space<smem>>
    %245 = vector.extract_strided_slice %20 {offsets = [6, 0, 0], sizes = [1, 8, 8], strides = [1, 1, 1]} : vector<8x8x8xf32> to vector<1x8x8xf32>
    %246 = vector.shape_cast %245 : vector<1x8x8xf32> to vector<8x8xf32>
    %247 = vector.broadcast %244 : f32 to vector<8x8xf32>
    %248 = arith.mulf %247, %246 : vector<8x8xf32>
    %249 = arith.addf %243, %248 : vector<8x8xf32>
    %c4_87 = arith.constant 4 : index
    %c7_88 = arith.constant 7 : index
    %250 = memref.load %arg6[%c4_87, %c7_88] : memref<8x8xf32, #tpu.memory_space<smem>>
    %251 = vector.extract_strided_slice %20 {offsets = [7, 0, 0], sizes = [1, 8, 8], strides = [1, 1, 1]} : vector<8x8x8xf32> to vector<1x8x8xf32>
    %252 = vector.shape_cast %251 : vector<1x8x8xf32> to vector<8x8xf32>
    %253 = vector.broadcast %250 : f32 to vector<8x8xf32>
    %254 = arith.mulf %253, %252 : vector<8x8xf32>
    %255 = arith.addf %249, %254 : vector<8x8xf32>
    %c5_89 = arith.constant 5 : index
    %c0_90 = arith.constant 0 : index
    %256 = memref.load %arg6[%c5_89, %c0_90] : memref<8x8xf32, #tpu.memory_space<smem>>
    %257 = vector.extract_strided_slice %20 {offsets = [0, 0, 0], sizes = [1, 8, 8], strides = [1, 1, 1]} : vector<8x8x8xf32> to vector<1x8x8xf32>
    %258 = vector.shape_cast %257 : vector<1x8x8xf32> to vector<8x8xf32>
    %259 = vector.broadcast %256 : f32 to vector<8x8xf32>
    %260 = arith.mulf %259, %258 : vector<8x8xf32>
    %c5_91 = arith.constant 5 : index
    %c1_92 = arith.constant 1 : index
    %261 = memref.load %arg6[%c5_91, %c1_92] : memref<8x8xf32, #tpu.memory_space<smem>>
    %262 = vector.extract_strided_slice %20 {offsets = [1, 0, 0], sizes = [1, 8, 8], strides = [1, 1, 1]} : vector<8x8x8xf32> to vector<1x8x8xf32>
    %263 = vector.shape_cast %262 : vector<1x8x8xf32> to vector<8x8xf32>
    %264 = vector.broadcast %261 : f32 to vector<8x8xf32>
    %265 = arith.mulf %264, %263 : vector<8x8xf32>
    %266 = arith.addf %260, %265 : vector<8x8xf32>
    %c5_93 = arith.constant 5 : index
    %c2_94 = arith.constant 2 : index
    %267 = memref.load %arg6[%c5_93, %c2_94] : memref<8x8xf32, #tpu.memory_space<smem>>
    %268 = vector.extract_strided_slice %20 {offsets = [2, 0, 0], sizes = [1, 8, 8], strides = [1, 1, 1]} : vector<8x8x8xf32> to vector<1x8x8xf32>
    %269 = vector.shape_cast %268 : vector<1x8x8xf32> to vector<8x8xf32>
    %270 = vector.broadcast %267 : f32 to vector<8x8xf32>
    %271 = arith.mulf %270, %269 : vector<8x8xf32>
    %272 = arith.addf %266, %271 : vector<8x8xf32>
    %c5_95 = arith.constant 5 : index
    %c3_96 = arith.constant 3 : index
    %273 = memref.load %arg6[%c5_95, %c3_96] : memref<8x8xf32, #tpu.memory_space<smem>>
    %274 = vector.extract_strided_slice %20 {offsets = [3, 0, 0], sizes = [1, 8, 8], strides = [1, 1, 1]} : vector<8x8x8xf32> to vector<1x8x8xf32>
    %275 = vector.shape_cast %274 : vector<1x8x8xf32> to vector<8x8xf32>
    %276 = vector.broadcast %273 : f32 to vector<8x8xf32>
    %277 = arith.mulf %276, %275 : vector<8x8xf32>
    %278 = arith.addf %272, %277 : vector<8x8xf32>
    %c5_97 = arith.constant 5 : index
    %c4_98 = arith.constant 4 : index
    %279 = memref.load %arg6[%c5_97, %c4_98] : memref<8x8xf32, #tpu.memory_space<smem>>
    %280 = vector.extract_strided_slice %20 {offsets = [4, 0, 0], sizes = [1, 8, 8], strides = [1, 1, 1]} : vector<8x8x8xf32> to vector<1x8x8xf32>
    %281 = vector.shape_cast %280 : vector<1x8x8xf32> to vector<8x8xf32>
    %282 = vector.broadcast %279 : f32 to vector<8x8xf32>
    %283 = arith.mulf %282, %281 : vector<8x8xf32>
    %284 = arith.addf %278, %283 : vector<8x8xf32>
    %c5_99 = arith.constant 5 : index
    %c5_100 = arith.constant 5 : index
    %285 = memref.load %arg6[%c5_99, %c5_100] : memref<8x8xf32, #tpu.memory_space<smem>>
    %286 = vector.extract_strided_slice %20 {offsets = [5, 0, 0], sizes = [1, 8, 8], strides = [1, 1, 1]} : vector<8x8x8xf32> to vector<1x8x8xf32>
    %287 = vector.shape_cast %286 : vector<1x8x8xf32> to vector<8x8xf32>
    %288 = vector.broadcast %285 : f32 to vector<8x8xf32>
    %289 = arith.mulf %288, %287 : vector<8x8xf32>
    %290 = arith.addf %284, %289 : vector<8x8xf32>
    %c5_101 = arith.constant 5 : index
    %c6_102 = arith.constant 6 : index
    %291 = memref.load %arg6[%c5_101, %c6_102] : memref<8x8xf32, #tpu.memory_space<smem>>
    %292 = vector.extract_strided_slice %20 {offsets = [6, 0, 0], sizes = [1, 8, 8], strides = [1, 1, 1]} : vector<8x8x8xf32> to vector<1x8x8xf32>
    %293 = vector.shape_cast %292 : vector<1x8x8xf32> to vector<8x8xf32>
    %294 = vector.broadcast %291 : f32 to vector<8x8xf32>
    %295 = arith.mulf %294, %293 : vector<8x8xf32>
    %296 = arith.addf %290, %295 : vector<8x8xf32>
    %c5_103 = arith.constant 5 : index
    %c7_104 = arith.constant 7 : index
    %297 = memref.load %arg6[%c5_103, %c7_104] : memref<8x8xf32, #tpu.memory_space<smem>>
    %298 = vector.extract_strided_slice %20 {offsets = [7, 0, 0], sizes = [1, 8, 8], strides = [1, 1, 1]} : vector<8x8x8xf32> to vector<1x8x8xf32>
    %299 = vector.shape_cast %298 : vector<1x8x8xf32> to vector<8x8xf32>
    %300 = vector.broadcast %297 : f32 to vector<8x8xf32>
    %301 = arith.mulf %300, %299 : vector<8x8xf32>
    %302 = arith.addf %296, %301 : vector<8x8xf32>
    %c6_105 = arith.constant 6 : index
    %c0_106 = arith.constant 0 : index
    %303 = memref.load %arg6[%c6_105, %c0_106] : memref<8x8xf32, #tpu.memory_space<smem>>
    %304 = vector.extract_strided_slice %20 {offsets = [0, 0, 0], sizes = [1, 8, 8], strides = [1, 1, 1]} : vector<8x8x8xf32> to vector<1x8x8xf32>
    %305 = vector.shape_cast %304 : vector<1x8x8xf32> to vector<8x8xf32>
    %306 = vector.broadcast %303 : f32 to vector<8x8xf32>
    %307 = arith.mulf %306, %305 : vector<8x8xf32>
    %c6_107 = arith.constant 6 : index
    %c1_108 = arith.constant 1 : index
    %308 = memref.load %arg6[%c6_107, %c1_108] : memref<8x8xf32, #tpu.memory_space<smem>>
    %309 = vector.extract_strided_slice %20 {offsets = [1, 0, 0], sizes = [1, 8, 8], strides = [1, 1, 1]} : vector<8x8x8xf32> to vector<1x8x8xf32>
    %310 = vector.shape_cast %309 : vector<1x8x8xf32> to vector<8x8xf32>
    %311 = vector.broadcast %308 : f32 to vector<8x8xf32>
    %312 = arith.mulf %311, %310 : vector<8x8xf32>
    %313 = arith.addf %307, %312 : vector<8x8xf32>
    %c6_109 = arith.constant 6 : index
    %c2_110 = arith.constant 2 : index
    %314 = memref.load %arg6[%c6_109, %c2_110] : memref<8x8xf32, #tpu.memory_space<smem>>
    %315 = vector.extract_strided_slice %20 {offsets = [2, 0, 0], sizes = [1, 8, 8], strides = [1, 1, 1]} : vector<8x8x8xf32> to vector<1x8x8xf32>
    %316 = vector.shape_cast %315 : vector<1x8x8xf32> to vector<8x8xf32>
    %317 = vector.broadcast %314 : f32 to vector<8x8xf32>
    %318 = arith.mulf %317, %316 : vector<8x8xf32>
    %319 = arith.addf %313, %318 : vector<8x8xf32>
    %c6_111 = arith.constant 6 : index
    %c3_112 = arith.constant 3 : index
    %320 = memref.load %arg6[%c6_111, %c3_112] : memref<8x8xf32, #tpu.memory_space<smem>>
    %321 = vector.extract_strided_slice %20 {offsets = [3, 0, 0], sizes = [1, 8, 8], strides = [1, 1, 1]} : vector<8x8x8xf32> to vector<1x8x8xf32>
    %322 = vector.shape_cast %321 : vector<1x8x8xf32> to vector<8x8xf32>
    %323 = vector.broadcast %320 : f32 to vector<8x8xf32>
    %324 = arith.mulf %323, %322 : vector<8x8xf32>
    %325 = arith.addf %319, %324 : vector<8x8xf32>
    %c6_113 = arith.constant 6 : index
    %c4_114 = arith.constant 4 : index
    %326 = memref.load %arg6[%c6_113, %c4_114] : memref<8x8xf32, #tpu.memory_space<smem>>
    %327 = vector.extract_strided_slice %20 {offsets = [4, 0, 0], sizes = [1, 8, 8], strides = [1, 1, 1]} : vector<8x8x8xf32> to vector<1x8x8xf32>
    %328 = vector.shape_cast %327 : vector<1x8x8xf32> to vector<8x8xf32>
    %329 = vector.broadcast %326 : f32 to vector<8x8xf32>
    %330 = arith.mulf %329, %328 : vector<8x8xf32>
    %331 = arith.addf %325, %330 : vector<8x8xf32>
    %c6_115 = arith.constant 6 : index
    %c5_116 = arith.constant 5 : index
    %332 = memref.load %arg6[%c6_115, %c5_116] : memref<8x8xf32, #tpu.memory_space<smem>>
    %333 = vector.extract_strided_slice %20 {offsets = [5, 0, 0], sizes = [1, 8, 8], strides = [1, 1, 1]} : vector<8x8x8xf32> to vector<1x8x8xf32>
    %334 = vector.shape_cast %333 : vector<1x8x8xf32> to vector<8x8xf32>
    %335 = vector.broadcast %332 : f32 to vector<8x8xf32>
    %336 = arith.mulf %335, %334 : vector<8x8xf32>
    %337 = arith.addf %331, %336 : vector<8x8xf32>
    %c6_117 = arith.constant 6 : index
    %c6_118 = arith.constant 6 : index
    %338 = memref.load %arg6[%c6_117, %c6_118] : memref<8x8xf32, #tpu.memory_space<smem>>
    %339 = vector.extract_strided_slice %20 {offsets = [6, 0, 0], sizes = [1, 8, 8], strides = [1, 1, 1]} : vector<8x8x8xf32> to vector<1x8x8xf32>
    %340 = vector.shape_cast %339 : vector<1x8x8xf32> to vector<8x8xf32>
    %341 = vector.broadcast %338 : f32 to vector<8x8xf32>
    %342 = arith.mulf %341, %340 : vector<8x8xf32>
    %343 = arith.addf %337, %342 : vector<8x8xf32>
    %c6_119 = arith.constant 6 : index
    %c7_120 = arith.constant 7 : index
    %344 = memref.load %arg6[%c6_119, %c7_120] : memref<8x8xf32, #tpu.memory_space<smem>>
    %345 = vector.extract_strided_slice %20 {offsets = [7, 0, 0], sizes = [1, 8, 8], strides = [1, 1, 1]} : vector<8x8x8xf32> to vector<1x8x8xf32>
    %346 = vector.shape_cast %345 : vector<1x8x8xf32> to vector<8x8xf32>
    %347 = vector.broadcast %344 : f32 to vector<8x8xf32>
    %348 = arith.mulf %347, %346 : vector<8x8xf32>
    %349 = arith.addf %343, %348 : vector<8x8xf32>
    %c7_121 = arith.constant 7 : index
    %c0_122 = arith.constant 0 : index
    %350 = memref.load %arg6[%c7_121, %c0_122] : memref<8x8xf32, #tpu.memory_space<smem>>
    %351 = vector.extract_strided_slice %20 {offsets = [0, 0, 0], sizes = [1, 8, 8], strides = [1, 1, 1]} : vector<8x8x8xf32> to vector<1x8x8xf32>
    %352 = vector.shape_cast %351 : vector<1x8x8xf32> to vector<8x8xf32>
    %353 = vector.broadcast %350 : f32 to vector<8x8xf32>
    %354 = arith.mulf %353, %352 : vector<8x8xf32>
    %c7_123 = arith.constant 7 : index
    %c1_124 = arith.constant 1 : index
    %355 = memref.load %arg6[%c7_123, %c1_124] : memref<8x8xf32, #tpu.memory_space<smem>>
    %356 = vector.extract_strided_slice %20 {offsets = [1, 0, 0], sizes = [1, 8, 8], strides = [1, 1, 1]} : vector<8x8x8xf32> to vector<1x8x8xf32>
    %357 = vector.shape_cast %356 : vector<1x8x8xf32> to vector<8x8xf32>
    %358 = vector.broadcast %355 : f32 to vector<8x8xf32>
    %359 = arith.mulf %358, %357 : vector<8x8xf32>
    %360 = arith.addf %354, %359 : vector<8x8xf32>
    %c7_125 = arith.constant 7 : index
    %c2_126 = arith.constant 2 : index
    %361 = memref.load %arg6[%c7_125, %c2_126] : memref<8x8xf32, #tpu.memory_space<smem>>
    %362 = vector.extract_strided_slice %20 {offsets = [2, 0, 0], sizes = [1, 8, 8], strides = [1, 1, 1]} : vector<8x8x8xf32> to vector<1x8x8xf32>
    %363 = vector.shape_cast %362 : vector<1x8x8xf32> to vector<8x8xf32>
    %364 = vector.broadcast %361 : f32 to vector<8x8xf32>
    %365 = arith.mulf %364, %363 : vector<8x8xf32>
    %366 = arith.addf %360, %365 : vector<8x8xf32>
    %c7_127 = arith.constant 7 : index
    %c3_128 = arith.constant 3 : index
    %367 = memref.load %arg6[%c7_127, %c3_128] : memref<8x8xf32, #tpu.memory_space<smem>>
    %368 = vector.extract_strided_slice %20 {offsets = [3, 0, 0], sizes = [1, 8, 8], strides = [1, 1, 1]} : vector<8x8x8xf32> to vector<1x8x8xf32>
    %369 = vector.shape_cast %368 : vector<1x8x8xf32> to vector<8x8xf32>
    %370 = vector.broadcast %367 : f32 to vector<8x8xf32>
    %371 = arith.mulf %370, %369 : vector<8x8xf32>
    %372 = arith.addf %366, %371 : vector<8x8xf32>
    %c7_129 = arith.constant 7 : index
    %c4_130 = arith.constant 4 : index
    %373 = memref.load %arg6[%c7_129, %c4_130] : memref<8x8xf32, #tpu.memory_space<smem>>
    %374 = vector.extract_strided_slice %20 {offsets = [4, 0, 0], sizes = [1, 8, 8], strides = [1, 1, 1]} : vector<8x8x8xf32> to vector<1x8x8xf32>
    %375 = vector.shape_cast %374 : vector<1x8x8xf32> to vector<8x8xf32>
    %376 = vector.broadcast %373 : f32 to vector<8x8xf32>
    %377 = arith.mulf %376, %375 : vector<8x8xf32>
    %378 = arith.addf %372, %377 : vector<8x8xf32>
    %c7_131 = arith.constant 7 : index
    %c5_132 = arith.constant 5 : index
    %379 = memref.load %arg6[%c7_131, %c5_132] : memref<8x8xf32, #tpu.memory_space<smem>>
    %380 = vector.extract_strided_slice %20 {offsets = [5, 0, 0], sizes = [1, 8, 8], strides = [1, 1, 1]} : vector<8x8x8xf32> to vector<1x8x8xf32>
    %381 = vector.shape_cast %380 : vector<1x8x8xf32> to vector<8x8xf32>
    %382 = vector.broadcast %379 : f32 to vector<8x8xf32>
    %383 = arith.mulf %382, %381 : vector<8x8xf32>
    %384 = arith.addf %378, %383 : vector<8x8xf32>
    %c7_133 = arith.constant 7 : index
    %c6_134 = arith.constant 6 : index
    %385 = memref.load %arg6[%c7_133, %c6_134] : memref<8x8xf32, #tpu.memory_space<smem>>
    %386 = vector.extract_strided_slice %20 {offsets = [6, 0, 0], sizes = [1, 8, 8], strides = [1, 1, 1]} : vector<8x8x8xf32> to vector<1x8x8xf32>
    %387 = vector.shape_cast %386 : vector<1x8x8xf32> to vector<8x8xf32>
    %388 = vector.broadcast %385 : f32 to vector<8x8xf32>
    %389 = arith.mulf %388, %387 : vector<8x8xf32>
    %390 = arith.addf %384, %389 : vector<8x8xf32>
    %c7_135 = arith.constant 7 : index
    %c7_136 = arith.constant 7 : index
    %391 = memref.load %arg6[%c7_135, %c7_136] : memref<8x8xf32, #tpu.memory_space<smem>>
    %392 = vector.extract_strided_slice %20 {offsets = [7, 0, 0], sizes = [1, 8, 8], strides = [1, 1, 1]} : vector<8x8x8xf32> to vector<1x8x8xf32>
    %393 = vector.shape_cast %392 : vector<1x8x8xf32> to vector<8x8xf32>
    %394 = vector.broadcast %391 : f32 to vector<8x8xf32>
    %395 = arith.mulf %394, %393 : vector<8x8xf32>
    %396 = arith.addf %390, %395 : vector<8x8xf32>
    %397 = vector.shape_cast %67 : vector<8x8xf32> to vector<1x8x8xf32>
    %398 = vector.shape_cast %114 : vector<8x8xf32> to vector<1x8x8xf32>
    %399 = vector.shape_cast %161 : vector<8x8xf32> to vector<1x8x8xf32>
    %400 = vector.shape_cast %208 : vector<8x8xf32> to vector<1x8x8xf32>
    %401 = vector.shape_cast %255 : vector<8x8xf32> to vector<1x8x8xf32>
    %402 = vector.shape_cast %302 : vector<8x8xf32> to vector<1x8x8xf32>
    %403 = vector.shape_cast %349 : vector<8x8xf32> to vector<1x8x8xf32>
    %404 = vector.shape_cast %396 : vector<8x8xf32> to vector<1x8x8xf32>
    %405 = tpu.concatenate %397, %398, %399, %400, %401, %402, %403, %404 in 0 : vector<1x8x8xf32>, vector<1x8x8xf32>, vector<1x8x8xf32>, vector<1x8x8xf32>, vector<1x8x8xf32>, vector<1x8x8xf32>, vector<1x8x8xf32>, vector<1x8x8xf32> -> vector<8x8x8xf32>
    %cst_137 = arith.constant dense<0xFF800000> : vector<8x8xf32>
    %406 = vector.multi_reduction <maximumf>, %405, %cst_137 [2] : vector<8x8x8xf32> to vector<8x8xf32>
    %407 = vector.shape_cast %406 : vector<8x8xf32> to vector<8x8x1xf32>
    %408 = vector.broadcast %407 : vector<8x8x1xf32> to vector<8x8x8xf32>
    %409 = arith.subf %405, %408 : vector<8x8x8xf32>
    %410 = math.exp %409 : vector<8x8x8xf32>
    %cst_138 = arith.constant dense<0.000000e+00> : vector<8x8xf32>
    %411 = vector.multi_reduction <add>, %410, %cst_138 [2] : vector<8x8x8xf32> to vector<8x8xf32>
    %412 = vector.shape_cast %411 : vector<8x8xf32> to vector<8x8x1xf32>
    %413 = vector.broadcast %412 : vector<8x8x1xf32> to vector<8x8x8xf32>
    %414 = arith.divf %410, %413 : vector<8x8x8xf32>
    %c0_139 = arith.constant 0 : index
    %c0_140 = arith.constant 0 : index
    %415 = memref.load %arg7[%c0_139, %c0_140] : memref<8x8xf32, #tpu.memory_space<smem>>
    %416 = vector.extract_strided_slice %414 {offsets = [0, 0, 0], sizes = [1, 8, 8], strides = [1, 1, 1]} : vector<8x8x8xf32> to vector<1x8x8xf32>
    %417 = vector.shape_cast %416 : vector<1x8x8xf32> to vector<8x8xf32>
    %418 = vector.broadcast %415 : f32 to vector<8x8xf32>
    %419 = arith.mulf %418, %417 : vector<8x8xf32>
    %c0_141 = arith.constant 0 : index
    %c1_142 = arith.constant 1 : index
    %420 = memref.load %arg7[%c0_141, %c1_142] : memref<8x8xf32, #tpu.memory_space<smem>>
    %421 = vector.extract_strided_slice %414 {offsets = [1, 0, 0], sizes = [1, 8, 8], strides = [1, 1, 1]} : vector<8x8x8xf32> to vector<1x8x8xf32>
    %422 = vector.shape_cast %421 : vector<1x8x8xf32> to vector<8x8xf32>
    %423 = vector.broadcast %420 : f32 to vector<8x8xf32>
    %424 = arith.mulf %423, %422 : vector<8x8xf32>
    %425 = arith.addf %419, %424 : vector<8x8xf32>
    %c0_143 = arith.constant 0 : index
    %c2_144 = arith.constant 2 : index
    %426 = memref.load %arg7[%c0_143, %c2_144] : memref<8x8xf32, #tpu.memory_space<smem>>
    %427 = vector.extract_strided_slice %414 {offsets = [2, 0, 0], sizes = [1, 8, 8], strides = [1, 1, 1]} : vector<8x8x8xf32> to vector<1x8x8xf32>
    %428 = vector.shape_cast %427 : vector<1x8x8xf32> to vector<8x8xf32>
    %429 = vector.broadcast %426 : f32 to vector<8x8xf32>
    %430 = arith.mulf %429, %428 : vector<8x8xf32>
    %431 = arith.addf %425, %430 : vector<8x8xf32>
    %c0_145 = arith.constant 0 : index
    %c3_146 = arith.constant 3 : index
    %432 = memref.load %arg7[%c0_145, %c3_146] : memref<8x8xf32, #tpu.memory_space<smem>>
    %433 = vector.extract_strided_slice %414 {offsets = [3, 0, 0], sizes = [1, 8, 8], strides = [1, 1, 1]} : vector<8x8x8xf32> to vector<1x8x8xf32>
    %434 = vector.shape_cast %433 : vector<1x8x8xf32> to vector<8x8xf32>
    %435 = vector.broadcast %432 : f32 to vector<8x8xf32>
    %436 = arith.mulf %435, %434 : vector<8x8xf32>
    %437 = arith.addf %431, %436 : vector<8x8xf32>
    %c0_147 = arith.constant 0 : index
    %c4_148 = arith.constant 4 : index
    %438 = memref.load %arg7[%c0_147, %c4_148] : memref<8x8xf32, #tpu.memory_space<smem>>
    %439 = vector.extract_strided_slice %414 {offsets = [4, 0, 0], sizes = [1, 8, 8], strides = [1, 1, 1]} : vector<8x8x8xf32> to vector<1x8x8xf32>
    %440 = vector.shape_cast %439 : vector<1x8x8xf32> to vector<8x8xf32>
    %441 = vector.broadcast %438 : f32 to vector<8x8xf32>
    %442 = arith.mulf %441, %440 : vector<8x8xf32>
    %443 = arith.addf %437, %442 : vector<8x8xf32>
    %c0_149 = arith.constant 0 : index
    %c5_150 = arith.constant 5 : index
    %444 = memref.load %arg7[%c0_149, %c5_150] : memref<8x8xf32, #tpu.memory_space<smem>>
    %445 = vector.extract_strided_slice %414 {offsets = [5, 0, 0], sizes = [1, 8, 8], strides = [1, 1, 1]} : vector<8x8x8xf32> to vector<1x8x8xf32>
    %446 = vector.shape_cast %445 : vector<1x8x8xf32> to vector<8x8xf32>
    %447 = vector.broadcast %444 : f32 to vector<8x8xf32>
    %448 = arith.mulf %447, %446 : vector<8x8xf32>
    %449 = arith.addf %443, %448 : vector<8x8xf32>
    %c0_151 = arith.constant 0 : index
    %c6_152 = arith.constant 6 : index
    %450 = memref.load %arg7[%c0_151, %c6_152] : memref<8x8xf32, #tpu.memory_space<smem>>
    %451 = vector.extract_strided_slice %414 {offsets = [6, 0, 0], sizes = [1, 8, 8], strides = [1, 1, 1]} : vector<8x8x8xf32> to vector<1x8x8xf32>
    %452 = vector.shape_cast %451 : vector<1x8x8xf32> to vector<8x8xf32>
    %453 = vector.broadcast %450 : f32 to vector<8x8xf32>
    %454 = arith.mulf %453, %452 : vector<8x8xf32>
    %455 = arith.addf %449, %454 : vector<8x8xf32>
    %c0_153 = arith.constant 0 : index
    %c7_154 = arith.constant 7 : index
    %456 = memref.load %arg7[%c0_153, %c7_154] : memref<8x8xf32, #tpu.memory_space<smem>>
    %457 = vector.extract_strided_slice %414 {offsets = [7, 0, 0], sizes = [1, 8, 8], strides = [1, 1, 1]} : vector<8x8x8xf32> to vector<1x8x8xf32>
    %458 = vector.shape_cast %457 : vector<1x8x8xf32> to vector<8x8xf32>
    %459 = vector.broadcast %456 : f32 to vector<8x8xf32>
    %460 = arith.mulf %459, %458 : vector<8x8xf32>
    %461 = arith.addf %455, %460 : vector<8x8xf32>
    %c1_155 = arith.constant 1 : index
    %c0_156 = arith.constant 0 : index
    %462 = memref.load %arg7[%c1_155, %c0_156] : memref<8x8xf32, #tpu.memory_space<smem>>
    %463 = vector.extract_strided_slice %414 {offsets = [0, 0, 0], sizes = [1, 8, 8], strides = [1, 1, 1]} : vector<8x8x8xf32> to vector<1x8x8xf32>
    %464 = vector.shape_cast %463 : vector<1x8x8xf32> to vector<8x8xf32>
    %465 = vector.broadcast %462 : f32 to vector<8x8xf32>
    %466 = arith.mulf %465, %464 : vector<8x8xf32>
    %c1_157 = arith.constant 1 : index
    %c1_158 = arith.constant 1 : index
    %467 = memref.load %arg7[%c1_157, %c1_158] : memref<8x8xf32, #tpu.memory_space<smem>>
    %468 = vector.extract_strided_slice %414 {offsets = [1, 0, 0], sizes = [1, 8, 8], strides = [1, 1, 1]} : vector<8x8x8xf32> to vector<1x8x8xf32>
    %469 = vector.shape_cast %468 : vector<1x8x8xf32> to vector<8x8xf32>
    %470 = vector.broadcast %467 : f32 to vector<8x8xf32>
    %471 = arith.mulf %470, %469 : vector<8x8xf32>
    %472 = arith.addf %466, %471 : vector<8x8xf32>
    %c1_159 = arith.constant 1 : index
    %c2_160 = arith.constant 2 : index
    %473 = memref.load %arg7[%c1_159, %c2_160] : memref<8x8xf32, #tpu.memory_space<smem>>
    %474 = vector.extract_strided_slice %414 {offsets = [2, 0, 0], sizes = [1, 8, 8], strides = [1, 1, 1]} : vector<8x8x8xf32> to vector<1x8x8xf32>
    %475 = vector.shape_cast %474 : vector<1x8x8xf32> to vector<8x8xf32>
    %476 = vector.broadcast %473 : f32 to vector<8x8xf32>
    %477 = arith.mulf %476, %475 : vector<8x8xf32>
    %478 = arith.addf %472, %477 : vector<8x8xf32>
    %c1_161 = arith.constant 1 : index
    %c3_162 = arith.constant 3 : index
    %479 = memref.load %arg7[%c1_161, %c3_162] : memref<8x8xf32, #tpu.memory_space<smem>>
    %480 = vector.extract_strided_slice %414 {offsets = [3, 0, 0], sizes = [1, 8, 8], strides = [1, 1, 1]} : vector<8x8x8xf32> to vector<1x8x8xf32>
    %481 = vector.shape_cast %480 : vector<1x8x8xf32> to vector<8x8xf32>
    %482 = vector.broadcast %479 : f32 to vector<8x8xf32>
    %483 = arith.mulf %482, %481 : vector<8x8xf32>
    %484 = arith.addf %478, %483 : vector<8x8xf32>
    %c1_163 = arith.constant 1 : index
    %c4_164 = arith.constant 4 : index
    %485 = memref.load %arg7[%c1_163, %c4_164] : memref<8x8xf32, #tpu.memory_space<smem>>
    %486 = vector.extract_strided_slice %414 {offsets = [4, 0, 0], sizes = [1, 8, 8], strides = [1, 1, 1]} : vector<8x8x8xf32> to vector<1x8x8xf32>
    %487 = vector.shape_cast %486 : vector<1x8x8xf32> to vector<8x8xf32>
    %488 = vector.broadcast %485 : f32 to vector<8x8xf32>
    %489 = arith.mulf %488, %487 : vector<8x8xf32>
    %490 = arith.addf %484, %489 : vector<8x8xf32>
    %c1_165 = arith.constant 1 : index
    %c5_166 = arith.constant 5 : index
    %491 = memref.load %arg7[%c1_165, %c5_166] : memref<8x8xf32, #tpu.memory_space<smem>>
    %492 = vector.extract_strided_slice %414 {offsets = [5, 0, 0], sizes = [1, 8, 8], strides = [1, 1, 1]} : vector<8x8x8xf32> to vector<1x8x8xf32>
    %493 = vector.shape_cast %492 : vector<1x8x8xf32> to vector<8x8xf32>
    %494 = vector.broadcast %491 : f32 to vector<8x8xf32>
    %495 = arith.mulf %494, %493 : vector<8x8xf32>
    %496 = arith.addf %490, %495 : vector<8x8xf32>
    %c1_167 = arith.constant 1 : index
    %c6_168 = arith.constant 6 : index
    %497 = memref.load %arg7[%c1_167, %c6_168] : memref<8x8xf32, #tpu.memory_space<smem>>
    %498 = vector.extract_strided_slice %414 {offsets = [6, 0, 0], sizes = [1, 8, 8], strides = [1, 1, 1]} : vector<8x8x8xf32> to vector<1x8x8xf32>
    %499 = vector.shape_cast %498 : vector<1x8x8xf32> to vector<8x8xf32>
    %500 = vector.broadcast %497 : f32 to vector<8x8xf32>
    %501 = arith.mulf %500, %499 : vector<8x8xf32>
    %502 = arith.addf %496, %501 : vector<8x8xf32>
    %c1_169 = arith.constant 1 : index
    %c7_170 = arith.constant 7 : index
    %503 = memref.load %arg7[%c1_169, %c7_170] : memref<8x8xf32, #tpu.memory_space<smem>>
    %504 = vector.extract_strided_slice %414 {offsets = [7, 0, 0], sizes = [1, 8, 8], strides = [1, 1, 1]} : vector<8x8x8xf32> to vector<1x8x8xf32>
    %505 = vector.shape_cast %504 : vector<1x8x8xf32> to vector<8x8xf32>
    %506 = vector.broadcast %503 : f32 to vector<8x8xf32>
    %507 = arith.mulf %506, %505 : vector<8x8xf32>
    %508 = arith.addf %502, %507 : vector<8x8xf32>
    %c2_171 = arith.constant 2 : index
    %c0_172 = arith.constant 0 : index
    %509 = memref.load %arg7[%c2_171, %c0_172] : memref<8x8xf32, #tpu.memory_space<smem>>
    %510 = vector.extract_strided_slice %414 {offsets = [0, 0, 0], sizes = [1, 8, 8], strides = [1, 1, 1]} : vector<8x8x8xf32> to vector<1x8x8xf32>
    %511 = vector.shape_cast %510 : vector<1x8x8xf32> to vector<8x8xf32>
    %512 = vector.broadcast %509 : f32 to vector<8x8xf32>
    %513 = arith.mulf %512, %511 : vector<8x8xf32>
    %c2_173 = arith.constant 2 : index
    %c1_174 = arith.constant 1 : index
    %514 = memref.load %arg7[%c2_173, %c1_174] : memref<8x8xf32, #tpu.memory_space<smem>>
    %515 = vector.extract_strided_slice %414 {offsets = [1, 0, 0], sizes = [1, 8, 8], strides = [1, 1, 1]} : vector<8x8x8xf32> to vector<1x8x8xf32>
    %516 = vector.shape_cast %515 : vector<1x8x8xf32> to vector<8x8xf32>
    %517 = vector.broadcast %514 : f32 to vector<8x8xf32>
    %518 = arith.mulf %517, %516 : vector<8x8xf32>
    %519 = arith.addf %513, %518 : vector<8x8xf32>
    %c2_175 = arith.constant 2 : index
    %c2_176 = arith.constant 2 : index
    %520 = memref.load %arg7[%c2_175, %c2_176] : memref<8x8xf32, #tpu.memory_space<smem>>
    %521 = vector.extract_strided_slice %414 {offsets = [2, 0, 0], sizes = [1, 8, 8], strides = [1, 1, 1]} : vector<8x8x8xf32> to vector<1x8x8xf32>
    %522 = vector.shape_cast %521 : vector<1x8x8xf32> to vector<8x8xf32>
    %523 = vector.broadcast %520 : f32 to vector<8x8xf32>
    %524 = arith.mulf %523, %522 : vector<8x8xf32>
    %525 = arith.addf %519, %524 : vector<8x8xf32>
    %c2_177 = arith.constant 2 : index
    %c3_178 = arith.constant 3 : index
    %526 = memref.load %arg7[%c2_177, %c3_178] : memref<8x8xf32, #tpu.memory_space<smem>>
    %527 = vector.extract_strided_slice %414 {offsets = [3, 0, 0], sizes = [1, 8, 8], strides = [1, 1, 1]} : vector<8x8x8xf32> to vector<1x8x8xf32>
    %528 = vector.shape_cast %527 : vector<1x8x8xf32> to vector<8x8xf32>
    %529 = vector.broadcast %526 : f32 to vector<8x8xf32>
    %530 = arith.mulf %529, %528 : vector<8x8xf32>
    %531 = arith.addf %525, %530 : vector<8x8xf32>
    %c2_179 = arith.constant 2 : index
    %c4_180 = arith.constant 4 : index
    %532 = memref.load %arg7[%c2_179, %c4_180] : memref<8x8xf32, #tpu.memory_space<smem>>
    %533 = vector.extract_strided_slice %414 {offsets = [4, 0, 0], sizes = [1, 8, 8], strides = [1, 1, 1]} : vector<8x8x8xf32> to vector<1x8x8xf32>
    %534 = vector.shape_cast %533 : vector<1x8x8xf32> to vector<8x8xf32>
    %535 = vector.broadcast %532 : f32 to vector<8x8xf32>
    %536 = arith.mulf %535, %534 : vector<8x8xf32>
    %537 = arith.addf %531, %536 : vector<8x8xf32>
    %c2_181 = arith.constant 2 : index
    %c5_182 = arith.constant 5 : index
    %538 = memref.load %arg7[%c2_181, %c5_182] : memref<8x8xf32, #tpu.memory_space<smem>>
    %539 = vector.extract_strided_slice %414 {offsets = [5, 0, 0], sizes = [1, 8, 8], strides = [1, 1, 1]} : vector<8x8x8xf32> to vector<1x8x8xf32>
    %540 = vector.shape_cast %539 : vector<1x8x8xf32> to vector<8x8xf32>
    %541 = vector.broadcast %538 : f32 to vector<8x8xf32>
    %542 = arith.mulf %541, %540 : vector<8x8xf32>
    %543 = arith.addf %537, %542 : vector<8x8xf32>
    %c2_183 = arith.constant 2 : index
    %c6_184 = arith.constant 6 : index
    %544 = memref.load %arg7[%c2_183, %c6_184] : memref<8x8xf32, #tpu.memory_space<smem>>
    %545 = vector.extract_strided_slice %414 {offsets = [6, 0, 0], sizes = [1, 8, 8], strides = [1, 1, 1]} : vector<8x8x8xf32> to vector<1x8x8xf32>
    %546 = vector.shape_cast %545 : vector<1x8x8xf32> to vector<8x8xf32>
    %547 = vector.broadcast %544 : f32 to vector<8x8xf32>
    %548 = arith.mulf %547, %546 : vector<8x8xf32>
    %549 = arith.addf %543, %548 : vector<8x8xf32>
    %c2_185 = arith.constant 2 : index
    %c7_186 = arith.constant 7 : index
    %550 = memref.load %arg7[%c2_185, %c7_186] : memref<8x8xf32, #tpu.memory_space<smem>>
    %551 = vector.extract_strided_slice %414 {offsets = [7, 0, 0], sizes = [1, 8, 8], strides = [1, 1, 1]} : vector<8x8x8xf32> to vector<1x8x8xf32>
    %552 = vector.shape_cast %551 : vector<1x8x8xf32> to vector<8x8xf32>
    %553 = vector.broadcast %550 : f32 to vector<8x8xf32>
    %554 = arith.mulf %553, %552 : vector<8x8xf32>
    %555 = arith.addf %549, %554 : vector<8x8xf32>
    %c3_187 = arith.constant 3 : index
    %c0_188 = arith.constant 0 : index
    %556 = memref.load %arg7[%c3_187, %c0_188] : memref<8x8xf32, #tpu.memory_space<smem>>
    %557 = vector.extract_strided_slice %414 {offsets = [0, 0, 0], sizes = [1, 8, 8], strides = [1, 1, 1]} : vector<8x8x8xf32> to vector<1x8x8xf32>
    %558 = vector.shape_cast %557 : vector<1x8x8xf32> to vector<8x8xf32>
    %559 = vector.broadcast %556 : f32 to vector<8x8xf32>
    %560 = arith.mulf %559, %558 : vector<8x8xf32>
    %c3_189 = arith.constant 3 : index
    %c1_190 = arith.constant 1 : index
    %561 = memref.load %arg7[%c3_189, %c1_190] : memref<8x8xf32, #tpu.memory_space<smem>>
    %562 = vector.extract_strided_slice %414 {offsets = [1, 0, 0], sizes = [1, 8, 8], strides = [1, 1, 1]} : vector<8x8x8xf32> to vector<1x8x8xf32>
    %563 = vector.shape_cast %562 : vector<1x8x8xf32> to vector<8x8xf32>
    %564 = vector.broadcast %561 : f32 to vector<8x8xf32>
    %565 = arith.mulf %564, %563 : vector<8x8xf32>
    %566 = arith.addf %560, %565 : vector<8x8xf32>
    %c3_191 = arith.constant 3 : index
    %c2_192 = arith.constant 2 : index
    %567 = memref.load %arg7[%c3_191, %c2_192] : memref<8x8xf32, #tpu.memory_space<smem>>
    %568 = vector.extract_strided_slice %414 {offsets = [2, 0, 0], sizes = [1, 8, 8], strides = [1, 1, 1]} : vector<8x8x8xf32> to vector<1x8x8xf32>
    %569 = vector.shape_cast %568 : vector<1x8x8xf32> to vector<8x8xf32>
    %570 = vector.broadcast %567 : f32 to vector<8x8xf32>
    %571 = arith.mulf %570, %569 : vector<8x8xf32>
    %572 = arith.addf %566, %571 : vector<8x8xf32>
    %c3_193 = arith.constant 3 : index
    %c3_194 = arith.constant 3 : index
    %573 = memref.load %arg7[%c3_193, %c3_194] : memref<8x8xf32, #tpu.memory_space<smem>>
    %574 = vector.extract_strided_slice %414 {offsets = [3, 0, 0], sizes = [1, 8, 8], strides = [1, 1, 1]} : vector<8x8x8xf32> to vector<1x8x8xf32>
    %575 = vector.shape_cast %574 : vector<1x8x8xf32> to vector<8x8xf32>
    %576 = vector.broadcast %573 : f32 to vector<8x8xf32>
    %577 = arith.mulf %576, %575 : vector<8x8xf32>
    %578 = arith.addf %572, %577 : vector<8x8xf32>
    %c3_195 = arith.constant 3 : index
    %c4_196 = arith.constant 4 : index
    %579 = memref.load %arg7[%c3_195, %c4_196] : memref<8x8xf32, #tpu.memory_space<smem>>
    %580 = vector.extract_strided_slice %414 {offsets = [4, 0, 0], sizes = [1, 8, 8], strides = [1, 1, 1]} : vector<8x8x8xf32> to vector<1x8x8xf32>
    %581 = vector.shape_cast %580 : vector<1x8x8xf32> to vector<8x8xf32>
    %582 = vector.broadcast %579 : f32 to vector<8x8xf32>
    %583 = arith.mulf %582, %581 : vector<8x8xf32>
    %584 = arith.addf %578, %583 : vector<8x8xf32>
    %c3_197 = arith.constant 3 : index
    %c5_198 = arith.constant 5 : index
    %585 = memref.load %arg7[%c3_197, %c5_198] : memref<8x8xf32, #tpu.memory_space<smem>>
    %586 = vector.extract_strided_slice %414 {offsets = [5, 0, 0], sizes = [1, 8, 8], strides = [1, 1, 1]} : vector<8x8x8xf32> to vector<1x8x8xf32>
    %587 = vector.shape_cast %586 : vector<1x8x8xf32> to vector<8x8xf32>
    %588 = vector.broadcast %585 : f32 to vector<8x8xf32>
    %589 = arith.mulf %588, %587 : vector<8x8xf32>
    %590 = arith.addf %584, %589 : vector<8x8xf32>
    %c3_199 = arith.constant 3 : index
    %c6_200 = arith.constant 6 : index
    %591 = memref.load %arg7[%c3_199, %c6_200] : memref<8x8xf32, #tpu.memory_space<smem>>
    %592 = vector.extract_strided_slice %414 {offsets = [6, 0, 0], sizes = [1, 8, 8], strides = [1, 1, 1]} : vector<8x8x8xf32> to vector<1x8x8xf32>
    %593 = vector.shape_cast %592 : vector<1x8x8xf32> to vector<8x8xf32>
    %594 = vector.broadcast %591 : f32 to vector<8x8xf32>
    %595 = arith.mulf %594, %593 : vector<8x8xf32>
    %596 = arith.addf %590, %595 : vector<8x8xf32>
    %c3_201 = arith.constant 3 : index
    %c7_202 = arith.constant 7 : index
    %597 = memref.load %arg7[%c3_201, %c7_202] : memref<8x8xf32, #tpu.memory_space<smem>>
    %598 = vector.extract_strided_slice %414 {offsets = [7, 0, 0], sizes = [1, 8, 8], strides = [1, 1, 1]} : vector<8x8x8xf32> to vector<1x8x8xf32>
    %599 = vector.shape_cast %598 : vector<1x8x8xf32> to vector<8x8xf32>
    %600 = vector.broadcast %597 : f32 to vector<8x8xf32>
    %601 = arith.mulf %600, %599 : vector<8x8xf32>
    %602 = arith.addf %596, %601 : vector<8x8xf32>
    %c4_203 = arith.constant 4 : index
    %c0_204 = arith.constant 0 : index
    %603 = memref.load %arg7[%c4_203, %c0_204] : memref<8x8xf32, #tpu.memory_space<smem>>
    %604 = vector.extract_strided_slice %414 {offsets = [0, 0, 0], sizes = [1, 8, 8], strides = [1, 1, 1]} : vector<8x8x8xf32> to vector<1x8x8xf32>
    %605 = vector.shape_cast %604 : vector<1x8x8xf32> to vector<8x8xf32>
    %606 = vector.broadcast %603 : f32 to vector<8x8xf32>
    %607 = arith.mulf %606, %605 : vector<8x8xf32>
    %c4_205 = arith.constant 4 : index
    %c1_206 = arith.constant 1 : index
    %608 = memref.load %arg7[%c4_205, %c1_206] : memref<8x8xf32, #tpu.memory_space<smem>>
    %609 = vector.extract_strided_slice %414 {offsets = [1, 0, 0], sizes = [1, 8, 8], strides = [1, 1, 1]} : vector<8x8x8xf32> to vector<1x8x8xf32>
    %610 = vector.shape_cast %609 : vector<1x8x8xf32> to vector<8x8xf32>
    %611 = vector.broadcast %608 : f32 to vector<8x8xf32>
    %612 = arith.mulf %611, %610 : vector<8x8xf32>
    %613 = arith.addf %607, %612 : vector<8x8xf32>
    %c4_207 = arith.constant 4 : index
    %c2_208 = arith.constant 2 : index
    %614 = memref.load %arg7[%c4_207, %c2_208] : memref<8x8xf32, #tpu.memory_space<smem>>
    %615 = vector.extract_strided_slice %414 {offsets = [2, 0, 0], sizes = [1, 8, 8], strides = [1, 1, 1]} : vector<8x8x8xf32> to vector<1x8x8xf32>
    %616 = vector.shape_cast %615 : vector<1x8x8xf32> to vector<8x8xf32>
    %617 = vector.broadcast %614 : f32 to vector<8x8xf32>
    %618 = arith.mulf %617, %616 : vector<8x8xf32>
    %619 = arith.addf %613, %618 : vector<8x8xf32>
    %c4_209 = arith.constant 4 : index
    %c3_210 = arith.constant 3 : index
    %620 = memref.load %arg7[%c4_209, %c3_210] : memref<8x8xf32, #tpu.memory_space<smem>>
    %621 = vector.extract_strided_slice %414 {offsets = [3, 0, 0], sizes = [1, 8, 8], strides = [1, 1, 1]} : vector<8x8x8xf32> to vector<1x8x8xf32>
    %622 = vector.shape_cast %621 : vector<1x8x8xf32> to vector<8x8xf32>
    %623 = vector.broadcast %620 : f32 to vector<8x8xf32>
    %624 = arith.mulf %623, %622 : vector<8x8xf32>
    %625 = arith.addf %619, %624 : vector<8x8xf32>
    %c4_211 = arith.constant 4 : index
    %c4_212 = arith.constant 4 : index
    %626 = memref.load %arg7[%c4_211, %c4_212] : memref<8x8xf32, #tpu.memory_space<smem>>
    %627 = vector.extract_strided_slice %414 {offsets = [4, 0, 0], sizes = [1, 8, 8], strides = [1, 1, 1]} : vector<8x8x8xf32> to vector<1x8x8xf32>
    %628 = vector.shape_cast %627 : vector<1x8x8xf32> to vector<8x8xf32>
    %629 = vector.broadcast %626 : f32 to vector<8x8xf32>
    %630 = arith.mulf %629, %628 : vector<8x8xf32>
    %631 = arith.addf %625, %630 : vector<8x8xf32>
    %c4_213 = arith.constant 4 : index
    %c5_214 = arith.constant 5 : index
    %632 = memref.load %arg7[%c4_213, %c5_214] : memref<8x8xf32, #tpu.memory_space<smem>>
    %633 = vector.extract_strided_slice %414 {offsets = [5, 0, 0], sizes = [1, 8, 8], strides = [1, 1, 1]} : vector<8x8x8xf32> to vector<1x8x8xf32>
    %634 = vector.shape_cast %633 : vector<1x8x8xf32> to vector<8x8xf32>
    %635 = vector.broadcast %632 : f32 to vector<8x8xf32>
    %636 = arith.mulf %635, %634 : vector<8x8xf32>
    %637 = arith.addf %631, %636 : vector<8x8xf32>
    %c4_215 = arith.constant 4 : index
    %c6_216 = arith.constant 6 : index
    %638 = memref.load %arg7[%c4_215, %c6_216] : memref<8x8xf32, #tpu.memory_space<smem>>
    %639 = vector.extract_strided_slice %414 {offsets = [6, 0, 0], sizes = [1, 8, 8], strides = [1, 1, 1]} : vector<8x8x8xf32> to vector<1x8x8xf32>
    %640 = vector.shape_cast %639 : vector<1x8x8xf32> to vector<8x8xf32>
    %641 = vector.broadcast %638 : f32 to vector<8x8xf32>
    %642 = arith.mulf %641, %640 : vector<8x8xf32>
    %643 = arith.addf %637, %642 : vector<8x8xf32>
    %c4_217 = arith.constant 4 : index
    %c7_218 = arith.constant 7 : index
    %644 = memref.load %arg7[%c4_217, %c7_218] : memref<8x8xf32, #tpu.memory_space<smem>>
    %645 = vector.extract_strided_slice %414 {offsets = [7, 0, 0], sizes = [1, 8, 8], strides = [1, 1, 1]} : vector<8x8x8xf32> to vector<1x8x8xf32>
    %646 = vector.shape_cast %645 : vector<1x8x8xf32> to vector<8x8xf32>
    %647 = vector.broadcast %644 : f32 to vector<8x8xf32>
    %648 = arith.mulf %647, %646 : vector<8x8xf32>
    %649 = arith.addf %643, %648 : vector<8x8xf32>
    %c5_219 = arith.constant 5 : index
    %c0_220 = arith.constant 0 : index
    %650 = memref.load %arg7[%c5_219, %c0_220] : memref<8x8xf32, #tpu.memory_space<smem>>
    %651 = vector.extract_strided_slice %414 {offsets = [0, 0, 0], sizes = [1, 8, 8], strides = [1, 1, 1]} : vector<8x8x8xf32> to vector<1x8x8xf32>
    %652 = vector.shape_cast %651 : vector<1x8x8xf32> to vector<8x8xf32>
    %653 = vector.broadcast %650 : f32 to vector<8x8xf32>
    %654 = arith.mulf %653, %652 : vector<8x8xf32>
    %c5_221 = arith.constant 5 : index
    %c1_222 = arith.constant 1 : index
    %655 = memref.load %arg7[%c5_221, %c1_222] : memref<8x8xf32, #tpu.memory_space<smem>>
    %656 = vector.extract_strided_slice %414 {offsets = [1, 0, 0], sizes = [1, 8, 8], strides = [1, 1, 1]} : vector<8x8x8xf32> to vector<1x8x8xf32>
    %657 = vector.shape_cast %656 : vector<1x8x8xf32> to vector<8x8xf32>
    %658 = vector.broadcast %655 : f32 to vector<8x8xf32>
    %659 = arith.mulf %658, %657 : vector<8x8xf32>
    %660 = arith.addf %654, %659 : vector<8x8xf32>
    %c5_223 = arith.constant 5 : index
    %c2_224 = arith.constant 2 : index
    %661 = memref.load %arg7[%c5_223, %c2_224] : memref<8x8xf32, #tpu.memory_space<smem>>
    %662 = vector.extract_strided_slice %414 {offsets = [2, 0, 0], sizes = [1, 8, 8], strides = [1, 1, 1]} : vector<8x8x8xf32> to vector<1x8x8xf32>
    %663 = vector.shape_cast %662 : vector<1x8x8xf32> to vector<8x8xf32>
    %664 = vector.broadcast %661 : f32 to vector<8x8xf32>
    %665 = arith.mulf %664, %663 : vector<8x8xf32>
    %666 = arith.addf %660, %665 : vector<8x8xf32>
    %c5_225 = arith.constant 5 : index
    %c3_226 = arith.constant 3 : index
    %667 = memref.load %arg7[%c5_225, %c3_226] : memref<8x8xf32, #tpu.memory_space<smem>>
    %668 = vector.extract_strided_slice %414 {offsets = [3, 0, 0], sizes = [1, 8, 8], strides = [1, 1, 1]} : vector<8x8x8xf32> to vector<1x8x8xf32>
    %669 = vector.shape_cast %668 : vector<1x8x8xf32> to vector<8x8xf32>
    %670 = vector.broadcast %667 : f32 to vector<8x8xf32>
    %671 = arith.mulf %670, %669 : vector<8x8xf32>
    %672 = arith.addf %666, %671 : vector<8x8xf32>
    %c5_227 = arith.constant 5 : index
    %c4_228 = arith.constant 4 : index
    %673 = memref.load %arg7[%c5_227, %c4_228] : memref<8x8xf32, #tpu.memory_space<smem>>
    %674 = vector.extract_strided_slice %414 {offsets = [4, 0, 0], sizes = [1, 8, 8], strides = [1, 1, 1]} : vector<8x8x8xf32> to vector<1x8x8xf32>
    %675 = vector.shape_cast %674 : vector<1x8x8xf32> to vector<8x8xf32>
    %676 = vector.broadcast %673 : f32 to vector<8x8xf32>
    %677 = arith.mulf %676, %675 : vector<8x8xf32>
    %678 = arith.addf %672, %677 : vector<8x8xf32>
    %c5_229 = arith.constant 5 : index
    %c5_230 = arith.constant 5 : index
    %679 = memref.load %arg7[%c5_229, %c5_230] : memref<8x8xf32, #tpu.memory_space<smem>>
    %680 = vector.extract_strided_slice %414 {offsets = [5, 0, 0], sizes = [1, 8, 8], strides = [1, 1, 1]} : vector<8x8x8xf32> to vector<1x8x8xf32>
    %681 = vector.shape_cast %680 : vector<1x8x8xf32> to vector<8x8xf32>
    %682 = vector.broadcast %679 : f32 to vector<8x8xf32>
    %683 = arith.mulf %682, %681 : vector<8x8xf32>
    %684 = arith.addf %678, %683 : vector<8x8xf32>
    %c5_231 = arith.constant 5 : index
    %c6_232 = arith.constant 6 : index
    %685 = memref.load %arg7[%c5_231, %c6_232] : memref<8x8xf32, #tpu.memory_space<smem>>
    %686 = vector.extract_strided_slice %414 {offsets = [6, 0, 0], sizes = [1, 8, 8], strides = [1, 1, 1]} : vector<8x8x8xf32> to vector<1x8x8xf32>
    %687 = vector.shape_cast %686 : vector<1x8x8xf32> to vector<8x8xf32>
    %688 = vector.broadcast %685 : f32 to vector<8x8xf32>
    %689 = arith.mulf %688, %687 : vector<8x8xf32>
    %690 = arith.addf %684, %689 : vector<8x8xf32>
    %c5_233 = arith.constant 5 : index
    %c7_234 = arith.constant 7 : index
    %691 = memref.load %arg7[%c5_233, %c7_234] : memref<8x8xf32, #tpu.memory_space<smem>>
    %692 = vector.extract_strided_slice %414 {offsets = [7, 0, 0], sizes = [1, 8, 8], strides = [1, 1, 1]} : vector<8x8x8xf32> to vector<1x8x8xf32>
    %693 = vector.shape_cast %692 : vector<1x8x8xf32> to vector<8x8xf32>
    %694 = vector.broadcast %691 : f32 to vector<8x8xf32>
    %695 = arith.mulf %694, %693 : vector<8x8xf32>
    %696 = arith.addf %690, %695 : vector<8x8xf32>
    %c6_235 = arith.constant 6 : index
    %c0_236 = arith.constant 0 : index
    %697 = memref.load %arg7[%c6_235, %c0_236] : memref<8x8xf32, #tpu.memory_space<smem>>
    %698 = vector.extract_strided_slice %414 {offsets = [0, 0, 0], sizes = [1, 8, 8], strides = [1, 1, 1]} : vector<8x8x8xf32> to vector<1x8x8xf32>
    %699 = vector.shape_cast %698 : vector<1x8x8xf32> to vector<8x8xf32>
    %700 = vector.broadcast %697 : f32 to vector<8x8xf32>
    %701 = arith.mulf %700, %699 : vector<8x8xf32>
    %c6_237 = arith.constant 6 : index
    %c1_238 = arith.constant 1 : index
    %702 = memref.load %arg7[%c6_237, %c1_238] : memref<8x8xf32, #tpu.memory_space<smem>>
    %703 = vector.extract_strided_slice %414 {offsets = [1, 0, 0], sizes = [1, 8, 8], strides = [1, 1, 1]} : vector<8x8x8xf32> to vector<1x8x8xf32>
    %704 = vector.shape_cast %703 : vector<1x8x8xf32> to vector<8x8xf32>
    %705 = vector.broadcast %702 : f32 to vector<8x8xf32>
    %706 = arith.mulf %705, %704 : vector<8x8xf32>
    %707 = arith.addf %701, %706 : vector<8x8xf32>
    %c6_239 = arith.constant 6 : index
    %c2_240 = arith.constant 2 : index
    %708 = memref.load %arg7[%c6_239, %c2_240] : memref<8x8xf32, #tpu.memory_space<smem>>
    %709 = vector.extract_strided_slice %414 {offsets = [2, 0, 0], sizes = [1, 8, 8], strides = [1, 1, 1]} : vector<8x8x8xf32> to vector<1x8x8xf32>
    %710 = vector.shape_cast %709 : vector<1x8x8xf32> to vector<8x8xf32>
    %711 = vector.broadcast %708 : f32 to vector<8x8xf32>
    %712 = arith.mulf %711, %710 : vector<8x8xf32>
    %713 = arith.addf %707, %712 : vector<8x8xf32>
    %c6_241 = arith.constant 6 : index
    %c3_242 = arith.constant 3 : index
    %714 = memref.load %arg7[%c6_241, %c3_242] : memref<8x8xf32, #tpu.memory_space<smem>>
    %715 = vector.extract_strided_slice %414 {offsets = [3, 0, 0], sizes = [1, 8, 8], strides = [1, 1, 1]} : vector<8x8x8xf32> to vector<1x8x8xf32>
    %716 = vector.shape_cast %715 : vector<1x8x8xf32> to vector<8x8xf32>
    %717 = vector.broadcast %714 : f32 to vector<8x8xf32>
    %718 = arith.mulf %717, %716 : vector<8x8xf32>
    %719 = arith.addf %713, %718 : vector<8x8xf32>
    %c6_243 = arith.constant 6 : index
    %c4_244 = arith.constant 4 : index
    %720 = memref.load %arg7[%c6_243, %c4_244] : memref<8x8xf32, #tpu.memory_space<smem>>
    %721 = vector.extract_strided_slice %414 {offsets = [4, 0, 0], sizes = [1, 8, 8], strides = [1, 1, 1]} : vector<8x8x8xf32> to vector<1x8x8xf32>
    %722 = vector.shape_cast %721 : vector<1x8x8xf32> to vector<8x8xf32>
    %723 = vector.broadcast %720 : f32 to vector<8x8xf32>
    %724 = arith.mulf %723, %722 : vector<8x8xf32>
    %725 = arith.addf %719, %724 : vector<8x8xf32>
    %c6_245 = arith.constant 6 : index
    %c5_246 = arith.constant 5 : index
    %726 = memref.load %arg7[%c6_245, %c5_246] : memref<8x8xf32, #tpu.memory_space<smem>>
    %727 = vector.extract_strided_slice %414 {offsets = [5, 0, 0], sizes = [1, 8, 8], strides = [1, 1, 1]} : vector<8x8x8xf32> to vector<1x8x8xf32>
    %728 = vector.shape_cast %727 : vector<1x8x8xf32> to vector<8x8xf32>
    %729 = vector.broadcast %726 : f32 to vector<8x8xf32>
    %730 = arith.mulf %729, %728 : vector<8x8xf32>
    %731 = arith.addf %725, %730 : vector<8x8xf32>
    %c6_247 = arith.constant 6 : index
    %c6_248 = arith.constant 6 : index
    %732 = memref.load %arg7[%c6_247, %c6_248] : memref<8x8xf32, #tpu.memory_space<smem>>
    %733 = vector.extract_strided_slice %414 {offsets = [6, 0, 0], sizes = [1, 8, 8], strides = [1, 1, 1]} : vector<8x8x8xf32> to vector<1x8x8xf32>
    %734 = vector.shape_cast %733 : vector<1x8x8xf32> to vector<8x8xf32>
    %735 = vector.broadcast %732 : f32 to vector<8x8xf32>
    %736 = arith.mulf %735, %734 : vector<8x8xf32>
    %737 = arith.addf %731, %736 : vector<8x8xf32>
    %c6_249 = arith.constant 6 : index
    %c7_250 = arith.constant 7 : index
    %738 = memref.load %arg7[%c6_249, %c7_250] : memref<8x8xf32, #tpu.memory_space<smem>>
    %739 = vector.extract_strided_slice %414 {offsets = [7, 0, 0], sizes = [1, 8, 8], strides = [1, 1, 1]} : vector<8x8x8xf32> to vector<1x8x8xf32>
    %740 = vector.shape_cast %739 : vector<1x8x8xf32> to vector<8x8xf32>
    %741 = vector.broadcast %738 : f32 to vector<8x8xf32>
    %742 = arith.mulf %741, %740 : vector<8x8xf32>
    %743 = arith.addf %737, %742 : vector<8x8xf32>
    %c7_251 = arith.constant 7 : index
    %c0_252 = arith.constant 0 : index
    %744 = memref.load %arg7[%c7_251, %c0_252] : memref<8x8xf32, #tpu.memory_space<smem>>
    %745 = vector.extract_strided_slice %414 {offsets = [0, 0, 0], sizes = [1, 8, 8], strides = [1, 1, 1]} : vector<8x8x8xf32> to vector<1x8x8xf32>
    %746 = vector.shape_cast %745 : vector<1x8x8xf32> to vector<8x8xf32>
    %747 = vector.broadcast %744 : f32 to vector<8x8xf32>
    %748 = arith.mulf %747, %746 : vector<8x8xf32>
    %c7_253 = arith.constant 7 : index
    %c1_254 = arith.constant 1 : index
    %749 = memref.load %arg7[%c7_253, %c1_254] : memref<8x8xf32, #tpu.memory_space<smem>>
    %750 = vector.extract_strided_slice %414 {offsets = [1, 0, 0], sizes = [1, 8, 8], strides = [1, 1, 1]} : vector<8x8x8xf32> to vector<1x8x8xf32>
    %751 = vector.shape_cast %750 : vector<1x8x8xf32> to vector<8x8xf32>
    %752 = vector.broadcast %749 : f32 to vector<8x8xf32>
    %753 = arith.mulf %752, %751 : vector<8x8xf32>
    %754 = arith.addf %748, %753 : vector<8x8xf32>
    %c7_255 = arith.constant 7 : index
    %c2_256 = arith.constant 2 : index
    %755 = memref.load %arg7[%c7_255, %c2_256] : memref<8x8xf32, #tpu.memory_space<smem>>
    %756 = vector.extract_strided_slice %414 {offsets = [2, 0, 0], sizes = [1, 8, 8], strides = [1, 1, 1]} : vector<8x8x8xf32> to vector<1x8x8xf32>
    %757 = vector.shape_cast %756 : vector<1x8x8xf32> to vector<8x8xf32>
    %758 = vector.broadcast %755 : f32 to vector<8x8xf32>
    %759 = arith.mulf %758, %757 : vector<8x8xf32>
    %760 = arith.addf %754, %759 : vector<8x8xf32>
    %c7_257 = arith.constant 7 : index
    %c3_258 = arith.constant 3 : index
    %761 = memref.load %arg7[%c7_257, %c3_258] : memref<8x8xf32, #tpu.memory_space<smem>>
    %762 = vector.extract_strided_slice %414 {offsets = [3, 0, 0], sizes = [1, 8, 8], strides = [1, 1, 1]} : vector<8x8x8xf32> to vector<1x8x8xf32>
    %763 = vector.shape_cast %762 : vector<1x8x8xf32> to vector<8x8xf32>
    %764 = vector.broadcast %761 : f32 to vector<8x8xf32>
    %765 = arith.mulf %764, %763 : vector<8x8xf32>
    %766 = arith.addf %760, %765 : vector<8x8xf32>
    %c7_259 = arith.constant 7 : index
    %c4_260 = arith.constant 4 : index
    %767 = memref.load %arg7[%c7_259, %c4_260] : memref<8x8xf32, #tpu.memory_space<smem>>
    %768 = vector.extract_strided_slice %414 {offsets = [4, 0, 0], sizes = [1, 8, 8], strides = [1, 1, 1]} : vector<8x8x8xf32> to vector<1x8x8xf32>
    %769 = vector.shape_cast %768 : vector<1x8x8xf32> to vector<8x8xf32>
    %770 = vector.broadcast %767 : f32 to vector<8x8xf32>
    %771 = arith.mulf %770, %769 : vector<8x8xf32>
    %772 = arith.addf %766, %771 : vector<8x8xf32>
    %c7_261 = arith.constant 7 : index
    %c5_262 = arith.constant 5 : index
    %773 = memref.load %arg7[%c7_261, %c5_262] : memref<8x8xf32, #tpu.memory_space<smem>>
    %774 = vector.extract_strided_slice %414 {offsets = [5, 0, 0], sizes = [1, 8, 8], strides = [1, 1, 1]} : vector<8x8x8xf32> to vector<1x8x8xf32>
    %775 = vector.shape_cast %774 : vector<1x8x8xf32> to vector<8x8xf32>
    %776 = vector.broadcast %773 : f32 to vector<8x8xf32>
    %777 = arith.mulf %776, %775 : vector<8x8xf32>
    %778 = arith.addf %772, %777 : vector<8x8xf32>
    %c7_263 = arith.constant 7 : index
    %c6_264 = arith.constant 6 : index
    %779 = memref.load %arg7[%c7_263, %c6_264] : memref<8x8xf32, #tpu.memory_space<smem>>
    %780 = vector.extract_strided_slice %414 {offsets = [6, 0, 0], sizes = [1, 8, 8], strides = [1, 1, 1]} : vector<8x8x8xf32> to vector<1x8x8xf32>
    %781 = vector.shape_cast %780 : vector<1x8x8xf32> to vector<8x8xf32>
    %782 = vector.broadcast %779 : f32 to vector<8x8xf32>
    %783 = arith.mulf %782, %781 : vector<8x8xf32>
    %784 = arith.addf %778, %783 : vector<8x8xf32>
    %c7_265 = arith.constant 7 : index
    %c7_266 = arith.constant 7 : index
    %785 = memref.load %arg7[%c7_265, %c7_266] : memref<8x8xf32, #tpu.memory_space<smem>>
    %786 = vector.extract_strided_slice %414 {offsets = [7, 0, 0], sizes = [1, 8, 8], strides = [1, 1, 1]} : vector<8x8x8xf32> to vector<1x8x8xf32>
    %787 = vector.shape_cast %786 : vector<1x8x8xf32> to vector<8x8xf32>
    %788 = vector.broadcast %785 : f32 to vector<8x8xf32>
    %789 = arith.mulf %788, %787 : vector<8x8xf32>
    %790 = arith.addf %784, %789 : vector<8x8xf32>
    %791 = vector.shape_cast %461 : vector<8x8xf32> to vector<1x8x8xf32>
    %792 = vector.shape_cast %508 : vector<8x8xf32> to vector<1x8x8xf32>
    %793 = vector.shape_cast %555 : vector<8x8xf32> to vector<1x8x8xf32>
    %794 = vector.shape_cast %602 : vector<8x8xf32> to vector<1x8x8xf32>
    %795 = vector.shape_cast %649 : vector<8x8xf32> to vector<1x8x8xf32>
    %796 = vector.shape_cast %696 : vector<8x8xf32> to vector<1x8x8xf32>
    %797 = vector.shape_cast %743 : vector<8x8xf32> to vector<1x8x8xf32>
    %798 = vector.shape_cast %790 : vector<8x8xf32> to vector<1x8x8xf32>
    %799 = tpu.concatenate %791, %792, %793, %794, %795, %796, %797, %798 in 0 : vector<1x8x8xf32>, vector<1x8x8xf32>, vector<1x8x8xf32>, vector<1x8x8xf32>, vector<1x8x8xf32>, vector<1x8x8xf32>, vector<1x8x8xf32>, vector<1x8x8xf32> -> vector<8x8x8xf32>
    %800 = arith.truncf %799 : vector<8x8x8xf32> to vector<8x8x8xbf16>
    "tpu.trace_start"() <{level = 10 : i32, message = "hqk,hkn->hqn"}> : () -> ()
    %cst_267 = arith.constant dense<0.000000e+00> : vector<8x8x64xf32>
    %801 = tpu.matmul %800, %5, %cst_267 {dimension_numbers = #tpu.dot_dimension_numbers<[2], [1], [1], [2], [0, 0, 0, 1, 1, 2], [0], [0]>} : vector<8x8x8xbf16>, vector<8x8x64xbf16>, vector<8x8x64xf32> -> vector<8x8x64xf32>
    "tpu.trace_stop"() : () -> ()
    %802 = arith.truncf %801 : vector<8x8x64xf32> to vector<8x8x64xbf16>
    %c0_268 = arith.constant 0 : index
    %c0_269 = arith.constant 0 : index
    %c0_270 = arith.constant 0 : index
    %c0_271 = arith.constant 0 : index
    %803 = vector.load %arg8[%c0_268, %c0_269, %c0_270, %c0_271] : memref<1x8x8x64xbf16, #tpu.memory_space<vmem>>, vector<1x8x8x64xbf16>
    %804 = vector.shape_cast %803 : vector<1x8x8x64xbf16> to vector<8x8x64xbf16>
    %805 = vector.shape_cast %802 : vector<8x8x64xbf16> to vector<1x8x8x64xbf16>
    tpu.vector_store %arg8[%c0_268, %c0_269, %c0_270, %c0_271], %805 {strides = array<i32>} : memref<1x8x8x64xbf16, #tpu.memory_space<vmem>>, vector<1x8x8x64xbf16>,
    return
  }
  func.func @transform_0(%arg0: i32, %arg1: i32) -> (i32, i32, i32, i32) {
    %c0_i32 = arith.constant 0 : i32
    %c0_i32_0 = arith.constant 0 : i32
    %c0_i32_1 = arith.constant 0 : i32
    return %arg0, %c0_i32, %arg1, %c0_i32_0 : i32, i32, i32, i32
  }
  func.func @transform_1(%arg0: i32, %arg1: i32) -> (i32, i32, i32, i32) {
    %c1_i32 = arith.constant 1 : i32
    %c0_i32 = arith.constant 0 : i32
    %c0_i32_0 = arith.constant 0 : i32
    %c0_i32_1 = arith.constant 0 : i32
    return %arg0, %c1_i32, %c0_i32, %c0_i32_0 : i32, i32, i32, i32
  }
  func.func @transform_2(%arg0: i32, %arg1: i32) -> (i32, i32, i32, i32) {
    %c2_i32 = arith.constant 2 : i32
    %c0_i32 = arith.constant 0 : i32
    %c0_i32_0 = arith.constant 0 : i32
    %c0_i32_1 = arith.constant 0 : i32
    return %arg0, %c2_i32, %c0_i32, %c0_i32_0 : i32, i32, i32, i32
  }
  func.func @transform_3(%arg0: i32, %arg1: i32) -> (i32, i32, i32) {
    %c0_i32 = arith.constant 0 : i32
    %c0_i32_0 = arith.constant 0 : i32
    %c0_i32_1 = arith.constant 0 : i32
    return %c0_i32, %arg1, %c0_i32_0 : i32, i32, i32
  }
  func.func @transform_4(%arg0: i32, %arg1: i32) -> (i32, i32) {
    %c0_i32 = arith.constant 0 : i32
    %c0_i32_0 = arith.constant 0 : i32
    %c0_i32_1 = arith.constant 0 : i32
    return %c0_i32, %c0_i32_0 : i32, i32
  }
  func.func @transform_5(%arg0: i32, %arg1: i32) -> (i32, i32) {
    %c0_i32 = arith.constant 0 : i32
    %c0_i32_0 = arith.constant 0 : i32
    %c0_i32_1 = arith.constant 0 : i32
    return %c0_i32, %c0_i32_0 : i32, i32
  }
  func.func @transform_6(%arg0: i32, %arg1: i32) -> (i32, i32, i32, i32) {
    %c0_i32 = arith.constant 0 : i32
    %c0_i32_0 = arith.constant 0 : i32
    %c0_i32_1 = arith.constant 0 : i32
    return %arg0, %c0_i32, %arg1, %c0_i32_0 : i32, i32, i32, i32
  }
}

module attributes {stable_mosaic.version = 11 : i64} {
  func.func @_ln_res_kernel(%arg0: i32, %arg1: memref<16x256xbf16, #tpu.memory_space<vmem>>, %arg2: memref<1x256xf32, #tpu.memory_space<vmem>>, %arg3: memref<1x256xf32, #tpu.memory_space<vmem>>, %arg4: memref<16x256xf32, #tpu.memory_space<vmem>>, %arg5: memref<16x256xf32, #tpu.memory_space<vmem>>) attributes {dimension_semantics = [#tpu.dimension_semantics<parallel>], iteration_bounds = array<i64: 1>, scalar_prefetch = 0 : i64, scratch_operands = 0 : i64, tpu.core_type = #tpu.core_type<tc>, window_params = [{transform_indices = @transform_0, window_bounds = array<i64: 16, 256>}, {pipeline_mode = #tpu.pipeline_mode<synchronous>, transform_indices = @transform_1, window_bounds = array<i64: 1, 256>}, {pipeline_mode = #tpu.pipeline_mode<synchronous>, transform_indices = @transform_2, window_bounds = array<i64: 1, 256>}, {transform_indices = @transform_3, window_bounds = array<i64: 16, 256>}, {transform_indices = @transform_4, window_bounds = array<i64: 16, 256>}]} {
    %c0 = arith.constant 0 : index
    %c0_0 = arith.constant 0 : index
    %0 = vector.load %arg1[%c0, %c0_0] : memref<16x256xbf16, #tpu.memory_space<vmem>>, vector<16x256xbf16>
    %1 = arith.extf %0 : vector<16x256xbf16> to vector<16x256xf32>
    %cst = arith.constant dense<0.000000e+00> : vector<16xf32>
    %2 = vector.multi_reduction <add>, %1, %cst [1] : vector<16x256xf32> to vector<16xf32>
    %3 = vector.shape_cast %2 : vector<16xf32> to vector<16x1xf32>
    %cst_1 = arith.constant 2.560000e+02 : f32
    %4 = vector.broadcast %cst_1 : f32 to vector<16x1xf32>
    %5 = arith.divf %3, %4 : vector<16x1xf32>
    %6 = vector.broadcast %5 : vector<16x1xf32> to vector<16x256xf32>
    %7 = arith.subf %1, %6 : vector<16x256xf32>
    %8 = arith.mulf %7, %7 : vector<16x256xf32>
    %cst_2 = arith.constant dense<0.000000e+00> : vector<16xf32>
    %9 = vector.multi_reduction <add>, %8, %cst_2 [1] : vector<16x256xf32> to vector<16xf32>
    %10 = vector.shape_cast %9 : vector<16xf32> to vector<16x1xf32>
    %cst_3 = arith.constant 2.560000e+02 : f32
    %11 = vector.broadcast %cst_3 : f32 to vector<16x1xf32>
    %12 = arith.divf %10, %11 : vector<16x1xf32>
    %13 = vector.broadcast %5 : vector<16x1xf32> to vector<16x256xf32>
    %14 = arith.subf %1, %13 : vector<16x256xf32>
    %cst_4 = arith.constant 9.99999974E-6 : f32
    %15 = vector.broadcast %cst_4 : f32 to vector<16x1xf32>
    %16 = arith.addf %12, %15 : vector<16x1xf32>
    %17 = math.rsqrt %16 : vector<16x1xf32>
    %18 = vector.broadcast %17 : vector<16x1xf32> to vector<16x256xf32>
    %19 = arith.mulf %14, %18 : vector<16x256xf32>
    %c0_5 = arith.constant 0 : index
    %c0_6 = arith.constant 0 : index
    %20 = vector.load %arg2[%c0_5, %c0_6] : memref<1x256xf32, #tpu.memory_space<vmem>>, vector<1x256xf32>
    %21 = vector.broadcast %20 : vector<1x256xf32> to vector<16x256xf32>
    %22 = arith.mulf %19, %21 : vector<16x256xf32>
    %c0_7 = arith.constant 0 : index
    %c0_8 = arith.constant 0 : index
    %23 = vector.load %arg3[%c0_7, %c0_8] : memref<1x256xf32, #tpu.memory_space<vmem>>, vector<1x256xf32>
    %24 = vector.broadcast %23 : vector<1x256xf32> to vector<16x256xf32>
    %25 = arith.addf %22, %24 : vector<16x256xf32>
    %c0_9 = arith.constant 0 : index
    %c0_10 = arith.constant 0 : index
    %26 = vector.load %arg4[%c0_9, %c0_10] : memref<16x256xf32, #tpu.memory_space<vmem>>, vector<16x256xf32>
    %27 = arith.addf %25, %26 : vector<16x256xf32>
    %c0_11 = arith.constant 0 : index
    %c0_12 = arith.constant 0 : index
    %28 = vector.load %arg5[%c0_11, %c0_12] : memref<16x256xf32, #tpu.memory_space<vmem>>, vector<16x256xf32>
    tpu.vector_store %arg5[%c0_11, %c0_12], %27 {strides = array<i32>} : memref<16x256xf32, #tpu.memory_space<vmem>>, vector<16x256xf32>,
    return
  }
  func.func @transform_0(%arg0: i32) -> (i32, i32) {
    %c0_i32 = arith.constant 0 : i32
    %c0_i32_0 = arith.constant 0 : i32
    return %arg0, %c0_i32 : i32, i32
  }
  func.func @transform_1(%arg0: i32) -> (i32, i32) {
    %c0_i32 = arith.constant 0 : i32
    %c0_i32_0 = arith.constant 0 : i32
    %c0_i32_1 = arith.constant 0 : i32
    return %c0_i32, %c0_i32_0 : i32, i32
  }
  func.func @transform_2(%arg0: i32) -> (i32, i32) {
    %c0_i32 = arith.constant 0 : i32
    %c0_i32_0 = arith.constant 0 : i32
    %c0_i32_1 = arith.constant 0 : i32
    return %c0_i32, %c0_i32_0 : i32, i32
  }
  func.func @transform_3(%arg0: i32) -> (i32, i32) {
    %c0_i32 = arith.constant 0 : i32
    %c0_i32_0 = arith.constant 0 : i32
    return %arg0, %c0_i32 : i32, i32
  }
  func.func @transform_4(%arg0: i32) -> (i32, i32) {
    %c0_i32 = arith.constant 0 : i32
    %c0_i32_0 = arith.constant 0 : i32
    return %arg0, %c0_i32 : i32, i32
  }
}

</mosaic_0001>

<bundles_post_ra>
// kernel: block_forward.11
= control target key start
LH: loop header
LB: loop body
LE: loop exit
PB: predicated region body
PF: predicated region fallthrough
CT: control target
= control target key end

     0   :  { %v53_v22 = vlaneseq  ;;  %s153_s0 = inlined_call_operand.vmem [shape: f32[16,256], index: 0, kind: input, shape index: {}]   ;;  %s154_s1 = inlined_call_operand.vmem [shape: f32[1,256], index: 1, kind: input, shape index: {}]   ;;  %s155_s2 = inlined_call_operand.vmem [shape: f32[1,256], index: 2, kind: input, shape index: {}]   ;;  %s156_s3 = inlined_call_operand.vmem [shape: bf16[16,256], index: 3, kind: output, shape index: {}]  }
   0x1   :  { %v14_v0 = vld [vmem:[%s153_s0] sm:$0xff]  ;;  %v15_v1 = vld [vmem:[%s153_s0 + $0x8] sm:$0xff]  ;;  %v16_v2 = vld [vmem:[%s153_s0 + $0x10] sm:$0xff] }
   0x2   :  { %v18_v3 = vadd.f32 %v15_v1, %v14_v0  ;;  %v17_v4 = vld [vmem:[%s153_s0 + $0x18] sm:$0xff]  ;;  %v54_v26 = vshrl.u32 %v53_v22, 7  ;;  %v51_v30 = vld [vmem:[%s154_s1] sm:$0x3] }
   0x3   :  { %v21_v5 = vadd.f32 %v17_v4, %v16_v2  ;;  %v67_v31 = vld [vmem:[%s155_s2] sm:$0x3] }
   0x4   :  { %19 = vadd.xlane.f32.xlu0 %v18_v3  ;;  %v55_v28 = vsub.s32 0, %v54_v26  ;;  %v59_v29 = vsub.s32 1, %v54_v26 }
   0x6   :  { %v56_v32 = vrot.slane %v51_v30, %v55_v28  ;;  %v60_v33 = vrot.slane %v51_v30, %v59_v29  ;;  %v72_v35 = vrot.slane %v67_v31, %v55_v28  ;;  %v76_v36 = vrot.slane %v67_v31, %v59_v29 }
   0x8   :  { %22 = vadd.xlane.f32.xlu0 %v21_v5 }
  0x91   :  { %v20_v6 = vpop.xlane.xlu0 %19 }
  0x92   :  { %v25_v7 = vmul.f32 0.00390625, %v20_v6 }
  0x94   :  { %v27_v8 = vsub.f32 %v14_v0, %v25_v7  ;;  %v28_v9 = vsub.f32 %v15_v1, %v25_v7 }
  0x95   :  { %v23_v10 = vpop.xlane.xlu0 %22 }
  0x96   :  { %v26_v11 = vmul.f32 0.00390625, %v23_v10  ;;  %v31_v12 = vmul.f32 %v27_v8, %v27_v8  ;;  %v32_v13 = vmul.f32 %v28_v9, %v28_v9 }
  0x98   :  { %v29_v14 = vsub.f32 %v16_v2, %v26_v11  ;;  %v30_v15 = vsub.f32 %v17_v4, %v26_v11  ;;  %v35_v16 = vadd.f32 %v32_v13, %v31_v12 }
  0x9a   :  { %36 = vadd.xlane.f32.xlu1 %v35_v16  ;;  %v33_v17 = vmul.f32 %v29_v14, %v29_v14  ;;  %v34_v18 = vmul.f32 %v30_v15, %v30_v15 }
  0x9c   :  { %v38_v19 = vadd.f32 %v34_v18, %v33_v17 }
  0x9e   :  { %39 = vadd.xlane.f32.xlu1 %v38_v19 }
 0x127   :  { %v37_v20 = vpop.xlane.xlu1 %36 }
 0x128   :  { %v41_v21 = vmul.f32 0.00390625, %v37_v20 }
 0x12a   :  { %v43_v23 = vadd.f32 1e-05, %v41_v21 }
 0x12b   :  { %v40_v24 = vpop.xlane.xlu1 %39 }
 0x12c   :  { %105 = vrsqrt.f32 %v43_v23  ;;  %v42_v25 = vmul.f32 0.00390625, %v40_v24 }
 0x12e   :  { %v44_v27 = vadd.f32 1e-05, %v42_v25 }
 0x130   :  { %107 = vrsqrt.f32 %v44_v27 }
 0x136   :  { %v106_v34 = vpop.eup %105 }
 0x137   :  { %v47_v37 = vmul.f32 %v106_v34, %v27_v8  ;;  %v48_v38 = vmul.f32 %v106_v34, %v28_v9 }
 0x139   :  { %v63_v39 = vmul.f32 %v56_v32, %v47_v37  ;;  %v64_v40 = vmul.f32 %v60_v33, %v48_v38 }
 0x13a   :  { %v108_v41 = vpop.eup %107 }
 0x13b   :  { %v79_v42 = vadd.f32 %v72_v35, %v63_v39  ;;  %v80_v43 = vadd.f32 %v76_v36, %v64_v40  ;;  %v49_v44 = vmul.f32 %v108_v41, %v29_v14  ;;  %v50_v45 = vmul.f32 %v108_v41, %v30_v15 }
 0x13d   :  { %v103_v46 = vpack.c.bf16 %v80_v43, %v79_v42  ;;  %v65_v47 = vmul.f32 %v56_v32, %v49_v44  ;;  %v66_v48 = vmul.f32 %v60_v33, %v50_v45 }
 0x13f   :  { %95 = vst [vmem:[%s156_s3] sm:$0xff] %v103_v46  ;;  %v81_v49 = vadd.f32 %v72_v35, %v65_v47  ;;  %v82_v50 = vadd.f32 %v76_v36, %v66_v48 }
 0x141   :  { %v104_v51 = vpack.c.bf16 %v82_v50, %v81_v49 }
 0x143   :  { %96 = vst [vmem:[%s156_s3 + $0x8] sm:$0xff] %v104_v51 }

// kernel: block_forward.12
= control target key start
LH: loop header
LB: loop body
LE: loop exit
PB: predicated region body
PF: predicated region fallthrough
CT: control target
= control target key end

     0   :  { %s1012_s20 = smov 0   ;;  %s1114_s0 = inlined_call_operand.vmem [shape: bf16[16,4,82], index: 0, kind: input, shape index: {}]   ;;  %s1115_s1 = inlined_call_operand.vmem [shape: bf16[9,8,4], index: 1, kind: input, shape index: {}]   ;;  %s1116_s2 = inlined_call_operand.vmem [shape: f32[8,1], index: 2, kind: input, shape index: {}]   ;;  %s1117_s3 = inlined_call_operand.vmem [shape: f32[3,64], index: 3, kind: input, shape index: {}]   ;;  %s1118_s4 = inlined_call_operand.<no memory space> [shape: f32[1], index: 4, kind: input, shape index: {}]   ;;  %s1119_s5 = inlined_call_operand.vmem [shape: bf16[16,8,64], index: 5, kind: output, shape index: {}]  }
   0x1   :  { %10 = sst [smem:[#allocation2]] %s1118_s4 }
   0x2 LB: > { %s815_s21 = sadd.s32 4294967295, %s965_s20   ;;  %p819_p0 = scmp.ge.s32.totalorder %s965_s20, 1  ;;  %s965_s20 = sphi %s1012_s20, %s16_s20  }
   0x3   : > { %p187_p1 = scmp.lt.s32.totalorder %s965_s20, 17 }
   0x5   : > { %p188_p2 = pnand %p819_p0, %p187_p1 }
   0x6   : > { %p213_p3 = scmp.lt.s32.totalorder (!%p188_p2), %s815_s21, 15  ;;  %v230_v0 = vlaneseq (!%p188_p2)  ;;  %v967_v1 = vmov (!%p188_p2), 1983009808   ;;  %v968_v3 = vmov (!%p188_p2), 0.0   ;;  %vm969_vm0 = vmmov (!%p188_p2), 0   ;;  %s970_s25 = smov (!%p188_p2), 112  }
   0x7   : > { %191 = sbr.rel (%p188_p2) target bundleno = 420 (0x1a4), region = 40  ;;  %v228_v2 = vunpack.c.l.s4 (!%p188_p2), %v967_v1  ;;  %873 = vmatprep.subr.bf16.mxu0 (!%p188_p2), %v968_v3  ;;  %867 = vmatprep.subr.bf16.mxu1 (!%p188_p2), %v968_v3  ;;  %vm240_vm1 = vcmask (!%p188_p2), 1041408   ;;  %s971_s26 = smov (!%p188_p2), 118   ;;  %v223_v11 = vld [vmem:[%s1115_s1] sm:$0xf] (!%p188_p2)  ;;  %vm236_vm2 = vcmask (!%p188_p2), 31744  }
   0x8   : > { %v231_v4 = vshrl.u32 (!%p188_p2), %v230_v0, 7  ;;  %875 = vmatprep.mubr.msk.bf16.mxu0 (!%p188_p2), %vm969_vm0, %v968_v3  ;;  %869 = vmatprep.mubr.msk.bf16.mxu1 (!%p188_p2), %vm969_vm0, %v968_v3  ;;  %s972_s29 = smov (!%p188_p2), 120   ;;  %s973_s30 = smov (!%p188_p2), 119   ;;  %v742_v12 = vld [vmem:[%s1116_s2] sm:$0xff] (!%p188_p2)  ;;  %v978_v13 = vmov (!%p188_p2), 0   ;;  %vm760_vm3 = vcmask (!%p188_p2), 519168  }
   0x9   : > { %v229_v5 = vunpack.c.0.s8 (!%p188_p2), %v228_v2  ;;  %s974_s6 = smov (!%p188_p2), 127   ;;  %s975_s7 = smov (!%p188_p2), 126   ;;  %954 = vset.pattern.permute.xlu0 (!%p188_p2), %v978_v13  ;;  %v825_v17 = vld [vmem:[%s1115_s1 + $0x18] sm:$0xf] (!%p188_p2)  ;;  %v822_v22 = vld [vmem:[%s1115_s1 + $0xc] sm:$0xf] (!%p188_p2) }
   0xa   : > { %s976_s8 = smov (!%p188_p2), 111   ;;  %s977_s9 = smov (!%p188_p2), 110   ;;  %v838_v25 = vld [vmem:[%s1115_s1 + $0x14] sm:$0xf] (!%p188_p2)  ;;  %v830_v28 = vld [vmem:[%s1115_s1 + $0x10] sm:$0xf] (!%p188_p2) }
   0xb   : > { %v232_v6 = vsub.s32 (!%p188_p2), %v229_v5, %v231_v4  ;;  %v829_v32 = vld [vmem:[%s1115_s1 + $0x4] sm:$0xf] (!%p188_p2)  ;;  %v837_v33 = vld [vmem:[%s1115_s1 + $0x8] sm:$0xf] (!%p188_p2)  ;;  %v834_v36 = vld [vmem:[%s1115_s1 + $0x1c] sm:$0xf] (!%p188_p2) }
   0xc   : > { %v842_v37 = vld [vmem:[%s1115_s1 + $0x20] sm:$0xf] (!%p188_p2) }
   0xd   : > { %v828_v56 = vld [vmem:[%s1117_s3] ss:$0 sm:$0xff] (!%p188_p2)  ;;  %v845_v61 = vld [vmem:[%s1117_s3 + $0x2] ss:$0 sm:$0xff] (!%p188_p2) }
   0xe   : > { %s1121_s21 = smov (!%p213_p3, %s815_s21), 15 }
   0xf   : > { %s820_s4 = sshll.u32 %s1121_s21, 1 }
  0x10   : > { %s216_s24 = scalar_lea.vmem %s1114_s0, %s820_s4 }
  0x11   : > { %v826_v7 = vld.sshfl [vmem:[%s216_s24] sm:$0x3 pattern:$0x76325410] }
  0x12   : > { %v222_v8 = vld [vmem:[%s216_s24] sm:$0x3]  ;;  %341 = vrot.lane.b32.xlu0 %v826_v7, %s970_s25  ;;  %579 = vrot.lane.b32.xlu1 %v826_v7, %s971_s26 }
  0x13   : > { %v233_v9 = vrot.slane %v222_v8, %v232_v6  ;;  %v288_v10 = vsel %vm240_vm1, %v222_v8, 0 }
  0x14   : > { %874 = vmatpush3.bf16.msra.mxu0 %v288_v10 }
  0x15   : > { %879 = vmatprep.subr.bf16.mxu0 %v968_v3 }
  0x16   : > { %234 = vrot.lane.b32.xlu0 %v233_v9, %s972_s29  ;;  %409 = vrot.lane.b32.xlu1 %v826_v7, %s973_s30 }
  0x17   : > { %876 = vmatmul.mubr.msk.bf16.vlgmr.msra.gmra.mrb[0].mxu0 %vm236_vm2, %v223_v11 }
  0x18   : > { %881 = vmatprep.mubr.msk.bf16.mxu0 %vm969_vm0, %v968_v3 }
  0x1a   : > { %457 = vrot.lane.b32.xlu1 %v826_v7, %s974_s6  ;;  %627 = vrot.lane.b32.xlu0 %v826_v7, %s975_s7  ;;  %s749_s6 = sld [smem:[#allocation2]] }
  0x1e   : > { %516 = vrot.lane.b32.xlu0 %v826_v7, %s976_s8  ;;  %686 = vrot.lane.b32.xlu1 %v826_v7, %s977_s9  ;;  %s821_s9 = sshll.u32 %s1121_s21, 2 }
  0x1f   : > { %s220_s12 = scalar_lea.vmem %s1119_s5, %s821_s9 }
  0x20   : > { %v750_v8 = vstv %s749_s6 }
  0x22   : > { %745 = vperm.xlu0 %954, %v742_v12  }
  0x84   : > { %v342_v14 = vpop.permute.xlu0 %341  ;;  %v580_v15 = vpop.permute.xlu1 %579 }
  0x85   : > { %v347_v16 = vsel %vm240_vm1, %v342_v14, 0  ;;  %v585_v18 = vsel %vm240_vm1, %v580_v15, 0 }
  0x86   : > { %880 = vmatpush3.bf16.msra.mxu0 %v347_v16 }
  0x87   : > { %903 = vmatprep.subr.bf16.mxu0 %v968_v3 }
  0x88   : > { %v235_v19 = vpop.permute.xlu0 %234  ;;  %v410_v20 = vpop.permute.xlu1 %409 }
  0x89   : > { %882 = vmatmul.mubr.msk.bf16.vlgmr.msra.gmra.mrb[0].mxu0 %vm236_vm2, %v825_v17  ;;  %v242_v21 = vsel %vm240_vm1, %v235_v19, 0  ;;  %v415_v23 = vsel %vm240_vm1, %v410_v20, 0 }
  0x8a   : > { %868 = vmatpush3.bf16.msra.mxu1 %v242_v21  ;;  %904 = vmatpush3.bf16.msra.mxu0 %v585_v18 }
  0x8b   : > { %905 = vmatprep.mubr.msk.bf16.mxu0 %vm969_vm0, %v968_v3  ;;  %885 = vmatprep.subr.bf16.mxu1 %v968_v3 }
  0x8c   : > { %v628_v24 = vpop.permute.xlu0 %627  ;;  %909 = vmatprep.subr.bf16.mxu0 %v968_v3  ;;  %v458_v27 = vpop.permute.xlu1 %457 }
  0x8d   : > { %870 = vmatmul.mubr.msk.bf16.vlgmr.msra.gmra.mrb[0].mxu1 %vm236_vm2, %v822_v22  ;;  %v633_v26 = vsel %vm240_vm1, %v628_v24, 0  ;;  %v463_v29 = vsel %vm240_vm1, %v458_v27, 0 }
  0x8e   : > { %886 = vmatpush3.bf16.msra.mxu1 %v415_v23  ;;  %887 = vmatprep.mubr.msk.bf16.mxu1 %vm969_vm0, %v968_v3 }
  0x8f   : > { %891 = vmatprep.subr.bf16.mxu1 %v968_v3 }
  0x90   : > { %v517_v30 = vpop.permute.xlu0 %516  ;;  %v687_v31 = vpop.permute.xlu1 %686 }
  0x91   : > { %906 = vmatmul.mubr.msk.bf16.vlgmr.msra.gmra.mrb[4].mxu0 %vm236_vm2, %v838_v25  ;;  %v522_v34 = vsel %vm240_vm1, %v517_v30, 0  ;;  %v692_v35 = vsel %vm240_vm1, %v687_v31, 0 }
  0x92   : > { %910 = vmatpush3.bf16.msra.mxu0 %v633_v26  ;;  %911 = vmatprep.mubr.msk.bf16.mxu0 %vm969_vm0, %v968_v3 }
  0x93   : > { %915 = vmatprep.subr.bf16.mxu0 %v968_v3 }
  0x95   : > { %888 = vmatmul.mubr.msk.bf16.vlgmr.msra.gmra.mrb[4].mxu1 %vm236_vm2, %v830_v28 }
  0x96   : > { %892 = vmatpush3.bf16.msra.mxu1 %v463_v29  ;;  %893 = vmatprep.mubr.msk.bf16.mxu1 %vm969_vm0, %v968_v3 }
  0x97   : > { %897 = vmatprep.subr.bf16.mxu1 %v968_v3 }
  0x9d   : > { %894 = vmatmul.mubr.msk.bf16.vlgmr.msra.gmra.mrb[8].mxu1 %vm236_vm2, %v829_v32  ;;  %912 = vmatmul.mubr.msk.bf16.vlgmr.msra.gmra.mrb[4].mxu0 %vm236_vm2, %v837_v33 }
  0x9e   : > { %898 = vmatpush3.bf16.msra.mxu1 %v522_v34  ;;  %899 = vmatprep.mubr.msk.bf16.mxu1 %vm969_vm0, %v968_v3 }
  0x9f   : > { %916 = vmatpush3.bf16.msra.mxu0 %v692_v35  ;;  %917 = vmatprep.mubr.msk.bf16.mxu0 %vm969_vm0, %v968_v3 }
  0xa1   : > { %v746_v5 = vpop.permute.xlu0 %745 }
  0xa5   : > { %900 = vmatmul.mubr.msk.bf16.vlgmr.msra.gmra.mrb[12].mxu1 %vm236_vm2, %v834_v36 }
  0xa9   : > { %918 = vmatmul.mubr.msk.bf16.vlgmr.msra.gmra.mrb[4].mxu0 %vm236_vm2, %v842_v37 }
 0x15c   : > { %v383_v38 = vpop.f32.mrb[0].mxu0 }
 0x15d   : > { %v883_v39 = vpop.f32.mrb[1].mxu0 }
 0x15e   : > { %v386_v40 = vpop.f32.mrb[2].mxu0 }
 0x15f   : > { %v884_v41 = vpop.f32.mrb[3].mxu0 }
 0x160   : > { %v278_v42 = vpop.f32.mrb[0].mxu1 }
 0x161   : > { %v921_v43 = vadd.f32 %v383_v38, %v278_v42  ;;  %v871_v44 = vpop.f32.mrb[1].mxu1 }
 0x162   : > { %v281_v45 = vpop.f32.mrb[2].mxu1 }
 0x163   : > { %v872_v46 = vpop.f32.mrb[3].mxu1  ;;  %v395_v58 = vmul.f32 %v921_v43, %v828_v56 }
 0x168   : > { %v451_v47 = vpop.f32.mrb[4].mxu1 }
 0x169   : > { %v889_v48 = vpop.f32.mrb[5].mxu1 }
 0x16a   : > { %v454_v49 = vpop.f32.mrb[6].mxu1 }
 0x16b   : > { %v890_v50 = vpop.f32.mrb[7].mxu1 }
 0x170   : > { %v499_v51 = vpop.f32.mrb[8].mxu1 }
 0x171   : > { %v500_v52 = vadd.f32 %v499_v51, %v451_v47  ;;  %v895_v53 = vpop.f32.mrb[9].mxu1 }
 0x172   : > { %v502_v54 = vpop.f32.mrb[10].mxu1 }
 0x173   : > { %v896_v55 = vpop.f32.mrb[11].mxu1 }
 0x178   : > { %v558_v57 = vpop.f32.mrb[12].mxu1 }
 0x179   : > { %v564_v59 = vadd.f32 %v558_v57, %v500_v52  ;;  %v901_v60 = vpop.f32.mrb[13].mxu1 }
 0x17a   : > { %v561_v62 = vpop.f32.mrb[14].mxu1 }
 0x17b   : > { %v565_v63 = vadd.f32 %v564_v59, %v395_v58  ;;  %v902_v0 = vpop.f32.mrb[15].mxu1 }
 0x17c   : > { %v728_v1 = vpop.f32.mrb[4].mxu0 }
 0x17d   : > { %v740_v2 = vmul.f32 %v845_v61, %v728_v1  ;;  %v919_v3 = vpop.f32.mrb[5].mxu0 }
 0x17e   : > { %v731_v4 = vpop.f32.mrb[6].mxu0 }
 0x17f   : > { %v920_v6 = vpop.f32.mrb[7].mxu0  ;;  %v741_v7 = vadd.f32 %v740_v2, %v565_v63 }
 0x181   : > { %v748_v9 = vadd.f32 %v746_v5, %v741_v7 }
 0x183   : > { %v751_v10 = vmul.f32 %v750_v8, %v748_v9 }
 0x185   : > { %v846_v11 = vmul.f32 -1.442695, %v751_v10 }
 0x187   : > { %955 = vpow2.f32 %v846_v11 }
 0x191   : > { %v956_v12 = vpop.eup %955 }
 0x192   : > { %v755_v13 = vadd.f32 1.0, %v956_v12 }
 0x194   : > { %957 = vrcp.f32 %v755_v13 }
 0x19e   : > { %v958_v14 = vpop.eup %957 }
 0x19f   : > { %v758_v15 = vmul.f32 %v958_v14, %v748_v9 }
 0x1a1   : > { %v759_v16 = vpack.c.bf16 %v758_v15, %v758_v15 }
 0x1a3   : > { %761 = vst.msk [vmem:[%s220_s12] sm:$0xf] %vm760_vm3, %v759_v16 }
 0x1a4 PF: > { %s16_s20 = sadd.s32 1, %s965_s20  }
 0x1a5   : > { %p13_p4 = scmp.ge.s32.totalorder %s16_s20, 18  }
 0x1a7   :  { %15 = sbr.rel (!%p13_p4) target bundleno = 2 (0x2), region = 78 }

// kernel: block_forward.13
= control target key start
LH: loop header
LB: loop body
LE: loop exit
PB: predicated region body
PF: predicated region fallthrough
CT: control target
= control target key end

     0   :  { %s906_s15 = smov 0   ;;  %s1008_s0 = inlined_call_operand.vmem [shape: bf16[16,8,82], index: 0, kind: input, shape index: {}]   ;;  %s1009_s1 = inlined_call_operand.vmem [shape: bf16[9,4,8], index: 1, kind: input, shape index: {}]   ;;  %s1010_s2 = inlined_call_operand.vmem [shape: f32[4,1], index: 2, kind: input, shape index: {}]   ;;  %s1011_s3 = inlined_call_operand.vmem [shape: f32[3,64], index: 3, kind: input, shape index: {}]   ;;  %s1012_s4 = inlined_call_operand.vmem [shape: bf16[16,4,64], index: 4, kind: output, shape index: {}]  }
   0x1 LB: > { %s727_s16 = sadd.s32 4294967295, %s868_s15   ;;  %p731_p0 = scmp.ge.s32.totalorder %s868_s15, 1  ;;  %s868_s15 = sphi %s906_s15, %s14_s15  }
   0x2   : > { %p161_p1 = scmp.lt.s32.totalorder %s868_s15, 17 }
   0x4   : > { %p162_p2 = pnand %p731_p0, %p161_p1 }
   0x5   : > { %p185_p3 = scmp.lt.s32.totalorder (!%p162_p2), %s727_s16, 15  ;;  %v870_v0 = vmov (!%p162_p2), 0.0   ;;  %vm871_vm0 = vmmov (!%p162_p2), 0   ;;  %vm207_vm1 = vcmask (!%p162_p2), 1043456   ;;  %v195_v4 = vld [vmem:[%s1009_s1] sm:$0x3] (!%p162_p2) }
   0x6   : > { %165 = sbr.rel (%p162_p2) target bundleno = 391 (0x187), region = 36  ;;  %780 = vmatprep.subr.bf16.mxu0 (!%p162_p2), %v870_v0  ;;  %782 = vmatprep.mubr.msk.bf16.mxu0 (!%p162_p2), %vm871_vm0, %v870_v0  ;;  %vm203_vm2 = vcmask (!%p162_p2), 64512   ;;  %s872_s23 = smov (!%p162_p2), 112   ;;  %v664_v5 = vld [vmem:[%s1010_s2] sm:$0xf] (!%p162_p2)  ;;  %v880_v6 = vmov (!%p162_p2), 0  }
   0x7   : > { %774 = vmatprep.subr.bf16.mxu1 (!%p162_p2), %v870_v0  ;;  %776 = vmatprep.mubr.msk.bf16.mxu1 (!%p162_p2), %vm871_vm0, %v870_v0  ;;  %s873_s24 = smov (!%p162_p2), 118   ;;  %s874_s25 = smov (!%p162_p2), 120   ;;  %v738_v10 = vld [vmem:[%s1009_s1 + $0xc] sm:$0x3] (!%p162_p2)  ;;  %v734_v15 = vld [vmem:[%s1009_s1 + $0x6] sm:$0x3] (!%p162_p2) }
   0x8   : > { %s875_s26 = smov (!%p162_p2), 119   ;;  %s876_s27 = smov (!%p162_p2), 127   ;;  %860 = vset.pattern.permute.xlu0 (!%p162_p2), %v880_v6  ;;  %v748_v18 = vld [vmem:[%s1009_s1 + $0xa] sm:$0x3] (!%p162_p2)  ;;  %v742_v21 = vld [vmem:[%s1009_s1 + $0x8] sm:$0x3] (!%p162_p2) }
   0x9   : > { %s877_s28 = smov (!%p162_p2), 126   ;;  %s878_s29 = smov (!%p162_p2), 111   ;;  %v741_v25 = vld [vmem:[%s1009_s1 + $0x2] sm:$0x3] (!%p162_p2)  ;;  %v747_v26 = vld [vmem:[%s1009_s1 + $0x4] sm:$0x3] (!%p162_p2) }
   0xa   : > { %s879_s30 = smov (!%p162_p2), 110   ;;  %v745_v29 = vld [vmem:[%s1009_s1 + $0xe] sm:$0x3] (!%p162_p2)  ;;  %v751_v30 = vld [vmem:[%s1009_s1 + $0x10] sm:$0x3] (!%p162_p2)  ;;  %vm672_vm3 = vcmask (!%p162_p2), 517120  }
   0xb   : > { %v740_v49 = vld [vmem:[%s1011_s3] ss:$0 sm:$0xff] (!%p162_p2)  ;;  %v753_v54 = vld [vmem:[%s1011_s3 + $0x2] ss:$0 sm:$0xff] (!%p162_p2) }
   0xd   : > { %s1014_s16 = smov (!%p185_p3, %s727_s16), 15 }
   0xe   : > { %s732_s17 = sshll.u32 %s1014_s16, 2 }
   0xf   : > { %s188_s20 = scalar_lea.vmem %s1008_s0, %s732_s17 }
  0x10   : > { %v194_v1 = vld [vmem:[%s188_s20] sm:$0xf] }
  0x11   : > { %v735_v2 = vcombine.low %v194_v1, %v194_v1  ;;  %v255_v3 = vsel %vm207_vm1, %v194_v1, 0 }
  0x12   : > { %781 = vmatpush3.bf16.msra.mxu0 %v255_v3 }
  0x13   : > { %299 = vrot.lane.b32.xlu0 %v735_v2, %s872_s23  ;;  %510 = vrot.lane.b32.xlu1 %v735_v2, %s873_s24 }
  0x14   : > { %786 = vmatprep.subr.bf16.mxu0 %v870_v0 }
  0x15   : > { %783 = vmatmul.mubr.msk.bf16.vlgmr.msra.gmra.mrb[0].mxu0 %vm203_vm2, %v195_v4 }
  0x16   : > { %788 = vmatprep.mubr.msk.bf16.mxu0 %vm871_vm0, %v870_v0 }
  0x17   : > { %201 = vrot.lane.b32.xlu0 %v735_v2, %s874_s25  ;;  %358 = vrot.lane.b32.xlu1 %v735_v2, %s875_s26 }
  0x1b   : > { %406 = vrot.lane.b32.xlu1 %v735_v2, %s876_s27  ;;  %558 = vrot.lane.b32.xlu0 %v735_v2, %s877_s28 }
  0x1f   : > { %456 = vrot.lane.b32.xlu0 %v735_v2, %s878_s29  ;;  %608 = vrot.lane.b32.xlu1 %v735_v2, %s879_s30  ;;  %s733_s29 = sshll.u32 %s1014_s16, 1 }
  0x20   : > { %s192_s6 = scalar_lea.vmem %s1012_s4, %s733_s29 }
  0x23   : > { %667 = vperm.xlu0 %860, %v664_v5  }
  0x85   : > { %v300_v7 = vpop.permute.xlu0 %299  ;;  %v511_v8 = vpop.permute.xlu1 %510 }
  0x86   : > { %v305_v9 = vsel %vm207_vm1, %v300_v7, 0  ;;  %v516_v11 = vsel %vm207_vm1, %v511_v8, 0 }
  0x87   : > { %787 = vmatpush3.bf16.msra.mxu0 %v305_v9 }
  0x88   : > { %810 = vmatprep.subr.bf16.mxu0 %v870_v0 }
  0x89   : > { %v202_v12 = vpop.permute.xlu0 %201  ;;  %v359_v13 = vpop.permute.xlu1 %358 }
  0x8a   : > { %789 = vmatmul.mubr.msk.bf16.vlgmr.msra.gmra.mrb[0].mxu0 %vm203_vm2, %v738_v10  ;;  %v209_v14 = vsel %vm207_vm1, %v202_v12, 0  ;;  %v364_v16 = vsel %vm207_vm1, %v359_v13, 0 }
  0x8b   : > { %775 = vmatpush3.bf16.msra.mxu1 %v209_v14  ;;  %811 = vmatpush3.bf16.msra.mxu0 %v516_v11 }
  0x8c   : > { %812 = vmatprep.mubr.msk.bf16.mxu0 %vm871_vm0, %v870_v0  ;;  %792 = vmatprep.subr.bf16.mxu1 %v870_v0 }
  0x8d   : > { %v559_v17 = vpop.permute.xlu0 %558  ;;  %816 = vmatprep.subr.bf16.mxu0 %v870_v0  ;;  %v407_v20 = vpop.permute.xlu1 %406 }
  0x8e   : > { %777 = vmatmul.mubr.msk.bf16.vlgmr.msra.gmra.mrb[0].mxu1 %vm203_vm2, %v734_v15  ;;  %v564_v19 = vsel %vm207_vm1, %v559_v17, 0  ;;  %v412_v22 = vsel %vm207_vm1, %v407_v20, 0 }
  0x8f   : > { %793 = vmatpush3.bf16.msra.mxu1 %v364_v16  ;;  %794 = vmatprep.mubr.msk.bf16.mxu1 %vm871_vm0, %v870_v0 }
  0x90   : > { %798 = vmatprep.subr.bf16.mxu1 %v870_v0 }
  0x91   : > { %v457_v23 = vpop.permute.xlu0 %456  ;;  %v609_v24 = vpop.permute.xlu1 %608 }
  0x92   : > { %813 = vmatmul.mubr.msk.bf16.vlgmr.msra.gmra.mrb[4].mxu0 %vm203_vm2, %v748_v18  ;;  %v462_v27 = vsel %vm207_vm1, %v457_v23, 0  ;;  %v614_v28 = vsel %vm207_vm1, %v609_v24, 0 }
  0x93   : > { %817 = vmatpush3.bf16.msra.mxu0 %v564_v19  ;;  %818 = vmatprep.mubr.msk.bf16.mxu0 %vm871_vm0, %v870_v0 }
  0x94   : > { %822 = vmatprep.subr.bf16.mxu0 %v870_v0 }
  0x96   : > { %795 = vmatmul.mubr.msk.bf16.vlgmr.msra.gmra.mrb[4].mxu1 %vm203_vm2, %v742_v21 }
  0x97   : > { %799 = vmatpush3.bf16.msra.mxu1 %v412_v22  ;;  %800 = vmatprep.mubr.msk.bf16.mxu1 %vm871_vm0, %v870_v0 }
  0x98   : > { %804 = vmatprep.subr.bf16.mxu1 %v870_v0 }
  0x9e   : > { %801 = vmatmul.mubr.msk.bf16.vlgmr.msra.gmra.mrb[8].mxu1 %vm203_vm2, %v741_v25  ;;  %819 = vmatmul.mubr.msk.bf16.vlgmr.msra.gmra.mrb[4].mxu0 %vm203_vm2, %v747_v26 }
  0x9f   : > { %805 = vmatpush3.bf16.msra.mxu1 %v462_v27  ;;  %806 = vmatprep.mubr.msk.bf16.mxu1 %vm871_vm0, %v870_v0 }
  0xa0   : > { %823 = vmatpush3.bf16.msra.mxu0 %v614_v28  ;;  %824 = vmatprep.mubr.msk.bf16.mxu0 %vm871_vm0, %v870_v0 }
  0xa2   : > { %v668_v62 = vpop.permute.xlu0 %667 }
  0xa6   : > { %807 = vmatmul.mubr.msk.bf16.vlgmr.msra.gmra.mrb[12].mxu1 %vm203_vm2, %v745_v29 }
  0xaa   : > { %825 = vmatmul.mubr.msk.bf16.vlgmr.msra.gmra.mrb[4].mxu0 %vm203_vm2, %v751_v30 }
 0x15d   : > { %v341_v31 = vpop.f32.mrb[0].mxu0 }
 0x15e   : > { %v790_v32 = vpop.f32.mrb[1].mxu0 }
 0x15f   : > { %v344_v33 = vpop.f32.mrb[2].mxu0 }
 0x160   : > { %v791_v34 = vpop.f32.mrb[3].mxu0 }
 0x161   : > { %v245_v35 = vpop.f32.mrb[0].mxu1 }
 0x162   : > { %v828_v36 = vadd.f32 %v341_v31, %v245_v35  ;;  %v778_v37 = vpop.f32.mrb[1].mxu1 }
 0x163   : > { %v248_v38 = vpop.f32.mrb[2].mxu1 }
 0x164   : > { %v779_v39 = vpop.f32.mrb[3].mxu1  ;;  %v353_v51 = vmul.f32 %v828_v36, %v740_v49 }
 0x169   : > { %v400_v40 = vpop.f32.mrb[4].mxu1 }
 0x16a   : > { %v796_v41 = vpop.f32.mrb[5].mxu1 }
 0x16b   : > { %v403_v42 = vpop.f32.mrb[6].mxu1 }
 0x16c   : > { %v797_v43 = vpop.f32.mrb[7].mxu1 }
 0x171   : > { %v448_v44 = vpop.f32.mrb[8].mxu1 }
 0x172   : > { %v449_v45 = vadd.f32 %v448_v44, %v400_v40  ;;  %v802_v46 = vpop.f32.mrb[9].mxu1 }
 0x173   : > { %v451_v47 = vpop.f32.mrb[10].mxu1 }
 0x174   : > { %v803_v48 = vpop.f32.mrb[11].mxu1 }
 0x179   : > { %v498_v50 = vpop.f32.mrb[12].mxu1 }
 0x17a   : > { %v504_v52 = vadd.f32 %v498_v50, %v449_v45  ;;  %v808_v53 = vpop.f32.mrb[13].mxu1 }
 0x17b   : > { %v501_v55 = vpop.f32.mrb[14].mxu1 }
 0x17c   : > { %v505_v56 = vadd.f32 %v504_v52, %v353_v51  ;;  %v809_v57 = vpop.f32.mrb[15].mxu1 }
 0x17d   : > { %v650_v58 = vpop.f32.mrb[4].mxu0 }
 0x17e   : > { %v662_v59 = vmul.f32 %v753_v54, %v650_v58  ;;  %v826_v60 = vpop.f32.mrb[5].mxu0 }
 0x17f   : > { %v653_v61 = vpop.f32.mrb[6].mxu0 }
 0x180   : > { %v827_v63 = vpop.f32.mrb[7].mxu0  ;;  %v663_v0 = vadd.f32 %v662_v59, %v505_v56 }
 0x182   : > { %v670_v1 = vadd.f32 %v668_v62, %v663_v0 }
 0x184   : > { %v671_v2 = vpack.c.bf16 %v670_v1, %v670_v1 }
 0x186   : > { %673 = vst.msk [vmem:[%s192_s6] sm:$0x3] %vm672_vm3, %v671_v2 }
 0x187 PF: > { %s14_s15 = sadd.s32 1, %s868_s15  }
 0x188   : > { %p11_p4 = scmp.ge.s32.totalorder %s14_s15, 18  }
 0x18a   :  { %13 = sbr.rel (!%p11_p4) target bundleno = 1 (0x1), region = 74 }

// kernel: block_forward.14
= control target key start
LH: loop header
LB: loop body
LE: loop exit
PB: predicated region body
PF: predicated region fallthrough
CT: control target
= control target key end

     0   :  { %v66_v24 = vlaneseq  ;;  %s306_s0 = inlined_call_operand.vmem [shape: bf16[16,256], index: 0, kind: input, shape index: {}]   ;;  %s307_s1 = inlined_call_operand.vmem [shape: f32[1,256], index: 1, kind: input, shape index: {}, may-alias: {1,4}]   ;;  %s308_s2 = inlined_call_operand.vmem [shape: f32[1,256], index: 2, kind: input, shape index: {}, may-alias: {2,5}]   ;;  %s309_s3 = inlined_call_operand.vmem [shape: f32[16,256], index: 3, kind: input, shape index: {}]   ;;  %s310_s6 = inlined_call_operand.vmem [shape: f32[16,256], index: 6, kind: output, shape index: {0}]   ;;  %s311_s4 = inlined_call_operand.vmem [shape: f32[1,256], index: 4, kind: input, shape index: {}, may-alias: {1,4}]   ;;  %s312_s5 = inlined_call_operand.vmem [shape: f32[1,256], index: 5, kind: input, shape index: {}, may-alias: {2,5}]   ;;  %s313_s7 = inlined_call_operand.vmem [shape: bf16[16,256], index: 7, kind: output, shape index: {1}]  }
   0x1   :  { %v25_v0 = vld [vmem:[%s306_s0] sm:$0xff]  ;;  %v26_v1 = vld [vmem:[%s306_s0 + $0x8] sm:$0xff]  ;;  %v98_v54 = vld [vmem:[%s309_s3 + $0x10] sm:$0xff] }
   0x2   :  { %v27_v2 = vunpack.c.l.bf16 %v25_v0  ;;  %v28_v3 = vunpack.c.h.bf16 %v25_v0  ;;  %v29_v4 = vunpack.c.l.bf16 %v26_v1  ;;  %v30_v5 = vunpack.c.h.bf16 %v26_v1  ;;  %v64_v32 = vld [vmem:[%s307_s1] sm:$0x3]  ;;  %v97_v45 = vld [vmem:[%s309_s3 + $0x8] sm:$0xff]  ;;  %v99_v55 = vld [vmem:[%s309_s3 + $0x18] sm:$0xff] }
   0x3   :  { %v67_v28 = vshrl.u32 %v66_v24, 7  ;;  %v80_v33 = vld [vmem:[%s308_s2] sm:$0x3] }
   0x4   :  { %v31_v6 = vadd.f32 %v28_v3, %v27_v2  ;;  %v34_v7 = vadd.f32 %v30_v5, %v29_v4  ;;  %v96_v44 = vld [vmem:[%s309_s3] sm:$0xff] }
   0x5   :  { %v252_v30 = vsub.s32 0, %v67_v28  ;;  %v254_v31 = vsub.s32 1, %v67_v28 }
   0x6   :  { %32 = vadd.xlane.f32.xlu0 %v31_v6 }
   0x7   :  { %v69_v34 = vrot.slane %v64_v32, %v252_v30  ;;  %v73_v35 = vrot.slane %v64_v32, %v254_v31  ;;  %v85_v39 = vrot.slane %v80_v33, %v252_v30  ;;  %v89_v40 = vrot.slane %v80_v33, %v254_v31 }
   0xa   :  { %35 = vadd.xlane.f32.xlu0 %v34_v7 }
  0x93   :  { %v33_v8 = vpop.xlane.xlu0 %32 }
  0x94   :  { %v38_v9 = vmul.f32 0.00390625, %v33_v8 }
  0x96   :  { %v40_v10 = vsub.f32 %v27_v2, %v38_v9  ;;  %v41_v11 = vsub.f32 %v28_v3, %v38_v9 }
  0x97   :  { %v36_v12 = vpop.xlane.xlu0 %35 }
  0x98   :  { %v39_v13 = vmul.f32 0.00390625, %v36_v12  ;;  %v44_v14 = vmul.f32 %v40_v10, %v40_v10  ;;  %v45_v15 = vmul.f32 %v41_v11, %v41_v11 }
  0x9a   :  { %v42_v16 = vsub.f32 %v29_v4, %v39_v13  ;;  %v43_v17 = vsub.f32 %v30_v5, %v39_v13  ;;  %v48_v18 = vadd.f32 %v45_v15, %v44_v14 }
  0x9c   :  { %49 = vadd.xlane.f32.xlu1 %v48_v18  ;;  %v46_v19 = vmul.f32 %v42_v16, %v42_v16  ;;  %v47_v20 = vmul.f32 %v43_v17, %v43_v17  ;;  %v140_v18 = vld [vmem:[%s311_s4] sm:$0x3] }
  0x9e   :  { %v51_v21 = vadd.f32 %v47_v20, %v46_v19  ;;  %v156_v19 = vld [vmem:[%s312_s5] sm:$0x3]  ;;  %v145_v20 = vrot.slane %v140_v18, %v252_v30 }
  0x9f   :  { %v165_v24 = vrot.slane %v156_v19, %v254_v31 }
  0xa0   :  { %52 = vadd.xlane.f32.xlu1 %v51_v21  ;;  %v149_v21 = vrot.slane %v140_v18, %v254_v31 }
 0x129   :  { %v50_v22 = vpop.xlane.xlu1 %49 }
 0x12a   :  { %v54_v23 = vmul.f32 0.00390625, %v50_v22 }
 0x12c   :  { %v56_v25 = vadd.f32 1e-05, %v54_v23  ;;  %v161_v23 = vrot.slane %v156_v19, %v252_v30 }
 0x12d   :  { %v53_v26 = vpop.xlane.xlu1 %52 }
 0x12e   :  { %198 = vrsqrt.f32 %v56_v25  ;;  %v55_v27 = vmul.f32 0.00390625, %v53_v26 }
 0x130   :  { %v57_v29 = vadd.f32 1e-05, %v55_v27 }
 0x132   :  { %200 = vrsqrt.f32 %v57_v29 }
 0x138   :  { %v199_v36 = vpop.eup %198 }
 0x139   :  { %v60_v37 = vmul.f32 %v199_v36, %v40_v10  ;;  %v61_v38 = vmul.f32 %v199_v36, %v41_v11 }
 0x13b   :  { %v76_v41 = vmul.f32 %v69_v34, %v60_v37  ;;  %v77_v42 = vmul.f32 %v73_v35, %v61_v38 }
 0x13c   :  { %v201_v43 = vpop.eup %200 }
 0x13d   :  { %v92_v46 = vadd.f32 %v85_v39, %v76_v41  ;;  %v93_v47 = vadd.f32 %v89_v40, %v77_v42  ;;  %v62_v48 = vmul.f32 %v201_v43, %v42_v16  ;;  %v63_v49 = vmul.f32 %v201_v43, %v43_v17 }
 0x13f   :  { %v100_v50 = vadd.f32 %v96_v44, %v92_v46  ;;  %v101_v51 = vadd.f32 %v97_v45, %v93_v47  ;;  %v78_v52 = vmul.f32 %v69_v34, %v62_v48  ;;  %v79_v53 = vmul.f32 %v73_v35, %v63_v49 }
 0x141   :  { %105 = vst [vmem:[%s310_s6 + $0x8] sm:$0xff] %v101_v51  ;;  %v108_v56 = vadd.f32 %v101_v51, %v100_v50  ;;  %104 = vst [vmem:[%s310_s6] sm:$0xff] %v100_v50  ;;  %v94_v57 = vadd.f32 %v85_v39, %v78_v52  ;;  %v95_v58 = vadd.f32 %v89_v40, %v79_v53 }
 0x143   :  { %109 = vadd.xlane.f32.xlu0 %v108_v56  ;;  %v102_v59 = vadd.f32 %v98_v54, %v94_v57  ;;  %v103_v60 = vadd.f32 %v99_v55, %v95_v58 }
 0x145   :  { %107 = vst [vmem:[%s310_s6 + $0x18] sm:$0xff] %v103_v60  ;;  %v111_v61 = vadd.f32 %v103_v60, %v102_v59  ;;  %106 = vst [vmem:[%s310_s6 + $0x10] sm:$0xff] %v102_v59 }
 0x147   :  { %112 = vadd.xlane.f32.xlu1 %v111_v61 }
 0x1d0   :  { %v110_v62 = vpop.xlane.xlu0 %109 }
 0x1d1   :  { %v114_v63 = vmul.f32 0.00390625, %v110_v62 }
 0x1d3   :  { %v116_v0 = vsub.f32 %v100_v50, %v114_v63  ;;  %v117_v1 = vsub.f32 %v101_v51, %v114_v63 }
 0x1d4   :  { %v113_v2 = vpop.xlane.xlu1 %112 }
 0x1d5   :  { %v115_v3 = vmul.f32 0.00390625, %v113_v2  ;;  %v120_v4 = vmul.f32 %v116_v0, %v116_v0  ;;  %v121_v5 = vmul.f32 %v117_v1, %v117_v1 }
 0x1d7   :  { %v118_v6 = vsub.f32 %v102_v59, %v115_v3  ;;  %v119_v7 = vsub.f32 %v103_v60, %v115_v3  ;;  %v124_v8 = vadd.f32 %v121_v5, %v120_v4 }
 0x1d9   :  { %125 = vadd.xlane.f32.xlu0 %v124_v8  ;;  %v122_v9 = vmul.f32 %v118_v6, %v118_v6  ;;  %v123_v10 = vmul.f32 %v119_v7, %v119_v7 }
 0x1db   :  { %v127_v11 = vadd.f32 %v123_v10, %v122_v9 }
 0x1dd   :  { %128 = vadd.xlane.f32.xlu1 %v127_v11 }
 0x266   :  { %v126_v12 = vpop.xlane.xlu0 %125 }
 0x267   :  { %v130_v13 = vmul.f32 0.00390625, %v126_v12 }
 0x269   :  { %v132_v14 = vadd.f32 1e-05, %v130_v13 }
 0x26a   :  { %v129_v15 = vpop.xlane.xlu1 %128 }
 0x26b   :  { %202 = vrsqrt.f32 %v132_v14  ;;  %v131_v16 = vmul.f32 0.00390625, %v129_v15 }
 0x26d   :  { %v133_v17 = vadd.f32 1e-05, %v131_v16 }
 0x26f   :  { %204 = vrsqrt.f32 %v133_v17 }
 0x275   :  { %v203_v22 = vpop.eup %202 }
 0x276   :  { %v136_v25 = vmul.f32 %v203_v22, %v116_v0  ;;  %v137_v26 = vmul.f32 %v203_v22, %v117_v1 }
 0x278   :  { %v152_v27 = vmul.f32 %v145_v20, %v136_v25  ;;  %v153_v28 = vmul.f32 %v149_v21, %v137_v26 }
 0x279   :  { %v205_v29 = vpop.eup %204 }
 0x27a   :  { %v168_v32 = vadd.f32 %v161_v23, %v152_v27  ;;  %v169_v33 = vadd.f32 %v165_v24, %v153_v28  ;;  %v138_v34 = vmul.f32 %v205_v29, %v118_v6  ;;  %v139_v35 = vmul.f32 %v205_v29, %v119_v7 }
 0x27c   :  { %v196_v36 = vpack.c.bf16 %v169_v33, %v168_v32  ;;  %v154_v37 = vmul.f32 %v145_v20, %v138_v34  ;;  %v155_v38 = vmul.f32 %v149_v21, %v139_v35 }
 0x27e   :  { %184 = vst [vmem:[%s313_s7] sm:$0xff] %v196_v36  ;;  %v170_v39 = vadd.f32 %v161_v23, %v154_v37  ;;  %v171_v30 = vadd.f32 %v165_v24, %v155_v38 }
 0x280   :  { %v197_v40 = vpack.c.bf16 %v171_v30, %v170_v39 }
 0x282   :  { %185 = vst [vmem:[%s313_s7 + $0x8] sm:$0xff] %v197_v40 }

// kernel: block_forward.15
= control target key start
LH: loop header
LB: loop body
LE: loop exit
PB: predicated region body
PF: predicated region fallthrough
CT: control target
= control target key end

     0   :  { %s1281_s15 = smov 0   ;;  %s1407_s0 = inlined_call_operand.vmem [shape: bf16[16,4,82], index: 0, kind: input, shape index: {}]   ;;  %s1408_s1 = inlined_call_operand.vmem [shape: bf16[9,24,4], index: 1, kind: input, shape index: {}]   ;;  %s1409_s2 = inlined_call_operand.vmem [shape: f32[24,1], index: 2, kind: input, shape index: {}]   ;;  %s1410_s3 = inlined_call_operand.vmem [shape: f32[3,64], index: 3, kind: input, shape index: {}]   ;;  %s1411_s4 = inlined_call_operand.vmem [shape: bf16[16,24,64], index: 4, kind: output, shape index: {}]  }
   0x1 LB: > { %s1012_s16 = sadd.s32 4294967295, %s1244_s15   ;;  %p1016_p0 = scmp.ge.s32.totalorder %s1244_s15, 1  ;;  %s1244_s15 = sphi %s1281_s15, %s14_s15  }
   0x2   : > { %p161_p1 = scmp.lt.s32.totalorder %s1244_s15, 17 }
   0x4   : > { %p162_p2 = pnand %p1016_p0, %p161_p1 }
   0x5   : > { %p186_p3 = scmp.lt.s32.totalorder (!%p162_p2), %s1012_s16, 15  ;;  %v216_v0 = vlaneseq (!%p162_p2)  ;;  %v1246_v1 = vmov (!%p162_p2), 1983009808   ;;  %vm222_vm0 = vcmask (!%p162_p2), 31744   ;;  %v1220_v4 = vld [vmem:[%s1408_s1] sm:$0xff] (!%p162_p2)   ;;  %vm229_vm1 = vcmask (!%p162_p2), 1041408  }
   0x6   : > { %165 = sbr.rel (%p162_p2) target bundleno = 392 (0x188), region = 36  ;;  %v214_v2 = vunpack.c.l.s4 (!%p162_p2), %v1246_v1  ;;  %1129 = vmatprep.mubr.msk.bf16.mxu0 (!%p162_p2), %vm222_vm0, %v1220_v4  ;;  %v1224_v7 = vld [vmem:[%s1408_s1 + $0x24] sm:$0xff] (!%p162_p2)   ;;  %s1247_s25 = smov (!%p162_p2), 112   ;;  %v1255_v16 = vmov (!%p162_p2), 0   ;;  %v921_v17 = vld [vmem:[%s1409_s2 + $0x10] sm:$0xff] (!%p162_p2)  ;;  %v1226_v23 = vld [vmem:[%s1408_s1 + $0x3c] sm:$0xff] (!%p162_p2)  }
   0x7   : > { %v217_v3 = vshrl.u32 (!%p162_p2), %v216_v0, 7  ;;  %s1248_s26 = smov (!%p162_p2), 118   ;;  %v1221_v12 = vld [vmem:[%s1408_s1 + $0x8] ss:$0 sps:$4 sm:$0xff] (!%p162_p2)   ;;  %1123 = vmatprep.mubr.msk.bf16.mxu1 (!%p162_p2), %vm222_vm0, %v1224_v7  ;;  %s1249_s5 = smov (!%p162_p2), 120   ;;  %v919_v15 = vld [vmem:[%s1409_s2] sm:$0xff] (!%p162_p2)  ;;  %1219 = vset.pattern.permute.xlu1 (!%p162_p2), %v1255_v16 }
   0x8   : > { %v215_v5 = vunpack.c.0.s8 (!%p162_p2), %v214_v2  ;;  %v1222_v13 = vld [vmem:[%s1408_s1 + $0x48] sm:$0xff] (!%p162_p2)   ;;  %s1250_s6 = smov (!%p162_p2), 119   ;;  %s1251_s7 = smov (!%p162_p2), 127   ;;  %1218 = vset.pattern.permute.xlu0 (!%p162_p2), %v1255_v16  ;;  %v1223_v21 = vld [vmem:[%s1408_s1 + $0x50] ss:$0 sps:$4 sm:$0xff] (!%p162_p2)   ;;  %v1231_v33 = vld [vmem:[%s1408_s1 + $0x18] sm:$0xff] (!%p162_p2)  }
   0x9   : > { %s1252_s8 = smov (!%p162_p2), 126   ;;  %s1253_s9 = smov (!%p162_p2), 111   ;;  %v920_v14 = vld [vmem:[%s1409_s2 + $0x8] sm:$0xff] (!%p162_p2)  ;;  %v1228_v28 = vld [vmem:[%s1408_s1 + $0x30] sm:$0xff] (!%p162_p2)   ;;  %v1227_v32 = vld [vmem:[%s1408_s1 + $0x44] ss:$0 sps:$4 sm:$0xff] (!%p162_p2)  }
   0xa   : > { %v218_v6 = vsub.s32 (!%p162_p2), %v215_v5, %v217_v3  ;;  %s1254_s10 = smov (!%p162_p2), 110   ;;  %v1225_v27 = vld [vmem:[%s1408_s1 + $0x2c] ss:$0 sps:$4 sm:$0xff] (!%p162_p2)   ;;  %v1229_v36 = vld [vmem:[%s1408_s1 + $0x38] ss:$0 sps:$4 sm:$0xff] (!%p162_p2)   ;;  %v1236_v44 = vld [vmem:[%s1408_s1 + $0x60] sm:$0xff] (!%p162_p2)  }
   0xb   : > { %v1230_v37 = vld [vmem:[%s1408_s1 + $0xc] sm:$0xff] (!%p162_p2)   ;;  %v1232_v40 = vld [vmem:[%s1408_s1 + $0x14] ss:$0 sps:$4 sm:$0xff] (!%p162_p2)   ;;  %v1233_v41 = vld [vmem:[%s1408_s1 + $0x20] ss:$0 sps:$4 sm:$0xff] (!%p162_p2)   ;;  %vm953_vm2 = vcmask (!%p162_p2), 519168  }
   0xc   : > { %v1234_v42 = vld [vmem:[%s1408_s1 + $0x54] sm:$0xff] (!%p162_p2)   ;;  %v1235_v46 = vld [vmem:[%s1408_s1 + $0x5c] ss:$0 sps:$4 sm:$0xff] (!%p162_p2)   ;;  %v1237_v47 = vld [vmem:[%s1408_s1 + $0x68] ss:$0 sps:$4 sm:$0xff] (!%p162_p2)  }
   0xd   : > { %s1413_s16 = smov (!%p186_p3, %s1012_s16), 15 }
   0xe   : > { %s1017_s19 = sshll.u32 %s1413_s16, 1  ;;  %s1199_s27 = smul.u32 12, %s1413_s16 }
   0xf   : > { %s189_s22 = scalar_lea.vmem %s1407_s0, %s1017_s19 }
  0x10   : > { %v1035_v8 = vld.sshfl [vmem:[%s189_s22] sm:$0x3 pattern:$0x76325410]  ;;  %s194_s30 = scalar_lea.vmem %s1411_s4, %s1199_s27 }
  0x11   : > { %v196_v9 = vld [vmem:[%s189_s22] sm:$0x3]  ;;  %367 = vrot.lane.b32.xlu0 %v1035_v8, %s1247_s25  ;;  %699 = vrot.lane.b32.xlu1 %v1035_v8, %s1248_s26 }
  0x12   : > { %v219_v10 = vrot.slane %v196_v9, %v218_v6  ;;  %v296_v11 = vsel %vm229_vm1, %v196_v9, 0  ;;  %1191 = vmatprep.subr.msk.bf16.mxu0 %vm229_vm1, %v196_v9  ;;  %v1038_v6 = vld [vmem:[%s1410_s3] ss:$0 sm:$0xff] }
  0x13   : > { %1128 = vmatpush3.bf16.msra.mxu0 %v296_v11 }
  0x15   : > { %220 = vrot.lane.b32.xlu0 %v219_v10, %s1249_s5  ;;  %462 = vrot.lane.b32.xlu1 %v1035_v8, %s1250_s6 }
  0x16   : > { %1130 = vmatmul.mubr.msk.bf16.vlgmr.msra.gmra.mrb[0].mxu0 %vm222_vm0, %v1221_v12 }
  0x17   : > { %1135 = vmatprep.mubr.msk.bf16.mxu0 %vm222_vm0, %v1222_v13 }
  0x19   : > { %529 = vrot.lane.b32.xlu1 %v1035_v8, %s1251_s7  ;;  %766 = vrot.lane.b32.xlu0 %v1035_v8, %s1252_s8 }
  0x1d   : > { %609 = vrot.lane.b32.xlu0 %v1035_v8, %s1253_s9  ;;  %846 = vrot.lane.b32.xlu1 %v1035_v8, %s1254_s10 }
  0x21   : > { %929 = vperm.xlu1 %1219, %v920_v14   ;;  %924 = vperm.xlu0 %1218, %v919_v15   ;;  %v1085_v15 = vld [vmem:[%s1410_s3 + $0x2] ss:$0 sm:$0xff] }
  0x25   : > { %934 = vperm.xlu1 %1219, %v921_v17  }
  0x83   : > { %v368_v18 = vpop.permute.xlu0 %367  ;;  %v700_v19 = vpop.permute.xlu1 %699 }
  0x84   : > { %v376_v20 = vsel %vm229_vm1, %v368_v18, 0  ;;  %1192 = vmatprep.subr.msk.bf16.mxu0 %vm229_vm1, %v368_v18  ;;  %v708_v22 = vsel %vm229_vm1, %v700_v19, 0 }
  0x85   : > { %1134 = vmatpush3.bf16.msra.mxu0 %v376_v20 }
  0x86   : > { %1196 = vmatprep.subr.msk.bf16.mxu0 %vm229_vm1, %v700_v19 }
  0x87   : > { %v221_v24 = vpop.permute.xlu0 %220  ;;  %v463_v25 = vpop.permute.xlu1 %462 }
  0x88   : > { %1190 = vmatprep.subr.msk.bf16.mxu1 %vm229_vm1, %v221_v24  ;;  %1136 = vmatmul.mubr.msk.bf16.vlgmr.msra.gmra.mrb[0].mxu0 %vm222_vm0, %v1223_v21  ;;  %v231_v26 = vsel %vm229_vm1, %v221_v24, 0  ;;  %v471_v29 = vsel %vm229_vm1, %v463_v25, 0 }
  0x89   : > { %1122 = vmatpush3.bf16.msra.mxu1 %v231_v26  ;;  %1158 = vmatpush3.bf16.msra.mxu0 %v708_v22 }
  0x8a   : > { %1159 = vmatprep.mubr.msk.bf16.mxu0 %vm222_vm0, %v1226_v23  ;;  %1193 = vmatprep.subr.msk.bf16.mxu1 %vm229_vm1, %v463_v25 }
  0x8b   : > { %v530_v30 = vpop.permute.xlu1 %529  ;;  %v767_v31 = vpop.permute.xlu0 %766 }
  0x8c   : > { %1124 = vmatmul.mubr.msk.bf16.vlgmr.msra.gmra.mrb[0].mxu1 %vm222_vm0, %v1225_v27  ;;  %1197 = vmatprep.subr.msk.bf16.mxu0 %vm229_vm1, %v767_v31  ;;  %v775_v34 = vsel %vm229_vm1, %v767_v31, 0  ;;  %v538_v38 = vsel %vm229_vm1, %v530_v30, 0 }
  0x8d   : > { %1140 = vmatpush3.bf16.msra.mxu1 %v471_v29  ;;  %1141 = vmatprep.mubr.msk.bf16.mxu1 %vm222_vm0, %v1228_v28 }
  0x8e   : > { %1194 = vmatprep.subr.msk.bf16.mxu1 %vm229_vm1, %v530_v30 }
  0x8f   : > { %v847_v35 = vpop.permute.xlu1 %846  ;;  %v610_v39 = vpop.permute.xlu0 %609 }
  0x90   : > { %1160 = vmatmul.mubr.msk.bf16.vlgmr.msra.gmra.mrb[4].mxu0 %vm222_vm0, %v1227_v32  ;;  %v618_v43 = vsel %vm229_vm1, %v610_v39, 0  ;;  %v855_v45 = vsel %vm229_vm1, %v847_v35, 0 }
  0x91   : > { %1164 = vmatpush3.bf16.msra.mxu0 %v775_v34  ;;  %1165 = vmatprep.mubr.msk.bf16.mxu0 %vm222_vm0, %v1231_v33 }
  0x92   : > { %1198 = vmatprep.subr.msk.bf16.mxu0 %vm229_vm1, %v847_v35 }
  0x94   : > { %1142 = vmatmul.mubr.msk.bf16.vlgmr.msra.gmra.mrb[4].mxu1 %vm222_vm0, %v1229_v36 }
  0x95   : > { %1146 = vmatpush3.bf16.msra.mxu1 %v538_v38  ;;  %1147 = vmatprep.mubr.msk.bf16.mxu1 %vm222_vm0, %v1230_v37 }
  0x96   : > { %1195 = vmatprep.subr.msk.bf16.mxu1 %vm229_vm1, %v610_v39 }
  0x9c   : > { %1148 = vmatmul.mubr.msk.bf16.vlgmr.msra.gmra.mrb[8].mxu1 %vm222_vm0, %v1232_v40  ;;  %1166 = vmatmul.mubr.msk.bf16.vlgmr.msra.gmra.mrb[4].mxu0 %vm222_vm0, %v1233_v41 }
  0x9d   : > { %1152 = vmatpush3.bf16.msra.mxu1 %v618_v43  ;;  %1153 = vmatprep.mubr.msk.bf16.mxu1 %vm222_vm0, %v1234_v42 }
  0x9e   : > { %1170 = vmatpush3.bf16.msra.mxu0 %v855_v45  ;;  %1171 = vmatprep.mubr.msk.bf16.mxu0 %vm222_vm0, %v1236_v44 }
  0xa0   : > { %v930_v8 = vpop.permute.xlu1 %929  ;;  %v925_v30 = vpop.permute.xlu0 %924 }
  0xa4   : > { %1154 = vmatmul.mubr.msk.bf16.vlgmr.msra.gmra.mrb[12].mxu1 %vm222_vm0, %v1235_v46  ;;  %v935_v27 = vpop.permute.xlu1 %934 }
  0xa8   : > { %1172 = vmatmul.mubr.msk.bf16.vlgmr.msra.gmra.mrb[4].mxu0 %vm222_vm0, %v1237_v47 }
 0x15b   : > { %v1137_v48 = vpop.f32.mrb[0].mxu0 }
 0x15c   : > { %v412_v49 = vpop.f32.mrb[1].mxu0 }
 0x15d   : > { %v1138_v50 = vpop.f32.mrb[2].mxu0 }
 0x15e   : > { %v415_v51 = vpop.f32.mrb[3].mxu0 }
 0x15f   : > { %v1125_v52 = vpop.f32.mrb[0].mxu1 }
 0x160   : > { %v1175_v53 = vadd.f32 %v1137_v48, %v1125_v52  ;;  %v267_v54 = vpop.f32.mrb[1].mxu1 }
 0x161   : > { %v1176_v55 = vadd.f32 %v412_v49, %v267_v54  ;;  %v1126_v56 = vpop.f32.mrb[2].mxu1 }
 0x162   : > { %v270_v57 = vpop.f32.mrb[3].mxu1  ;;  %v436_v9 = vmul.f32 %v1175_v53, %v1038_v6 }
 0x163   : > { %v1177_v58 = vadd.f32 %v415_v51, %v270_v57  ;;  %v434_v12 = vmul.f32 %v1176_v55, %v1038_v6 }
 0x165   : > { %v435_v18 = vmul.f32 %v1177_v58, %v1038_v6 }
 0x167   : > { %v1143_v59 = vpop.f32.mrb[4].mxu1 }
 0x168   : > { %v507_v60 = vpop.f32.mrb[5].mxu1 }
 0x169   : > { %v1144_v61 = vpop.f32.mrb[6].mxu1 }
 0x16a   : > { %v510_v62 = vpop.f32.mrb[7].mxu1 }
 0x16f   : > { %v1149_v63 = vpop.f32.mrb[8].mxu1 }
 0x170   : > { %v583_v0 = vadd.f32 %v1149_v63, %v1143_v59  ;;  %v574_v1 = vpop.f32.mrb[9].mxu1 }
 0x171   : > { %v575_v2 = vadd.f32 %v574_v1, %v507_v60  ;;  %v1150_v3 = vpop.f32.mrb[10].mxu1 }
 0x172   : > { %v577_v4 = vpop.f32.mrb[11].mxu1 }
 0x173   : > { %v578_v5 = vadd.f32 %v577_v4, %v510_v62 }
 0x177   : > { %v1155_v7 = vpop.f32.mrb[12].mxu1 }
 0x178   : > { %v670_v10 = vadd.f32 %v1155_v7, %v583_v0  ;;  %v654_v11 = vpop.f32.mrb[13].mxu1 }
 0x179   : > { %v668_v13 = vadd.f32 %v654_v11, %v575_v2  ;;  %v1156_v14 = vpop.f32.mrb[14].mxu1 }
 0x17a   : > { %v673_v16 = vadd.f32 %v670_v10, %v436_v9  ;;  %v657_v17 = vpop.f32.mrb[15].mxu1 }
 0x17b   : > { %v671_v19 = vadd.f32 %v668_v13, %v434_v12  ;;  %v669_v20 = vadd.f32 %v657_v17, %v578_v5  ;;  %v1173_v21 = vpop.f32.mrb[4].mxu0 }
 0x17c   : > { %v915_v22 = vmul.f32 %v1173_v21, %v1085_v15  ;;  %v891_v23 = vpop.f32.mrb[5].mxu0 }
 0x17d   : > { %v672_v24 = vadd.f32 %v669_v20, %v435_v18  ;;  %v913_v25 = vmul.f32 %v1085_v15, %v891_v23  ;;  %v1174_v26 = vpop.f32.mrb[6].mxu0 }
 0x17e   : > { %v894_v28 = vpop.f32.mrb[7].mxu0  ;;  %v918_v29 = vadd.f32 %v915_v22, %v673_v16 }
 0x17f   : > { %v914_v31 = vmul.f32 %v1085_v15, %v894_v28  ;;  %v916_v32 = vadd.f32 %v913_v25, %v671_v19 }
 0x180   : > { %v939_v33 = vadd.f32 %v935_v27, %v918_v29 }
 0x181   : > { %v917_v34 = vadd.f32 %v914_v31, %v672_v24  ;;  %v937_v35 = vadd.f32 %v925_v30, %v916_v32 }
 0x182   : > { %v1093_v36 = vpack.c.bf16 %v939_v33, %v939_v33 }
 0x183   : > { %v938_v37 = vadd.f32 %v930_v8, %v917_v34  ;;  %v1091_v38 = vpack.c.bf16 %v937_v35, %v937_v35 }
 0x184   : > { %956 = vst.msk [vmem:[%s194_s30 + $0x8] sm:$0xf] %vm953_vm2, %v1093_v36 }
 0x185   : > { %v1092_v39 = vpack.c.bf16 %v938_v37, %v938_v37  ;;  %954 = vst.msk [vmem:[%s194_s30] sm:$0xf] %vm953_vm2, %v1091_v38 }
 0x187   : > { %955 = vst.msk [vmem:[%s194_s30 + $0x4] sm:$0xf] %vm953_vm2, %v1092_v39 }
 0x188 PF: > { %s14_s15 = sadd.s32 1, %s1244_s15  }
 0x189   : > { %p11_p4 = scmp.ge.s32.totalorder %s14_s15, 18  }
 0x18b   :  { %13 = sbr.rel (!%p11_p4) target bundleno = 1 (0x1), region = 74 }

// kernel: block_forward.21
= control target key start
LH: loop header
LB: loop body
LE: loop exit
PB: predicated region body
PF: predicated region fallthrough
CT: control target
= control target key end

     0   :  { %v58_v24 = vlaneseq  ;;  %s169_s0 = inlined_call_operand.vmem [shape: bf16[16,256], index: 0, kind: input, shape index: {}]   ;;  %s170_s1 = inlined_call_operand.vmem [shape: f32[1,256], index: 1, kind: input, shape index: {}]   ;;  %s171_s2 = inlined_call_operand.vmem [shape: f32[1,256], index: 2, kind: input, shape index: {}]   ;;  %s172_s3 = inlined_call_operand.vmem [shape: f32[16,256], index: 3, kind: input, shape index: {}]   ;;  %s173_s4 = inlined_call_operand.vmem [shape: f32[16,256], index: 4, kind: output, shape index: {}]  }
   0x1   :  { %v17_v0 = vld [vmem:[%s169_s0] sm:$0xff]  ;;  %v18_v1 = vld [vmem:[%s169_s0 + $0x8] sm:$0xff]  ;;  %v90_v54 = vld [vmem:[%s172_s3 + $0x10] sm:$0xff] }
   0x2   :  { %v19_v2 = vunpack.c.l.bf16 %v17_v0  ;;  %v20_v3 = vunpack.c.h.bf16 %v17_v0  ;;  %v21_v4 = vunpack.c.l.bf16 %v18_v1  ;;  %v22_v5 = vunpack.c.h.bf16 %v18_v1  ;;  %v56_v32 = vld [vmem:[%s170_s1] sm:$0x3]  ;;  %v89_v45 = vld [vmem:[%s172_s3 + $0x8] sm:$0xff]  ;;  %v91_v55 = vld [vmem:[%s172_s3 + $0x18] sm:$0xff] }
   0x3   :  { %v59_v28 = vshrl.u32 %v58_v24, 7  ;;  %v72_v33 = vld [vmem:[%s171_s2] sm:$0x3] }
   0x4   :  { %v23_v6 = vadd.f32 %v20_v3, %v19_v2  ;;  %v26_v7 = vadd.f32 %v22_v5, %v21_v4  ;;  %v88_v44 = vld [vmem:[%s172_s3] sm:$0xff] }
   0x5   :  { %v60_v30 = vsub.s32 0, %v59_v28  ;;  %v64_v31 = vsub.s32 1, %v59_v28 }
   0x6   :  { %24 = vadd.xlane.f32.xlu0 %v23_v6 }
   0x7   :  { %v61_v34 = vrot.slane %v56_v32, %v60_v30  ;;  %v65_v35 = vrot.slane %v56_v32, %v64_v31  ;;  %v77_v37 = vrot.slane %v72_v33, %v60_v30  ;;  %v81_v38 = vrot.slane %v72_v33, %v64_v31 }
   0xa   :  { %27 = vadd.xlane.f32.xlu0 %v26_v7 }
  0x93   :  { %v25_v8 = vpop.xlane.xlu0 %24 }
  0x94   :  { %v30_v9 = vmul.f32 0.00390625, %v25_v8 }
  0x96   :  { %v32_v10 = vsub.f32 %v19_v2, %v30_v9  ;;  %v33_v11 = vsub.f32 %v20_v3, %v30_v9 }
  0x97   :  { %v28_v12 = vpop.xlane.xlu0 %27 }
  0x98   :  { %v31_v13 = vmul.f32 0.00390625, %v28_v12  ;;  %v36_v14 = vmul.f32 %v32_v10, %v32_v10  ;;  %v37_v15 = vmul.f32 %v33_v11, %v33_v11 }
  0x9a   :  { %v34_v16 = vsub.f32 %v21_v4, %v31_v13  ;;  %v35_v17 = vsub.f32 %v22_v5, %v31_v13  ;;  %v40_v18 = vadd.f32 %v37_v15, %v36_v14 }
  0x9c   :  { %41 = vadd.xlane.f32.xlu1 %v40_v18  ;;  %v38_v19 = vmul.f32 %v34_v16, %v34_v16  ;;  %v39_v20 = vmul.f32 %v35_v17, %v35_v17 }
  0x9e   :  { %v43_v21 = vadd.f32 %v39_v20, %v38_v19 }
  0xa0   :  { %44 = vadd.xlane.f32.xlu1 %v43_v21 }
 0x129   :  { %v42_v22 = vpop.xlane.xlu1 %41 }
 0x12a   :  { %v46_v23 = vmul.f32 0.00390625, %v42_v22 }
 0x12c   :  { %v48_v25 = vadd.f32 1e-05, %v46_v23 }
 0x12d   :  { %v45_v26 = vpop.xlane.xlu1 %44 }
 0x12e   :  { %104 = vrsqrt.f32 %v48_v25  ;;  %v47_v27 = vmul.f32 0.00390625, %v45_v26 }
 0x130   :  { %v49_v29 = vadd.f32 1e-05, %v47_v27 }
 0x132   :  { %106 = vrsqrt.f32 %v49_v29 }
 0x138   :  { %v105_v36 = vpop.eup %104 }
 0x139   :  { %v52_v39 = vmul.f32 %v105_v36, %v32_v10  ;;  %v53_v40 = vmul.f32 %v105_v36, %v33_v11 }
 0x13b   :  { %v68_v41 = vmul.f32 %v61_v34, %v52_v39  ;;  %v69_v42 = vmul.f32 %v65_v35, %v53_v40 }
 0x13c   :  { %v107_v43 = vpop.eup %106 }
 0x13d   :  { %v84_v46 = vadd.f32 %v77_v37, %v68_v41  ;;  %v85_v47 = vadd.f32 %v81_v38, %v69_v42  ;;  %v54_v48 = vmul.f32 %v107_v43, %v34_v16  ;;  %v55_v49 = vmul.f32 %v107_v43, %v35_v17 }
 0x13f   :  { %v92_v50 = vadd.f32 %v88_v44, %v84_v46  ;;  %v93_v51 = vadd.f32 %v89_v45, %v85_v47  ;;  %v70_v52 = vmul.f32 %v61_v34, %v54_v48  ;;  %v71_v53 = vmul.f32 %v65_v35, %v55_v49 }
 0x141   :  { %96 = vst [vmem:[%s173_s4] sm:$0xff] %v92_v50  ;;  %97 = vst [vmem:[%s173_s4 + $0x8] sm:$0xff] %v93_v51  ;;  %v86_v56 = vadd.f32 %v77_v37, %v70_v52  ;;  %v87_v57 = vadd.f32 %v81_v38, %v71_v53 }
 0x143   :  { %v94_v58 = vadd.f32 %v90_v54, %v86_v56  ;;  %v95_v59 = vadd.f32 %v91_v55, %v87_v57 }
 0x145   :  { %98 = vst [vmem:[%s173_s4 + $0x10] sm:$0xff] %v94_v58  ;;  %99 = vst [vmem:[%s173_s4 + $0x18] sm:$0xff] %v95_v59 }

// kernel: block_forward.16
= control target key start
LH: loop header
LB: loop body
LE: loop exit
PB: predicated region body
PF: predicated region fallthrough
CT: control target
= control target key end

     0   :  { %s3494_s0 = inlined_call_operand.vmem [shape: bf16[2,24,8,64], index: 0, kind: input, shape index: {}, may-alias: {0,1,2}]   ;;  %s3495_s1 = inlined_call_operand.vmem [shape: bf16[2,24,8,64], index: 1, kind: input, shape index: {}, may-alias: {0,1,2}]   ;;  %s3496_s2 = inlined_call_operand.vmem [shape: bf16[2,24,8,64], index: 2, kind: input, shape index: {}, may-alias: {0,1,2}]   ;;  %s3497_s3 = inlined_call_operand.vmem [shape: f32[8,8,8], index: 3, kind: input, shape index: {}]   ;;  %s3498_s4 = inlined_call_operand.vmem [shape: f32[8,8], index: 4, kind: input, shape index: {}]   ;;  %s3499_s5 = inlined_call_operand.vmem [shape: f32[8,8], index: 5, kind: input, shape index: {}]   ;;  %s3500_s6 = inlined_call_operand.vmem [shape: bf16[2,8,8,64], index: 6, kind: output, shape index: {}]  }
   0x1   :  { %3597 = sst [smem:[#allocation58_spill]] %s3494_s0 }
   0x2   :  { %3598 = sst [smem:[#allocation59_spill]] %s3495_s1 }
   0x3   :  { %3599 = sst [smem:[#allocation60_spill]] %s3496_s2 }
   0x4   :  { %3600 = sst [smem:[#allocation61_spill]] %s3497_s3 }
   0x5   :  { %3601 = sst [smem:[#allocation62_spill]] %s3498_s4 }
   0x6   :  { %3602 = sst [smem:[#allocation63_spill]] %s3499_s5 }
   0x7   :  { %3603 = sst [smem:[#allocation64_spill]] %s3500_s6 }
   0x8   :  { %11 = vsyncpa [#allocation3], 0 }
   0x9   :  { %12 = vsyncpa [#allocation5], 0  ;;  %s2422_s21 = smov 0   ;;  %s2424_s22 = smov 0  }
   0xa   :  { %s2426_s23 = smov 0  }
   0xb LB: > { %3604 = sst [smem:[#allocation8_spill]] %s2377_s22  ;;  %s1937_s24 = sadd.s32 4294967295, %s2381_s23   ;;  %s2381_s23 = sphi %s2426_s23, %s18_s23   ;;  %s2377_s22 = sphi %s2424_s22, %s3842_s22   ;;  %s2373_s21 = sphi %s2422_s21, %s3841_s21  }
   0xc   : > { %3605 = sst [smem:[#allocation9_spill]] %s2381_s23  ;;  %s30_s25 = sadd.s32 1, %s2377_s22 }
   0xd   : > { %p32_p0 = scmp.ge.s32.totalorder %s30_s25, 2  ;;  %p1939_p1 = scmp.ge.s32.totalorder %s2381_s23, 1 }
   0xe   : > { %p211_p2 = scmp.lt.s32.totalorder %s2381_s23, 3  ;;  %p2447_p4 = scmp.eq.s32.totalorder %s1937_s24, 0 }
   0xf   : > { %s3844_s25 = smov (%p32_p0, %s30_s25), 0  ;;  %s3609_s4 = sld [smem:[#allocation62_spill]] }
  0x10   : > { %3606 = sst [smem:[#allocation10_spill]] %s3844_s25  ;;  %p2443_p3 = pnand %p1939_p1, %p211_p2 }
  0x11   : > { %s3608_s27 = scalar_select %p2447_p4, 1, 0 }
  0x12   : > { %s3607_s26 = scalar_select %p2443_p3, 1, 0 }
  0x13   : > { %p2250_p5 = pneg %p2443_p3  ;;  %s3610_s5 = sld [smem:[#allocation63_spill]] }
  0x15   : > { %s231_s30 = sshll.u32 %s3609_s4, 4  ;;  %p2461_p6 = pnand %p2447_p4, %p2250_p5  ;;  %s232_s30 = int_to_ptr.vmem [resolvable:$true] %s231_s30 }
  0x16   : > { %s2321_s11 = scalar_lea.vmem %s232_s30, 128  ;;  %p2329_p11 = scmp.lt.s32.totalorder %s232_s30, %s232_s30 }
  0x17   : > { %p2322_p7 = scmp.ne.s32.totalorder %s232_s30, %s2321_s11  ;;  %p2323_p8 = pneg %p2461_p6 }
  0x18   : > { %p2330_p12 = scmp.lt.s32.totalorder %s2321_s11, %s2321_s11 }
  0x19   : > { %s242_s9 = sshll.u32 %s3610_s5, 4  ;;  %p2324_p9 = pnand %p2323_p8, %p2322_p7  ;;  %s243_s9 = int_to_ptr.vmem [resolvable:$true] %s242_s9 }
  0x1a   : > { %p2331_p13 = por %p2330_p12, %p2329_p11 }
  0x1b   : > { %p2325_p10 = pneg %p2324_p9 }
  0x1d   : > { %p2332_p0 = pnand %p2331_p13, %p2325_p10 }
  0x1f   : > { %2335 = shalt.err (!%p2332_p0)
}
  0x20   : > { %s2383_s12 = smov [#allocation2]   ;;  %s2336_s13 = scalar_lea.vmem %s243_s9, 128 }
  0x21   : > { %2253 = dma.vmem_to_smem (!%p2461_p6), %s232_s30, 128, %s2383_s12, [#allocation3]  }
  0x22   : > { %p2337_p1 = scmp.ne.s32.totalorder %s243_s9, %s2336_s13  ;;  %p2344_p4 = scmp.lt.s32.totalorder %s243_s9, %s243_s9 }
  0x23   : > { %p2345_p3 = scmp.lt.s32.totalorder %s2336_s13, %s2336_s13 }
  0x24   : > { %p2339_p2 = pnand %p2337_p1, %p2323_p8 }
  0x25   : > { %p2346_p7 = por %p2345_p3, %p2344_p4 }
  0x26   : > { %p2340_p5 = pneg %p2339_p2 }
  0x28   : > { %p2347_p9 = pnand %p2346_p7, %p2340_p5 }
  0x2a   : > { %2350 = shalt.err (!%p2347_p9)
}
  0x2b   : > { %s2384_s14 = smov [#allocation4]   ;;  %p3612_p10 = scmp.ne.s32.totalorder %s3607_s26, 0 }
  0x2c   : > { %2256 = dma.vmem_to_smem (!%p2461_p6), %s243_s9, 128, %s2384_s14, [#allocation5]  }
  0x2d   : > { %284 = sbr.rel (%p3612_p10) target bundleno = 905 (0x389), region = 44 }
  0x34   : > { %p3613_p11 = scmp.ne.s32.totalorder %s3608_s27, 0 }
  0x36   : > { %2364 = dma.done.wait (%p3613_p11), [#allocation3], 128  }
  0x37   : > { %2366 = vsyncadd (%p3613_p11), [#allocation3], 4294967168 }
  0x38   : > { %2368 = dma.done.wait (%p3613_p11), [#allocation5], 128  }
  0x39   : > { %2370 = vsyncadd (%p3613_p11), [#allocation5], 4294967168 }
  0x3a   : > { %294 = sfence }
  0x3b   : > { %p341_p3 = scmp.lt.s32.totalorder %s2373_s21, 1  ;;  %v3558_v0 = vmov 0.0   ;;  %vm2386_vm0 = vmmov 0   ;;  %vm406_vm1 = vcmask 523264   ;;  %s3616_s1 = sld [smem:[#allocation59_spill]]  ;;  %v783_v25 = vlaneseq }
  0x3c   : > { %2145 = vmatprep.subr.bf16.mxu0 %v3558_v0  ;;  %2151 = vmatprep.subr.bf16.mxu1 %v3558_v0  ;;  %s3617_s0 = sld [smem:[#allocation58_spill]]  ;;  %s2562_s26 = sld [smem:[#allocation2 + $0x100]]  ;;  %vm1049_vm3 = vcmask 64512   ;;  %vm1397_vm4 = vcmask 1043456   ;;  %vm1771_vm5 = vcmask 519168  }
  0x3d   : > { %s3846_s21 = smov (!%p341_p3, %s2373_s21), 1  ;;  %2147 = vmatprep.mubr.msk.bf16.mxu0 %vm2386_vm0, %v3558_v0  ;;  %2153 = vmatprep.mubr.msk.bf16.mxu1 %vm2386_vm0, %v3558_v0  ;;  %s2564_s27 = sld [smem:[#allocation2 + $0x101]]  ;;  %v784_v26 = vshrl.u32 %v783_v25, 7  ;;  %v789_v27 = vand.u32 127, %v783_v25 }
  0x3e   : > { %3614 = sst [smem:[#allocation11_spill]] %s3846_s21  ;;  %s2492_s15 = smul.u32 96, %s3846_s21 }
  0x3f   : > { %s2566_s28 = sld [smem:[#allocation2]]  ;;  %s2568_s29 = sld [smem:[#allocation2 + $0x1]]  ;;  %vm2672_vm2 = vcmp.le.s32.totalorder %v789_v27, %v784_v26 }
  0x40   : > { %3615 = sst [smem:[#allocation12_spill]] %s2492_s15  ;;  %s2570_s30 = sld [smem:[#allocation2 + $0x180]] }
  0x41   : > { %s2498_s18 = scalar_lea.vmem %s3616_s1, %s2492_s15  ;;  %s2572_s7 = sld [smem:[#allocation2 + $0x181]] }
  0x42   : > { %v1952_v1 = vld [vmem:[%s2498_s18 + $0x20] sm:$0xf]  ;;  %v1953_v2 = vld [vmem:[%s2498_s18 + $0x24] sm:$0xf]  ;;  %s2508_s24 = scalar_lea.vmem %s3617_s0, %s2492_s15  ;;  %v1954_v5 = vld [vmem:[%s2498_s18 + $0x28] sm:$0xf]  ;;  %v864_v28 = vstv %s2562_s26 }
  0x43   : > { %v411_v3 = vsel %vm406_vm1, %v1952_v1, 0  ;;  %v457_v4 = vsel %vm406_vm1, %v1953_v2, 0  ;;  %v1955_v6 = vld [vmem:[%s2498_s18 + $0x2c] sm:$0xf]  ;;  %v374_v7 = vld [vmem:[%s2508_s24] sm:$0xf]  ;;  %v867_v29 = vstv %s2564_s27 }
  0x44   : > { %2146 = vmatpush3.bf16.xpose.msra.mxu0 %v411_v3  ;;  %2152 = vmatpush3.bf16.xpose.msra.mxu1 %v457_v4  ;;  %v375_v8 = vld [vmem:[%s2508_s24 + $0x4] sm:$0xf]  ;;  %v503_v9 = vsel %vm406_vm1, %v1954_v5, 0  ;;  %v549_v10 = vsel %vm406_vm1, %v1955_v6, 0  ;;  %v1956_v11 = vld [vmem:[%s2498_s18 + $0x30] sm:$0xf] }
  0x45   : > { %2157 = vmatprep.subr.bf16.mxu0 %v3558_v0  ;;  %2163 = vmatprep.subr.bf16.mxu1 %v3558_v0  ;;  %v1957_v12 = vld [vmem:[%s2498_s18 + $0x34] sm:$0xf]  ;;  %v376_v13 = vld [vmem:[%s2508_s24 + $0x8] sm:$0xf]  ;;  %v377_v14 = vld [vmem:[%s2508_s24 + $0xc] sm:$0xf]  ;;  %v802_v30 = vstv %s2566_s28 }
  0x46   : > { %v595_v15 = vsel %vm406_vm1, %v1956_v11, 0  ;;  %v641_v16 = vsel %vm406_vm1, %v1957_v12, 0  ;;  %v1958_v17 = vld [vmem:[%s2498_s18 + $0x38] sm:$0xf]  ;;  %v1959_v18 = vld [vmem:[%s2498_s18 + $0x3c] sm:$0xf]  ;;  %v805_v31 = vstv %s2568_s29  ;;  %v895_v32 = vstv %s2570_s30 }
  0x47   : > { %v378_v19 = vld [vmem:[%s2508_s24 + $0x10] sm:$0xf]  ;;  %v379_v20 = vld [vmem:[%s2508_s24 + $0x14] sm:$0xf]  ;;  %v687_v21 = vsel %vm406_vm1, %v1958_v17, 0  ;;  %v733_v22 = vsel %vm406_vm1, %v1959_v18, 0  ;;  %v898_v33 = vstv %s2572_s7 }
  0x48   : > { %v380_v23 = vld [vmem:[%s2508_s24 + $0x18] sm:$0xf]  ;;  %v381_v24 = vld [vmem:[%s2508_s24 + $0x1c] sm:$0xf]  ;;  %3618 = sst [smem:[#allocation13_spill]] %s2562_s26  ;;  %s2574_s8 = sld [smem:[#allocation2 + $0x80]] }
  0x49   : > { %3619 = sst [smem:[#allocation14_spill]] %s2564_s27  ;;  %s2576_s9 = sld [smem:[#allocation2 + $0x81]] }
  0x4a   : > { %3620 = sst [smem:[#allocation15_spill]] %s2566_s28  ;;  %s2578_s10 = sld [smem:[#allocation2 + $0x280]] }
  0x4b   : > { %2148 = vmatmul.mubr.msk.bf16.vlgmr.msra.gmra.mrb[0].mxu0 %vm406_vm1, %v374_v7  ;;  %2154 = vmatmul.mubr.msk.bf16.vlgmr.msra.gmra.mrb[0].mxu1 %vm406_vm1, %v375_v8  ;;  %3621 = sst [smem:[#allocation16_spill]] %s2568_s29  ;;  %s2580_s11 = sld [smem:[#allocation2 + $0x281]] }
  0x4c   : > { %2158 = vmatpush3.bf16.xpose.msra.mxu0 %v503_v9  ;;  %2164 = vmatpush3.bf16.xpose.msra.mxu1 %v549_v10  ;;  %3622 = sst [smem:[#allocation17_spill]] %s2570_s30  ;;  %s2582_s12 = sld [smem:[#allocation2 + $0x200]] }
  0x4d   : > { %2159 = vmatprep.mubr.msk.bf16.mxu0 %vm2386_vm0, %v3558_v0  ;;  %2165 = vmatprep.mubr.msk.bf16.mxu1 %vm2386_vm0, %v3558_v0  ;;  %3623 = sst [smem:[#allocation18_spill]] %s2572_s7  ;;  %s2584_s13 = sld [smem:[#allocation2 + $0x201]] }
  0x4e   : > { %2169 = vmatprep.subr.bf16.mxu0 %v3558_v0  ;;  %2175 = vmatprep.subr.bf16.mxu1 %v3558_v0  ;;  %3624 = sst [smem:[#allocation19_spill]] %s2574_s8  ;;  %s2586_s14 = sld [smem:[#allocation2 + $0x102]]  ;;  %v833_v34 = vstv %s2574_s8 }
  0x4f   : > { %3625 = sst [smem:[#allocation20_spill]] %s2576_s9  ;;  %s2588_s16 = sld [smem:[#allocation2 + $0x2]]  ;;  %v836_v35 = vstv %s2576_s9 }
  0x50   : > { %3626 = sst [smem:[#allocation21_spill]] %s2578_s10  ;;  %s2590_s17 = sld [smem:[#allocation2 + $0x182]]  ;;  %v957_v36 = vstv %s2578_s10 }
  0x51   : > { %3627 = sst [smem:[#allocation22_spill]] %s2580_s11  ;;  %s2592_s18 = sld [smem:[#allocation2 + $0x82]]  ;;  %v960_v37 = vstv %s2580_s11 }
  0x52   : > { %3628 = sst [smem:[#allocation23_spill]] %s2582_s12  ;;  %s2594_s19 = sld [smem:[#allocation2 + $0x103]]  ;;  %v926_v40 = vstv %s2582_s12 }
  0x53   : > { %2160 = vmatmul.mubr.msk.bf16.vlgmr.msra.gmra.mrb[4].mxu0 %vm406_vm1, %v376_v13  ;;  %2166 = vmatmul.mubr.msk.bf16.vlgmr.msra.gmra.mrb[4].mxu1 %vm406_vm1, %v377_v14  ;;  %3629 = sst [smem:[#allocation24_spill]] %s2584_s13  ;;  %s2596_s20 = sld [smem:[#allocation2 + $0x3]]  ;;  %v929_v41 = vstv %s2584_s13 }
  0x54   : > { %2170 = vmatpush3.bf16.xpose.msra.mxu0 %v595_v15  ;;  %2176 = vmatpush3.bf16.xpose.msra.mxu1 %v641_v16  ;;  %3630 = sst [smem:[#allocation25_spill]] %s2586_s14  ;;  %s2598_s24 = sld [smem:[#allocation2 + $0x183]]  ;;  %v871_v38 = vstv %s2586_s14 }
  0x55   : > { %2171 = vmatprep.mubr.msk.bf16.mxu0 %vm2386_vm0, %v3558_v0  ;;  %2177 = vmatprep.mubr.msk.bf16.mxu1 %vm2386_vm0, %v3558_v0  ;;  %3631 = sst [smem:[#allocation26_spill]] %s2588_s16  ;;  %s2600_s0 = sld [smem:[#allocation2 + $0x83]]  ;;  %v809_v39 = vstv %s2588_s16 }
  0x56   : > { %2181 = vmatprep.subr.bf16.mxu0 %v3558_v0  ;;  %2187 = vmatprep.subr.bf16.mxu1 %v3558_v0  ;;  %3632 = sst [smem:[#allocation27_spill]] %s2590_s17  ;;  %s2602_s1 = sld [smem:[#allocation2 + $0x282]]  ;;  %v902_v45 = vstv %s2590_s17 }
  0x57   : > { %3633 = sst [smem:[#allocation28_spill]] %s2592_s18  ;;  %s2604_s4 = sld [smem:[#allocation2 + $0x283]]  ;;  %v840_v46 = vstv %s2592_s18 }
  0x58   : > { %3634 = sst [smem:[#allocation29_spill]] %s2594_s19  ;;  %s2606_s5 = sld [smem:[#allocation2 + $0x202]]  ;;  %v875_v43 = vstv %s2594_s19 }
  0x59   : > { %3635 = sst [smem:[#allocation30_spill]] %s2596_s20  ;;  %s2608_s25 = sld [smem:[#allocation2 + $0x380]]  ;;  %v813_v44 = vstv %s2596_s20 }
  0x5a   : > { %3636 = sst [smem:[#allocation31_spill]] %s2598_s24  ;;  %s2610_s22 = sld [smem:[#allocation2 + $0x203]]  ;;  %v906_v47 = vstv %s2598_s24 }
  0x5b   : > { %2172 = vmatmul.mubr.msk.bf16.vlgmr.msra.gmra.mrb[8].mxu0 %vm406_vm1, %v378_v19  ;;  %2178 = vmatmul.mubr.msk.bf16.vlgmr.msra.gmra.mrb[8].mxu1 %vm406_vm1, %v379_v20  ;;  %3637 = sst [smem:[#allocation32_spill]] %s2600_s0  ;;  %s2612_s23 = sld [smem:[#allocation2 + $0x381]]  ;;  %v844_v48 = vstv %s2600_s0 }
  0x5c   : > { %2182 = vmatpush3.bf16.xpose.msra.mxu0 %v687_v21  ;;  %2188 = vmatpush3.bf16.xpose.msra.mxu1 %v733_v22  ;;  %3638 = sst [smem:[#allocation33_spill]] %s2602_s1  ;;  %s2614_s6 = sld [smem:[#allocation2 + $0x104]]  ;;  %v964_v49 = vstv %s2602_s1 }
  0x5d   : > { %2183 = vmatprep.mubr.msk.bf16.mxu0 %vm2386_vm0, %v3558_v0  ;;  %2189 = vmatprep.mubr.msk.bf16.mxu1 %vm2386_vm0, %v3558_v0  ;;  %3639 = sst [smem:[#allocation34_spill]] %s2604_s4  ;;  %s2616_s21 = sld [smem:[#allocation2 + $0x4]] }
  0x5e   : > { %2193 = vmatprep.subr.bf16.mxu0 %v3558_v0  ;;  %2199 = vmatprep.subr.bf16.mxu1 %v3558_v0  ;;  %s2618_s2 = sld [smem:[#allocation2 + $0x184]]  ;;  %s2622_s3 = sld [smem:[#allocation2 + $0x105]]  ;;  %v933_v53 = vstv %s2606_s5 }
  0x5f   : > { %3640 = sst [smem:[#allocation35_spill]] %s2608_s25  ;;  %s2620_s15 = sld [smem:[#allocation2 + $0x84]] }
  0x60   : > { %s2624_s4 = sld [smem:[#allocation2 + $0x5]]  ;;  %s2656_s26 = sld [smem:[#allocation2 + $0x107]]  ;;  %v937_v54 = vstv %s2610_s22 }
  0x61   : > { %3641 = sst [smem:[#allocation36_spill]] %s2612_s23  ;;  %s2626_s25 = sld [smem:[#allocation2 + $0x185]] }
  0x62   : > { %3642 = sst [smem:[#allocation37_spill]] %s2614_s6  ;;  %s2658_s27 = sld [smem:[#allocation2 + $0x7]] }
  0x63   : > { %2184 = vmatmul.mubr.msk.bf16.vlgmr.msra.gmra.mrb[12].mxu0 %vm406_vm1, %v380_v23  ;;  %2190 = vmatmul.mubr.msk.bf16.vlgmr.msra.gmra.mrb[12].mxu1 %vm406_vm1, %v381_v24  ;;  %3643 = sst [smem:[#allocation38_spill]] %s2616_s21  ;;  %s2628_s23 = sld [smem:[#allocation2 + $0x85]] }
  0x64   : > { %2195 = vmatprep.mubr.msk.bf16.mxu0 %vm2386_vm0, %v3558_v0  ;;  %2201 = vmatprep.mubr.msk.bf16.mxu1 %vm2386_vm0, %v3558_v0  ;;  %3644 = sst [smem:[#allocation39_spill]] %s2618_s2  ;;  %s2630_s21 = sld [smem:[#allocation2 + $0x284]] }
  0x65   : > { %3645 = sst [smem:[#allocation40_spill]] %s2620_s15  ;;  %s2632_s6 = sld [smem:[#allocation2 + $0x285]] }
  0x66   : > { %3646 = sst [smem:[#allocation41_spill]] %s2622_s3  ;;  %s2634_s2 = sld [smem:[#allocation2 + $0x382]] }
  0x67   : > { %3647 = sst [smem:[#allocation42_spill]] %s2624_s4  ;;  %s2636_s15 = sld [smem:[#allocation2 + $0x300]]  ;;  %v914_v63 = vstv %s2626_s25 }
  0x68   : > { %3648 = sst [smem:[#allocation43_spill]] %s2626_s25  ;;  %s2640_s4 = sld [smem:[#allocation2 + $0x301]] }
  0x69   : > { %3649 = sst [smem:[#allocation44_spill]] %s2628_s23  ;;  %s2638_s3 = sld [smem:[#allocation2 + $0x383]]  ;;  %v852_v1 = vstv %s2628_s23 }
  0x6a   : > { %3650 = sst [smem:[#allocation45_spill]] %s2630_s21  ;;  %s2644_s21 = sld [smem:[#allocation2 + $0x106]] }
  0x6b   : > { %3651 = sst [smem:[#allocation46_spill]] %s2632_s6  ;;  %s3660_s7 = sld [smem:[#allocation34_spill]] }
  0x6c   : > { %s2646_s6 = sld [smem:[#allocation2 + $0x6]]  ;;  %3658 = sst [smem:[#allocation53_spill]] %s2656_s26  ;;  %v1026_v4 = vstv %s2634_s2 }
  0x6d   : > { %3659 = sst [smem:[#allocation54_spill]] %s2658_s27  ;;  %s2666_s30 = sld [smem:[#allocation2 + $0x187]]  ;;  %v988_v5 = vstv %s2636_s15 }
  0x6e   : > { %3653 = sst [smem:[#allocation48_spill]] %s2640_s4  ;;  %s2652_s4 = sld [smem:[#allocation2 + $0x186]] }
  0x6f   : > { %3652 = sst [smem:[#allocation47_spill]] %s2638_s3  ;;  %s2654_s3 = sld [smem:[#allocation2 + $0x86]] }
  0x70   : > { %3654 = sst [smem:[#allocation49_spill]] %s2644_s21  ;;  %s2668_s29 = sld [smem:[#allocation2 + $0x87]]  ;;  %v887_v8 = vstv %s2644_s21 }
  0x71   : > { %s3665_s10 = sld [smem:[#allocation35_spill]]  ;;  %s3666_s11 = sld [smem:[#allocation36_spill]]  ;;  %v968_v50 = vstv %s3660_s7 }
  0x72   : > { %3655 = sst [smem:[#allocation50_spill]] %s2646_s6  ;;  %s2680_s14 = sld [smem:[#allocation2 + $0x286]] }
  0x73   : > { %3661 = sst [smem:[#allocation55_spill]] %s2666_s30  ;;  %s3668_s16 = sld [smem:[#allocation37_spill]] }
  0x74   : > { %3656 = sst [smem:[#allocation51_spill]] %s2652_s4  ;;  %s2682_s9 = sld [smem:[#allocation2 + $0x287]] }
  0x75   : > { %3657 = sst [smem:[#allocation52_spill]] %s2654_s3  ;;  %s3670_s8 = sld [smem:[#allocation38_spill]] }
  0x76   : > { %3662 = sst [smem:[#allocation56_spill]] %s2668_s29  ;;  %s3671_s13 = sld [smem:[#allocation39_spill]] }
  0x77   : > { %s3672_s12 = sld [smem:[#allocation40_spill]]  ;;  %s2688_s28 = sld [smem:[#allocation2 + $0x204]]  ;;  %v1019_v55 = vstv %s3665_s10  ;;  %v1022_v56 = vstv %s3666_s11 }
  0x78   : > { %3667 = sst [smem:[#allocation35_spill]] %s2680_s14  ;;  %s3674_s19 = sld [smem:[#allocation41_spill]] }
  0x79   : > { %s2690_s20 = sld [smem:[#allocation2 + $0x205]]  ;;  %s3676_s18 = sld [smem:[#allocation61_spill]]  ;;  %v879_v57 = vstv %s3668_s16 }
  0x7a   : > { %3669 = sst [smem:[#allocation36_spill]] %s2682_s9  ;;  %s3677_s30 = sld [smem:[#allocation42_spill]] }
  0x7b   : > { %s3678_s0 = sld [smem:[#allocation45_spill]]  ;;  %s3679_s7 = sld [smem:[#allocation46_spill]]  ;;  %v817_v58 = vstv %s3670_s8 }
  0x7c   : > { %s2700_s1 = sld [smem:[#allocation2 + $0x206]]  ;;  %s2704_s24 = sld [smem:[#allocation2 + $0x302]]  ;;  %v910_v59 = vstv %s3671_s13 }
  0x7d   : > { %3673 = sst [smem:[#allocation37_spill]] %s2688_s28  ;;  %s3681_s27 = sld [smem:[#allocation47_spill]]  ;;  %v848_v60 = vstv %s3672_s12 }
  0x7e   : > { %s3682_s29 = sld [smem:[#allocation48_spill]]  ;;  %s2710_s14 = sld [smem:[#allocation2 + $0x384]]  ;;  %v883_v61 = vstv %s3674_s19 }
  0x7f   : > { %3675 = sst [smem:[#allocation41_spill]] %s2690_s20  ;;  %v398_v51 = vld [vmem:[%s3676_s18] sm:$0xff]  ;;  %v399_v52 = vld [vmem:[%s3676_s18 + $0x8] sm:$0xff]  ;;  %s2712_s17 = sld [smem:[#allocation2 + $0x303]] }
  0x80   : > { %v821_v62 = vstv %s3677_s30  ;;  %s2734_s3 = sld [smem:[#allocation2 + $0x207]]  ;;  %s2739_s13 = sld [smem:[#allocation2 + $0x385]] }
  0x81   : > { %v972_v2 = vstv %s3678_s0  ;;  %v976_v3 = vstv %s3679_s7  ;;  %s2741_s23 = sld [smem:[#allocation2 + $0x386]]  ;;  %s3720_s26 = sld [smem:[#allocation53_spill]] }
  0x82   : > { %3680 = sst [smem:[#allocation57_spill]] %s2700_s1  ;;  %s3722_s7 = sld [smem:[#allocation54_spill]] }
  0x83   : > { %v1030_v10 = vstv %s3681_s27  ;;  %s3723_s8 = sld [smem:[#allocation51_spill]]  ;;  %s3724_s9 = sld [smem:[#allocation55_spill]] }
  0x84   : > { %v991_v11 = vstv %s3682_s29  ;;  %s3725_s10 = sld [smem:[#allocation52_spill]]  ;;  %s3726_s11 = sld [smem:[#allocation56_spill]] }
  0x85   : > { %s2904_s15 = sld [smem:[#allocation2 + $0x387]]  ;;  %s3727_s12 = sld [smem:[#allocation35_spill]] }
  0x86   : > { %s2920_s29 = sld [smem:[#allocation2 + $0x304]]  ;;  %s3730_s30 = sld [smem:[#allocation57_spill]] }
  0x87   : > { %s2963_s25 = sld [smem:[#allocation2 + $0x307]]  ;;  %s3051_s1 = sld [smem:[#allocation4]] }
  0x88   : > { %s3053_s5 = sld [smem:[#allocation4 + $0x1]]  ;;  %s3055_s22 = sld [smem:[#allocation4 + $0x2]] }
  0x89   : > { %s3057_s4 = sld [smem:[#allocation4 + $0x3]]  ;;  %s3059_s2 = sld [smem:[#allocation4 + $0x4]] }
  0x8a   : > { %s3061_s6 = sld [smem:[#allocation4 + $0x5]]  ;;  %s3063_s21 = sld [smem:[#allocation4 + $0x6]] }
  0x8b   : > { %s3065_s16 = sld [smem:[#allocation4 + $0x7]]  ;;  %s3067_s19 = sld [smem:[#allocation4 + $0x80]] }
  0x8c   : > { %s3069_s27 = sld [smem:[#allocation4 + $0x81]] }
  0x8d   : > { %3745 = sst [smem:[#allocation47_spill]] %s3051_s1 }
  0x8e   : > { %3746 = sst [smem:[#allocation48_spill]] %s3053_s5 }
  0x8f   : > { %3747 = sst [smem:[#allocation13_spill]] %s3055_s22 }
  0x90   : > { %3748 = sst [smem:[#allocation14_spill]] %s3057_s4 }
  0x91   : > { %3749 = sst [smem:[#allocation15_spill]] %s3059_s2 }
  0x92   : > { %3750 = sst [smem:[#allocation16_spill]] %s3061_s6 }
  0x93   : > { %3751 = sst [smem:[#allocation17_spill]] %s3063_s21 }
  0x94   : > { %3752 = sst [smem:[#allocation18_spill]] %s3065_s16 }
  0x95   : > { %3753 = sst [smem:[#allocation19_spill]] %s3067_s19 }
  0x96   : > { %3754 = sst [smem:[#allocation20_spill]] %s3069_s27 }
 0x11e   : > { %v447_v6 = vpop.f32.mrb[0].mxu0  ;;  %v493_v7 = vpop.f32.mrb[0].mxu1 }
 0x11f   : > { %v448_v12 = vadd.f32 %v447_v6, %v398_v51  ;;  %v494_v13 = vadd.f32 %v493_v7, %v399_v52  ;;  %v2149_v14 = vpop.f32.mrb[1].mxu0  ;;  %v2155_v15 = vpop.f32.mrb[1].mxu1  ;;  %v941_v6 = vstv %s2688_s28  ;;  %v945_v7 = vstv %s2690_s20  ;;  %s3721_s28 = sld [smem:[#allocation50_spill]]  ;;  %s3728_s20 = sld [smem:[#allocation36_spill]] }
 0x120   : > { %v450_v18 = vpop.f32.mrb[2].mxu0  ;;  %v496_v19 = vpop.f32.mrb[2].mxu1 }
 0x121   : > { %v775_v24 = vmul.f32 0.125, %v448_v12  ;;  %v776_v25 = vmul.f32 0.125, %v494_v13  ;;  %v2150_v26 = vpop.f32.mrb[3].mxu0  ;;  %v2156_v27 = vpop.f32.mrb[3].mxu1  ;;  %v1034_v18 = vstv %s2710_s14  ;;  %s2957_s14 = sld [smem:[#allocation2 + $0x306]] }
 0x122   : > { %v400_v26 = vld [vmem:[%s3676_s18 + $0x10] sm:$0xff]  ;;  %v401_v27 = vld [vmem:[%s3676_s18 + $0x18] sm:$0xff] }
 0x123   : > { %v793_v13 = vsel %vm2672_vm2, -1e+18, %v775_v24  ;;  %v794_v15 = vsel %vm2672_vm2, -1e+18, %v776_v25 }
 0x124   : > { %v865_v0 = vmul.f32 %v864_v28, %v793_v13  ;;  %v868_v12 = vmul.f32 %v867_v29, %v794_v15  ;;  %v803_v24 = vmul.f32 %v802_v30, %v793_v13  ;;  %v806_v25 = vmul.f32 %v805_v31, %v794_v15 }
 0x125   : > { %v896_v14 = vmul.f32 %v895_v32, %v793_v13  ;;  %v899_v19 = vmul.f32 %v898_v33, %v794_v15  ;;  %v834_v52 = vmul.f32 %v833_v34, %v793_v13  ;;  %v837_v51 = vmul.f32 %v836_v35, %v794_v15 }
 0x126   : > { %v539_v23 = vpop.f32.mrb[4].mxu0  ;;  %v585_v17 = vpop.f32.mrb[4].mxu1  ;;  %v869_v28 = vadd.f32 %v868_v12, %v865_v0  ;;  %v807_v22 = vadd.f32 %v806_v25, %v803_v24  ;;  %v958_v29 = vmul.f32 %v957_v36, %v793_v13  ;;  %v961_v30 = vmul.f32 %v960_v37, %v794_v15 }
 0x127   : > { %v540_v31 = vadd.f32 %v539_v23, %v400_v26  ;;  %v586_v32 = vadd.f32 %v585_v17, %v401_v27  ;;  %v2161_v33 = vpop.f32.mrb[5].mxu0  ;;  %v2167_v16 = vpop.f32.mrb[5].mxu1  ;;  %v900_v34 = vadd.f32 %v899_v19, %v896_v14  ;;  %v838_v35 = vadd.f32 %v837_v51, %v834_v52  ;;  %v402_v26 = vld [vmem:[%s3676_s18 + $0x20] sm:$0xff] }
 0x128   : > { %v542_v21 = vpop.f32.mrb[6].mxu0  ;;  %v588_v9 = vpop.f32.mrb[6].mxu1  ;;  %v962_v20 = vadd.f32 %v961_v30, %v958_v29  ;;  %v927_v0 = vmul.f32 %v926_v40, %v793_v13  ;;  %v930_v36 = vmul.f32 %v929_v41, %v794_v15  ;;  %v1020_v37 = vmul.f32 %v1019_v55, %v793_v13 }
 0x129   : > { %v777_v23 = vmul.f32 0.125, %v540_v31  ;;  %v778_v17 = vmul.f32 0.125, %v586_v32  ;;  %v2162_v16 = vpop.f32.mrb[7].mxu0  ;;  %v2168_v14 = vpop.f32.mrb[7].mxu1  ;;  %v953_v51 = vstv %s2734_s3  ;;  %v1023_v9 = vmul.f32 %v1022_v56, %v794_v15  ;;  %s3742_s3 = sld [smem:[#allocation12_spill]] }
 0x12a   : > { %v931_v21 = vadd.f32 %v930_v36, %v927_v0  ;;  %v1038_v40 = vstv %s2739_s13  ;;  %v1042_v41 = vstv %s2741_s23  ;;  %v989_v55 = vmul.f32 %v988_v5, %v793_v13  ;;  %v403_v5 = vld [vmem:[%s3676_s18 + $0x28] sm:$0xff]  ;;  %s2946_s13 = sld [smem:[#allocation2 + $0x305]]  ;;  %s3103_s23 = sld [smem:[#allocation4 + $0x182]] }
 0x12b   : > { %v2791_v52 = vsel %vm2672_vm2, -1e+18, %v777_v23  ;;  %v2795_v12 = vsel %vm2672_vm2, -1e+18, %v778_v17  ;;  %v2797_v19 = vadd.f32 %v1023_v9, %v1020_v37  ;;  %v992_v56 = vmul.f32 %v991_v11, %v794_v15 }
 0x12c   : > { %v872_v13 = vmul.f32 %v871_v38, %v2791_v52  ;;  %v876_v27 = vmul.f32 %v875_v43, %v2795_v12  ;;  %v810_v24 = vmul.f32 %v809_v39, %v2791_v52  ;;  %v814_v11 = vmul.f32 %v813_v44, %v2795_v12 }
 0x12d   : > { %v903_v15 = vmul.f32 %v902_v45, %v2791_v52  ;;  %v907_v25 = vmul.f32 %v906_v47, %v2795_v12  ;;  %v841_v29 = vmul.f32 %v840_v46, %v2791_v52  ;;  %v845_v38 = vmul.f32 %v844_v48, %v2795_v12 }
 0x12e   : > { %v631_v30 = vpop.f32.mrb[8].mxu0  ;;  %v677_v43 = vpop.f32.mrb[8].mxu1  ;;  %v873_v31 = vadd.f32 %v872_v13, %v869_v28  ;;  %v811_v39 = vadd.f32 %v810_v24, %v807_v22  ;;  %v965_v44 = vmul.f32 %v964_v49, %v2791_v52  ;;  %v969_v45 = vmul.f32 %v968_v50, %v2795_v12 }
 0x12f   : > { %v632_v32 = vadd.f32 %v631_v30, %v402_v26  ;;  %v678_v33 = vadd.f32 %v677_v43, %v403_v5  ;;  %v2173_v47 = vpop.f32.mrb[9].mxu0  ;;  %v2179_v0 = vpop.f32.mrb[9].mxu1  ;;  %v904_v36 = vadd.f32 %v903_v15, %v900_v34  ;;  %v842_v46 = vadd.f32 %v841_v29, %v838_v35 }
 0x130   : > { %v634_v48 = vpop.f32.mrb[10].mxu0  ;;  %v680_v37 = vpop.f32.mrb[10].mxu1  ;;  %v877_v23 = vadd.f32 %v876_v27, %v873_v31  ;;  %v815_v28 = vadd.f32 %v814_v11, %v811_v39  ;;  %v966_v22 = vadd.f32 %v965_v44, %v962_v20  ;;  %v934_v49 = vmul.f32 %v933_v53, %v2791_v52  ;;  %3769 = sst [smem:[#allocation38_spill]] %s3103_s23  ;;  %s3119_s23 = sld [smem:[#allocation4 + $0x202]] }
 0x131   : > { %v779_v17 = vmul.f32 0.125, %v632_v32  ;;  %v780_v50 = vmul.f32 0.125, %v678_v33  ;;  %v2174_v16 = vpop.f32.mrb[11].mxu0  ;;  %v2180_v14 = vpop.f32.mrb[11].mxu1  ;;  %v908_v34 = vadd.f32 %v907_v25, %v904_v36  ;;  %v846_v35 = vadd.f32 %v845_v38, %v842_v46 }
 0x132   : > { %v970_v9 = vadd.f32 %v969_v45, %v966_v22  ;;  %v935_v26 = vadd.f32 %v934_v49, %v931_v21  ;;  %v938_v20 = vmul.f32 %v937_v54, %v2795_v12  ;;  %v1027_v53 = vmul.f32 %v1026_v4, %v2791_v52  ;;  %v404_v54 = vld [vmem:[%s3676_s18 + $0x30] sm:$0xff]  ;;  %v405_v4 = vld [vmem:[%s3676_s18 + $0x38] sm:$0xff]  ;;  %s3111_s18 = sld [smem:[#allocation4 + $0x186]] }
 0x133   : > { %v2848_v5 = vsel %vm2672_vm2, -1e+18, %v779_v17  ;;  %v2852_v13 = vsel %vm2672_vm2, -1e+18, %v780_v50  ;;  %v2857_v27 = vmul.f32 %v1030_v10, %v2795_v12  ;;  %v2859_v21 = vadd.f32 %v992_v56, %v989_v55 }
 0x134   : > { %v880_v24 = vmul.f32 %v879_v57, %v2848_v5  ;;  %v884_v11 = vmul.f32 %v883_v61, %v2852_v13  ;;  %v818_v10 = vmul.f32 %v817_v58, %v2848_v5  ;;  %v822_v55 = vmul.f32 %v821_v62, %v2852_v13 }
 0x135   : > { %v911_v56 = vmul.f32 %v910_v59, %v2848_v5  ;;  %v915_v15 = vmul.f32 %v914_v63, %v2852_v13  ;;  %v849_v25 = vmul.f32 %v848_v60, %v2848_v5  ;;  %v853_v57 = vmul.f32 %v852_v1, %v2852_v13 }
 0x136   : > { %v723_v29 = vpop.f32.mrb[12].mxu0  ;;  %v769_v61 = vpop.f32.mrb[12].mxu1  ;;  %v881_v38 = vadd.f32 %v880_v24, %v877_v23  ;;  %v819_v30 = vadd.f32 %v818_v10, %v815_v28  ;;  %v973_v58 = vmul.f32 %v972_v2, %v2848_v5  ;;  %v977_v62 = vmul.f32 %v976_v3, %v2852_v13  ;;  %3775 = sst [smem:[#allocation45_spill]] %s3119_s23  ;;  %s3134_s23 = sld [smem:[#allocation4 + $0x207]] }
 0x137   : > { %v724_v59 = vadd.f32 %v723_v29, %v404_v54  ;;  %v770_v43 = vadd.f32 %v769_v61, %v405_v4  ;;  %v2185_v31 = vpop.f32.mrb[13].mxu0  ;;  %v2191_v63 = vpop.f32.mrb[13].mxu1  ;;  %v912_v60 = vadd.f32 %v911_v56, %v908_v34  ;;  %v850_v39 = vadd.f32 %v849_v25, %v846_v35 }
 0x138   : > { %v726_v1 = vpop.f32.mrb[14].mxu0  ;;  %v772_v44 = vpop.f32.mrb[14].mxu1  ;;  %v885_v45 = vadd.f32 %v884_v11, %v881_v38  ;;  %v823_v32 = vadd.f32 %v822_v55, %v819_v30  ;;  %v974_v33 = vadd.f32 %v973_v58, %v970_v9  ;;  %v939_v2 = vadd.f32 %v938_v20, %v935_v26  ;;  %3772 = sst [smem:[#allocation43_spill]] %s3111_s18  ;;  %s3126_s18 = sld [smem:[#allocation4 + $0x205]] }
 0x139   : > { %v781_v47 = vmul.f32 0.125, %v724_v59  ;;  %v782_v3 = vmul.f32 0.125, %v770_v43  ;;  %v2186_v0 = vpop.f32.mrb[15].mxu0  ;;  %v2192_v36 = vpop.f32.mrb[15].mxu1  ;;  %v916_v46 = vadd.f32 %v915_v15, %v912_v60  ;;  %v854_v48 = vadd.f32 %v853_v57, %v850_v39 }
 0x13a   : > { %v978_v37 = vadd.f32 %v977_v62, %v974_v33  ;;  %v942_v23 = vmul.f32 %v941_v6, %v2848_v5  ;;  %v946_v28 = vmul.f32 %v945_v7, %v2852_v13  ;;  %v1028_v22 = vadd.f32 %v1027_v53, %v2797_v19 }
 0x13b   : > { %v2908_v49 = vsel %vm2672_vm2, -1e+18, %v781_v47  ;;  %v2912_v17 = vsel %vm2672_vm2, -1e+18, %v782_v3  ;;  %v1035_v6 = vmul.f32 %v1034_v18, %v2848_v5  ;;  %v1039_v7 = vmul.f32 %v1038_v40, %v2852_v13 }
 0x13c   : > { %v888_v19 = vmul.f32 %v887_v8, %v2908_v49  ;;  %v3729_v50 = vstv %s3720_s26  ;;  %v3731_v42 = vstv %s3721_s28  ;;  %v3732_v34 = vstv %s3722_s7  ;;  %s3071_s26 = sld [smem:[#allocation4 + $0x100]]  ;;  %s3073_s28 = sld [smem:[#allocation4 + $0x82]] }
 0x13d   : > { %v892_v16 = vmul.f32 %v3729_v50, %v2912_v17  ;;  %v826_v14 = vmul.f32 %v3731_v42, %v2908_v49  ;;  %v830_v35 = vmul.f32 %v3732_v34, %v2912_v17  ;;  %v3733_v18 = vstv %s3723_s8  ;;  %s3075_s7 = sld [smem:[#allocation4 + $0x101]]  ;;  %s3077_s8 = sld [smem:[#allocation4 + $0x102]] }
 0x13e   : > { %v919_v9 = vmul.f32 %v3733_v18, %v2908_v49  ;;  %v3734_v40 = vstv %s3724_s9  ;;  %v3735_v20 = vstv %s3725_s10  ;;  %v3736_v53 = vstv %s3726_s11  ;;  %s3079_s9 = sld [smem:[#allocation4 + $0x180]]  ;;  %s3081_s10 = sld [smem:[#allocation4 + $0x83]] }
 0x13f   : > { %v923_v26 = vmul.f32 %v3734_v40, %v2912_v17  ;;  %v857_v8 = vmul.f32 %v3735_v20, %v2908_v49  ;;  %v861_v54 = vmul.f32 %v3736_v53, %v2912_v17  ;;  %v889_v4 = vadd.f32 %v888_v19, %v885_v45  ;;  %s3083_s11 = sld [smem:[#allocation4 + $0x181]]  ;;  %3777 = sst [smem:[#allocation37_spill]] %s3126_s18 }
 0x140   : > { %v827_v24 = vadd.f32 %v826_v14, %v823_v32  ;;  %v3737_v11 = vstv %s3727_s12  ;;  %v3738_v55 = vstv %s3728_s20  ;;  %v920_v15 = vadd.f32 %v919_v9, %v916_v46  ;;  %s3087_s12 = sld [smem:[#allocation4 + $0x85]]  ;;  %s3089_s20 = sld [smem:[#allocation4 + $0x86]] }
 0x141   : > { %v981_v10 = vmul.f32 %v3737_v11, %v2908_v49  ;;  %v985_v56 = vmul.f32 %v3738_v55, %v2912_v17  ;;  %v858_v25 = vadd.f32 %v857_v8, %v854_v48  ;;  %v943_v57 = vadd.f32 %v942_v23, %v939_v2  ;;  %3779 = sst [smem:[#allocation49_spill]] %s3134_s23  ;;  %s3294_s23 = sld [smem:[#allocation4 + $0x380]] }
 0x142   : > { %v3739_v29 = vstv %s3730_s30  ;;  %v893_v38 = vadd.f32 %v892_v16, %v889_v4  ;;  %v831_v30 = vadd.f32 %v830_v35, %v827_v24  ;;  %v954_v62 = vmul.f32 %v953_v51, %v2912_v17  ;;  %3755 = sst [smem:[#allocation21_spill]] %s3071_s26  ;;  %s3093_s30 = sld [smem:[#allocation4 + $0x103]] }
 0x143   : > { %v950_v61 = vmul.f32 %v3739_v29, %v2908_v49  ;;  %v982_v58 = vadd.f32 %v981_v10, %v978_v37  ;;  %v924_v59 = vadd.f32 %v923_v26, %v920_v15  ;;  %v862_v43 = vadd.f32 %v861_v54, %v858_v25  ;;  %3756 = sst [smem:[#allocation22_spill]] %s3073_s28  ;;  %s3342_s18 = sld [smem:[#allocation4 + $0x383]] }
 0x144   : > { %v947_v31 = vadd.f32 %v946_v28, %v943_v57  ;;  %v1032_v63 = vadd.f32 %v2857_v27, %v1028_v22  ;;  %v1056_v60 = vsel %vm1049_vm3, %v893_v38, -inf  ;;  %v1050_v39 = vsel %vm1049_vm3, %v831_v30, -inf  ;;  %3757 = sst [smem:[#allocation23_spill]] %s3075_s7 }
 0x145   : > { %v986_v1 = vadd.f32 %v985_v56, %v982_v58  ;;  %v1046_v44 = vstv %s2904_s15  ;;  %1057 = vmax.xlane.f32.xlu1 %v1056_v60  ;;  %1051 = vmax.xlane.f32.xlu0 %v1050_v39  ;;  %v1043_v32 = vmul.f32 %v1042_v41, %v2908_v49  ;;  %v1003_v33 = vstv %s2920_s29  ;;  %3758 = sst [smem:[#allocation24_spill]] %s3077_s8  ;;  %s3085_s15 = sld [smem:[#allocation4 + $0x84]] }
 0x146   : > { %v951_v45 = vadd.f32 %v950_v61, %v947_v31  ;;  %v1036_v51 = vadd.f32 %v1035_v6, %v1032_v63  ;;  %v3740_v27 = vstv %s2704_s24  ;;  %v3741_v47 = vstv %s2712_s17  ;;  %s3743_s17 = sld [smem:[#allocation60_spill]]  ;;  %3759 = sst [smem:[#allocation25_spill]] %s3079_s9 }
 0x147   : > { %v996_v2 = vmul.f32 %v3740_v27, %v2791_v52  ;;  %v1000_v3 = vmul.f32 %v3741_v47, %v2795_v12  ;;  %v1047_v46 = vmul.f32 %v1046_v44, %v2912_v17  ;;  %v1007_v48 = vstv %s2946_s13  ;;  %3760 = sst [smem:[#allocation29_spill]] %s3081_s10  ;;  %s3091_s29 = sld [smem:[#allocation4 + $0x87]] }
 0x148   : > { %v955_v0 = vadd.f32 %v954_v62, %v951_v45  ;;  %v1040_v36 = vadd.f32 %v1039_v7, %v1036_v51  ;;  %v1059_v37 = vsel %vm1049_vm3, %v924_v59, -inf  ;;  %v1053_v23 = vsel %vm1049_vm3, %v862_v43, -inf  ;;  %3761 = sst [smem:[#allocation26_spill]] %s3083_s11  ;;  %s3095_s13 = sld [smem:[#allocation4 + $0x104]] }
 0x149   : > { %v997_v28 = vadd.f32 %v996_v2, %v2859_v21  ;;  %v1004_v41 = vmul.f32 %v1003_v33, %v2848_v5  ;;  %1060 = vmax.xlane.f32.xlu1 %v1059_v37  ;;  %1054 = vmax.xlane.f32.xlu0 %v1053_v23  ;;  %v1011_v22 = vstv %s2957_s14  ;;  %v1008_v12 = vmul.f32 %v1007_v48, %v2852_v13  ;;  %3763 = sst [smem:[#allocation27_spill]] %s3087_s12  ;;  %s3097_s14 = sld [smem:[#allocation4 + $0x105]] }
 0x14a   : > { %v1044_v52 = vadd.f32 %v1043_v32, %v1040_v36  ;;  %v1015_v7 = vstv %s2963_s25  ;;  %v1065_v50 = vsel %vm1049_vm3, %v986_v1, -inf  ;;  %v1062_v16 = vsel %vm1049_vm3, %v955_v0, -inf  ;;  %3764 = sst [smem:[#allocation31_spill]] %s3089_s20  ;;  %s3099_s25 = sld [smem:[#allocation4 + $0x106]] }
 0x14b   : > { %v1001_v6 = vadd.f32 %v1000_v3, %v997_v28  ;;  %v1012_v14 = vmul.f32 %v1011_v22, %v2908_v49  ;;  %v1016_v5 = vmul.f32 %v1015_v7, %v2912_v17  ;;  %v3744_v37 = vmov 0.0   ;;  %3762 = sst [smem:[#allocation30_spill]] %s3085_s15  ;;  %s3105_s24 = sld [smem:[#allocation4 + $0x183]] }
 0x14c   : > { %v1048_v19 = vadd.f32 %v1047_v46, %v1044_v52  ;;  %s1853_s0 = scalar_lea.vmem %s3743_s17, %s3742_s3  ;;  %s3101_s3 = sld [smem:[#allocation4 + $0x107]] }
 0x14d   : > { %v1005_v42 = vadd.f32 %v1004_v41, %v1001_v6  ;;  %1066 = vmax.xlane.f32.xlu1 %v1065_v50  ;;  %1063 = vmax.xlane.f32.xlu0 %v1062_v16  ;;  %v1961_v36 = vld [vmem:[%s1853_s0 + $0x44] sm:$0xf]  ;;  %v1962_v23 = vld [vmem:[%s1853_s0 + $0x48] sm:$0xf]  ;;  %v1963_v41 = vld [vmem:[%s1853_s0 + $0x4c] sm:$0xf] }
 0x14e   : > { %v1071_v34 = vsel %vm1049_vm3, %v1048_v19, -inf  ;;  %v1445_v48 = vsel %vm1397_vm4, %v1961_v36, 0  ;;  %v3034_v28 = vsel %vm1397_vm4, %v1962_v23, 0  ;;  %v3037_v52 = vsel %vm1397_vm4, %v1963_v41, 0  ;;  %v1964_v22 = vld [vmem:[%s1853_s0 + $0x50] sm:$0xf] }
 0x14f   : > { %v1009_v21 = vadd.f32 %v1008_v12, %v1005_v42  ;;  %2200 = vmatpush3.bf16.msra.mxu1 %v1445_v48  ;;  %v3040_v6 = vsel %vm1397_vm4, %v1964_v22, 0  ;;  %v1965_v12 = vld [vmem:[%s1853_s0 + $0x54] sm:$0xf]  ;;  %v1966_v7 = vld [vmem:[%s1853_s0 + $0x58] sm:$0xf]  ;;  %3765 = sst [smem:[#allocation28_spill]] %s3091_s29 }
 0x150   : > { %2211 = vmatprep.subr.bf16.mxu1 %v3744_v37  ;;  %v1967_v50 = vld [vmem:[%s1853_s0 + $0x5c] sm:$0xf]  ;;  %v3046_v16 = vsel %vm1397_vm4, %v1966_v7, 0  ;;  %3766 = sst [smem:[#allocation32_spill]] %s3095_s13  ;;  %s3107_s17 = sld [smem:[#allocation4 + $0x184]] }
 0x151   : > { %v1013_v35 = vadd.f32 %v1012_v14, %v1009_v21  ;;  %1072 = vmax.xlane.f32.xlu1 %v1071_v34  ;;  %v3049_v42 = vsel %vm1397_vm4, %v1967_v50, 0  ;;  %3767 = sst [smem:[#allocation33_spill]] %s3097_s14  ;;  %s3113_s14 = sld [smem:[#allocation4 + $0x187]]  ;;  %v1139_v21 = vstv %s3051_s1  ;;  %v1146_v34 = vstv %s3055_s22 }
 0x152   : > { %3768 = sst [smem:[#allocation34_spill]] %s3101_s3  ;;  %s3115_s13 = sld [smem:[#allocation4 + $0x200]] }
 0x153   : > { %v1017_v18 = vadd.f32 %v1016_v5, %v1013_v35  ;;  %3770 = sst [smem:[#allocation42_spill]] %s3105_s24  ;;  %s3117_s3 = sld [smem:[#allocation4 + $0x201]]  ;;  %v1142_v5 = vstv %s3053_s5  ;;  %v1150_v35 = vstv %s3057_s4 }
 0x154   : > { %s3123_s24 = sld [smem:[#allocation4 + $0x204]]  ;;  %s3142_s1 = sld [smem:[#allocation4 + $0x281]] }
 0x155   : > { %v1068_v13 = vsel %vm1049_vm3, %v1017_v18, -inf  ;;  %s3783_s4 = sld [smem:[#allocation33_spill]]  ;;  %s3159_s22 = sld [smem:[#allocation4 + $0x286]] }
 0x156   : > { %1069 = vmax.xlane.f32.xlu0 %v1068_v13  ;;  %3771 = sst [smem:[#allocation39_spill]] %s3107_s17  ;;  %s3121_s17 = sld [smem:[#allocation4 + $0x203]]  ;;  %v1158_v13 = vstv %s3061_s6 }
 0x157   : > { %3773 = sst [smem:[#allocation40_spill]] %s3113_s14  ;;  %s3128_s14 = sld [smem:[#allocation4 + $0x206]] }
 0x158   : > { %s3150_s6 = sld [smem:[#allocation4 + $0x283]]  ;;  %s3787_s5 = sld [smem:[#allocation42_spill]] }
 0x159   : > { %3774 = sst [smem:[#allocation44_spill]] %s3117_s3  ;;  %s3136_s3 = sld [smem:[#allocation4 + $0x280]] }
 0x15a   : > { %3776 = sst [smem:[#allocation46_spill]] %s3123_s24 }
 0x15b   : > { %3784 = sst [smem:[#allocation54_spill]] %s3159_s22  ;;  %s3257_s22 = sld [smem:[#allocation4 + $0x304]] }
 0x15d   : > { %3778 = sst [smem:[#allocation41_spill]] %s3128_s14  ;;  %s3144_s14 = sld [smem:[#allocation4 + $0x282]] }
 0x15f   : > { %v1294_v50 = vstv %s3136_s3  ;;  %s3397_s3 = sld [smem:[#allocation4 + $0x307]] }
 0x163   : > { %3780 = sst [smem:[#allocation53_spill]] %s3144_s14 }
 0x1d2   : > { %v1058_v9 = vpop.xlane.xlu1 %1057  ;;  %v1052_v40 = vpop.xlane.xlu0 %1051 }
 0x1d3   : > { %v1076_v26 = vsub.f32 %v893_v38, %v1058_v9  ;;  %v1074_v20 = vsub.f32 %v831_v30, %v1052_v40  ;;  %v1162_v9 = vstv %s3063_s21  ;;  %v1166_v40 = vstv %s3065_s16  ;;  %s3152_s16 = sld [smem:[#allocation4 + $0x284]]  ;;  %s3781_s21 = sld [smem:[#allocation32_spill]] }
 0x1d5   : > { %v1082_v8 = vmul.f32 1.442695, %v1074_v20  ;;  %v1086_v53 = vmul.f32 1.442695, %v1076_v26  ;;  %v1170_v26 = vstv %s3067_s19  ;;  %s3172_s19 = sld [smem:[#allocation4 + $0x301]] }
 0x1d6   : > { %v1061_v49 = vpop.xlane.xlu1 %1060  ;;  %v1055_v54 = vpop.xlane.xlu0 %1054 }
 0x1d7   : > { %v1077_v4 = vsub.f32 %v924_v59, %v1061_v49  ;;  %v1075_v24 = vsub.f32 %v862_v43, %v1055_v54  ;;  %2289 = vpow2.f32 %v1082_v8  ;;  %v1177_v49 = vstv %s3073_s28  ;;  %s3785_s28 = sld [smem:[#allocation34_spill]] }
 0x1d8   : > { %2291 = vpow2.f32 %v1086_v53  ;;  %v1173_v53 = vstv %s3069_s27  ;;  %v1201_v54 = vstv %s3071_s26  ;;  %s3164_s27 = sld [smem:[#allocation4 + $0x287]]  ;;  %s3166_s26 = sld [smem:[#allocation4 + $0x300]] }
 0x1d9   : > { %v1084_v17 = vmul.f32 1.442695, %v1075_v24  ;;  %v1088_v11 = vmul.f32 1.442695, %v1077_v4  ;;  %v1204_v4 = vstv %s3075_s7  ;;  %v1208_v24 = vstv %s3077_s8  ;;  %s3786_s7 = sld [smem:[#allocation38_spill]]  ;;  %s3788_s8 = sld [smem:[#allocation39_spill]] }
 0x1da   : > { %v1067_v10 = vpop.xlane.xlu1 %1066  ;;  %v1064_v55 = vpop.xlane.xlu0 %1063 }
 0x1db   : > { %v1079_v56 = vsub.f32 %v986_v1, %v1067_v10  ;;  %v1078_v15 = vsub.f32 %v955_v0, %v1064_v55  ;;  %2293 = vpow2.f32 %v1084_v17  ;;  %v1960_v0 = vld [vmem:[%s1853_s0 + $0x40] sm:$0xf]  ;;  %s3109_s0 = sld [smem:[#allocation4 + $0x185]]  ;;  %v1232_v17 = vstv %s3079_s9  ;;  %s3789_s9 = sld [smem:[#allocation43_spill]] }
 0x1dc   : > { %2295 = vpow2.f32 %v1088_v11  ;;  %v1399_v46 = vsel %vm1397_vm4, %v1960_v0, 0  ;;  %v1235_v11 = vstv %s3083_s11  ;;  %v1181_v10 = vstv %s3081_s10  ;;  %s3790_s11 = sld [smem:[#allocation40_spill]]  ;;  %s3174_s10 = sld [smem:[#allocation4 + $0x302]] }
 0x1dd   : > { %v1090_v25 = vmul.f32 1.442695, %v1078_v15  ;;  %v1092_v57 = vmul.f32 1.442695, %v1079_v56  ;;  %2194 = vmatpush3.bf16.msra.mxu0 %v1399_v46  ;;  %v1185_v55 = vstv %s3085_s15  ;;  %v1189_v56 = vstv %s3087_s12  ;;  %s3791_s12 = sld [smem:[#allocation44_spill]]  ;;  %s3792_s15 = sld [smem:[#allocation45_spill]] }
 0x1de   : > { %v1073_v29 = vpop.xlane.xlu1 %1072  ;;  %2205 = vmatprep.subr.bf16.mxu0 %v3744_v37  ;;  %v1193_v15 = vstv %s3089_s20  ;;  %v1274_v46 = vstv %s3121_s17  ;;  %s3417_s17 = sld [smem:[#allocation4 + $0x387]] }
 0x1df   : > { %v1081_v61 = vsub.f32 %v1048_v19, %v1073_v29  ;;  %2297 = vpow2.f32 %v1090_v25  ;;  %v3043_v19 = vsel %vm1397_vm4, %v1965_v12, 0  ;;  %v1197_v25 = vstv %s3091_s29  ;;  %s3180_s29 = sld [smem:[#allocation4 + $0x303]] }
 0x1e0   : > { %2299 = vpow2.f32 %v1092_v57  ;;  %v1212_v57 = vstv %s3093_s30  ;;  %v1216_v29 = vstv %s3781_s21  ;;  %s3292_s21 = sld [smem:[#allocation4 + $0x305]] }
 0x1e1   : > { %v2993_v38 = vpop.eup %2289  ;;  %v1096_v30 = vmul.f32 1.442695, %v1081_v61 }
 0x1e2   : > { %v1098_v59 = vsel %vm1049_vm3, %v2993_v38, 0.0  ;;  %v2997_v43 = vpop.eup %2291 }
 0x1e3   : > { %v1070_v58 = vpop.xlane.xlu0 %1069  ;;  %1099 = vadd.xlane.f32.xlu0 %v1098_v59  ;;  %2301 = vpow2.f32 %v1096_v30  ;;  %v1104_v60 = vsel %vm1049_vm3, %v2997_v43, 0.0  ;;  %v1228_v59 = vstv %s3785_s28  ;;  %v1266_v0 = vstv %s3791_s12  ;;  %s3334_s12 = sld [smem:[#allocation4 + $0x382]]  ;;  %s3373_s28 = sld [smem:[#allocation4 + $0x384]] }
 0x1e4   : > { %v1080_v62 = vsub.f32 %v1017_v18, %v1070_v58  ;;  %v1154_v18 = vstv %s3059_s2  ;;  %s3157_s2 = sld [smem:[#allocation4 + $0x285]]  ;;  %v1220_v58 = vstv %s3783_s4  ;;  %v1270_v36 = vstv %s3792_s15  ;;  %s3315_s4 = sld [smem:[#allocation4 + $0x306]] }
 0x1e5   : > { %v2999_v63 = vpop.eup %2293 }
 0x1e6   : > { %v1094_v31 = vmul.f32 1.442695, %v1080_v62  ;;  %v1101_v39 = vsel %vm1049_vm3, %v2999_v63, 0.0  ;;  %v3005_v1 = vpop.eup %2295  ;;  %v1224_v62 = vstv %s3099_s25  ;;  %s3381_s25 = sld [smem:[#allocation4 + $0x385]] }
 0x1e7   : > { %1105 = vadd.xlane.f32.xlu0 %v1104_v60  ;;  %1102 = vadd.xlane.f32.xlu1 %v1101_v39  ;;  %v1107_v45 = vsel %vm1049_vm3, %v3005_v1, 0.0  ;;  %v1243_v60 = vstv %s3787_s5  ;;  %v1247_v39 = vstv %s3788_s8 }
 0x1e8   : > { %2303 = vpow2.f32 %v1094_v31  ;;  %v1239_v31 = vstv %s3786_s7  ;;  %s3817_s7 = sld [smem:[#allocation46_spill]] }
 0x1e9   : > { %v3007_v44 = vpop.eup %2297 }
 0x1ea   : > { %v1110_v51 = vsel %vm1049_vm3, %v3007_v44, 0.0  ;;  %v3013_v32 = vpop.eup %2299  ;;  %3782 = sst [smem:[#allocation50_spill]] %s3157_s2 }
 0x1eb   : > { %1108 = vadd.xlane.f32.xlu1 %v1107_v45  ;;  %1111 = vadd.xlane.f32.xlu0 %v1110_v51  ;;  %v1113_v33 = vsel %vm1049_vm3, %v3013_v32, 0.0  ;;  %v1251_v45 = vstv %s3109_s0  ;;  %v1255_v51 = vstv %s3789_s9  ;;  %s3326_s0 = sld [smem:[#allocation4 + $0x381]] }
 0x1ed   : > { %v3017_v27 = vpop.eup %2301 }
 0x1ee   : > { %v1119_v3 = vsel %vm1049_vm3, %v3017_v27, 0.0 }
 0x1ef   : > { %1114 = vadd.xlane.f32.xlu1 %v1113_v33  ;;  %v1259_v33 = vstv %s3790_s11  ;;  %s3818_s11 = sld [smem:[#allocation37_spill]] }
 0x1f2   : > { %v3019_v2 = vpop.eup %2303 }
 0x1f3   : > { %v1116_v47 = vsel %vm1049_vm3, %v3019_v2, 0.0  ;;  %1120 = vadd.xlane.f32.xlu1 %v1119_v3 }
 0x1f4   : > { %1117 = vadd.xlane.f32.xlu0 %v1116_v47  ;;  %v1263_v47 = vstv %s3115_s13 }
 0x270   : > { %v1100_v14 = vpop.xlane.xlu0 %1099 }
 0x271   : > { %2305 = vrcp.f32 %v1100_v14 }
 0x274   : > { %v1103_v20 = vpop.xlane.xlu1 %1102  ;;  %v1106_v8 = vpop.xlane.xlu0 %1105 }
 0x275   : > { %2307 = vrcp.f32 %v1103_v20  ;;  %v1301_v20 = vstv %s3144_s14 }
 0x276   : > { %2309 = vrcp.f32 %v1106_v8 }
 0x278   : > { %v1109_v61 = vpop.xlane.xlu1 %1108  ;;  %v1112_v30 = vpop.xlane.xlu0 %1111 }
 0x279   : > { %2311 = vrcp.f32 %v1109_v61 }
 0x27a   : > { %2313 = vrcp.f32 %v1112_v30 }
 0x27b   : > { %v2306_v3 = vpop.eup %2305 }
 0x27c   : > { %v3193_v23 = vmul.f32 %v2306_v3, %v2993_v38  ;;  %v1115_v41 = vpop.xlane.xlu1 %1114 }
 0x27d   : > { %2315 = vrcp.f32 %v1115_v41 }
 0x27e   : > { %v1140_v30 = vmul.f32 %v1139_v21, %v3193_v23  ;;  %v1171_v7 = vmul.f32 %v1170_v26, %v3193_v23  ;;  %v1202_v41 = vmul.f32 %v1201_v54, %v3193_v23 }
 0x27f   : > { %v2308_v38 = vpop.eup %2307 }
 0x280   : > { %v2310_v14 = vpop.eup %2309  ;;  %v3210_v8 = vmul.f32 %v2308_v38, %v2999_v63  ;;  %v1121_v48 = vpop.xlane.xlu1 %1120 }
 0x281   : > { %v1118_v3 = vpop.xlane.xlu0 %1117  ;;  %v3217_v22 = vmul.f32 %v2310_v14, %v2997_v43 }
 0x282   : > { %2317 = vrcp.f32 %v1118_v3  ;;  %v1143_v63 = vmul.f32 %v1142_v5, %v3210_v8  ;;  %v1174_v38 = vmul.f32 %v1173_v53, %v3210_v8  ;;  %v1205_v21 = vmul.f32 %v1204_v4, %v3210_v8 }
 0x283   : > { %2319 = vrcp.f32 %v1121_v48  ;;  %v1236_v43 = vmul.f32 %v1235_v11, %v3210_v8  ;;  %v2312_v14 = vpop.eup %2311  ;;  %v1147_v26 = vmul.f32 %v1146_v34, %v3217_v22  ;;  %v1178_v54 = vmul.f32 %v1177_v49, %v3217_v22 }
 0x284   : > { %v1209_v5 = vmul.f32 %v1208_v24, %v3217_v22  ;;  %v1233_v53 = vmul.f32 %v1232_v17, %v3193_v23  ;;  %v2314_v4 = vpop.eup %2313  ;;  %v3250_v11 = vmul.f32 %v2312_v14, %v3005_v1  ;;  %v1144_v48 = vadd.f32 %v1143_v63, %v1140_v30 }
 0x285   : > { %v1175_v3 = vadd.f32 %v1174_v38, %v1171_v7  ;;  %v1206_v34 = vadd.f32 %v1205_v21, %v1202_v41  ;;  %v3253_v61 = vmul.f32 %v2314_v4, %v3007_v44  ;;  %v1240_v24 = vmul.f32 %v1239_v31, %v3217_v22 }
 0x286   : > { %v1237_v49 = vadd.f32 %v1236_v43, %v1233_v53  ;;  %v1267_v12 = vmul.f32 %v1266_v0, %v3210_v8  ;;  %v1148_v17 = vadd.f32 %v1147_v26, %v1144_v48  ;;  %v1151_v1 = vmul.f32 %v1150_v35, %v3250_v11 }
 0x287   : > { %v1179_v30 = vadd.f32 %v1178_v54, %v1175_v3  ;;  %v1182_v7 = vmul.f32 %v1181_v10, %v3250_v11  ;;  %v2316_v44 = vpop.eup %2315  ;;  %v1155_v41 = vmul.f32 %v1154_v18, %v3253_v61  ;;  %v1186_v31 = vmul.f32 %v1185_v55, %v3253_v61 }
 0x288   : > { %v1210_v0 = vadd.f32 %v1209_v5, %v1206_v34  ;;  %v1213_v63 = vmul.f32 %v1212_v57, %v3250_v11  ;;  %v3275_v38 = vmul.f32 %v2316_v44, %v3013_v32  ;;  %v1152_v35 = vadd.f32 %v1151_v1, %v1148_v17 }
 0x289   : > { %v1183_v21 = vadd.f32 %v1182_v7, %v1179_v30  ;;  %v1217_v10 = vmul.f32 %v1216_v29, %v3253_v61  ;;  %v1241_v14 = vadd.f32 %v1240_v24, %v1237_v49  ;;  %v1244_v18 = vmul.f32 %v1243_v60, %v3250_v11 }
 0x28a   : > { %v1214_v43 = vadd.f32 %v1213_v63, %v1210_v0  ;;  %v1248_v55 = vmul.f32 %v1247_v39, %v3253_v61  ;;  %v1156_v57 = vadd.f32 %v1155_v41, %v1152_v35  ;;  %v1159_v32 = vmul.f32 %v1158_v13, %v3275_v38 }
 0x28b   : > { %v1187_v54 = vadd.f32 %v1186_v31, %v1183_v21  ;;  %v1190_v29 = vmul.f32 %v1189_v56, %v3275_v38  ;;  %v1221_v13 = vmul.f32 %v1220_v58, %v3275_v38  ;;  %v1245_v53 = vadd.f32 %v1244_v18, %v1241_v14 }
 0x28c   : > { %v2318_v26 = vpop.eup %2317  ;;  %v1218_v5 = vadd.f32 %v1217_v10, %v1214_v43  ;;  %v1160_v56 = vadd.f32 %v1159_v32, %v1156_v57  ;;  %v1252_v3 = vmul.f32 %v1251_v45, %v3275_v38  ;;  %v1340_v58 = vstv %s3257_s22  ;;  %s3839_s22 = sld [smem:[#allocation64_spill]] }
 0x28d   : > { %v2320_v60 = vpop.eup %2319  ;;  %v3297_v39 = vmul.f32 %v2318_v26, %v3019_v2  ;;  %v1191_v48 = vadd.f32 %v1190_v29, %v1187_v54  ;;  %v1249_v17 = vadd.f32 %v1248_v55, %v1245_v53  ;;  %v1264_v45 = vmul.f32 %v1263_v47, %v3193_v23 }
 0x28e   : > { %v3303_v4 = vmul.f32 %v2320_v60, %v3017_v27  ;;  %v1222_v49 = vadd.f32 %v1221_v13, %v1218_v5  ;;  %v1275_v7 = vmul.f32 %v1274_v46, %v3250_v11  ;;  %v1356_v0 = vstv %s3294_s23 }
 0x28f   : > { %v1163_v2 = vmul.f32 %v1162_v9, %v3297_v39  ;;  %v1194_v34 = vmul.f32 %v1193_v15, %v3297_v39  ;;  %v1225_v1 = vmul.f32 %v1224_v62, %v3297_v39  ;;  %v1253_v47 = vadd.f32 %v1252_v3, %v1249_v17 }
 0x290   : > { %v1167_v27 = vmul.f32 %v1166_v40, %v3303_v4  ;;  %v1198_v24 = vmul.f32 %v1197_v25, %v3303_v4  ;;  %v1271_v40 = vmul.f32 %v1270_v36, %v3217_v22  ;;  %v1229_v25 = vmul.f32 %v1228_v59, %v3303_v4 }
 0x291   : > { %v1164_v9 = vadd.f32 %v1163_v2, %v1160_v56  ;;  %v1195_v15 = vadd.f32 %v1194_v34, %v1191_v48  ;;  %v1268_v30 = vadd.f32 %v1267_v12, %v1264_v45  ;;  %v1226_v41 = vadd.f32 %v1225_v1, %v1222_v49 }
 0x292   : > { %v1256_v36 = vmul.f32 %v1255_v51, %v3297_v39  ;;  %v1295_v59 = vmul.f32 %v1294_v50, %v3193_v23  ;;  %v1344_v12 = vstv %s3292_s21  ;;  %v1260_v21 = vmul.f32 %v1259_v33, %v3303_v4 }
 0x293   : > { %v1168_v62 = vadd.f32 %v1167_v27, %v1164_v9  ;;  %v1199_v44 = vadd.f32 %v1198_v24, %v1195_v15  ;;  %v1272_v31 = vadd.f32 %v1271_v40, %v1268_v30  ;;  %v3820_v43 = vstv %s3817_s7 }
 0x294   : > { %v1257_v35 = vadd.f32 %v1256_v36, %v1253_v47  ;;  %v1279_v51 = vmul.f32 %v3820_v43, %v3253_v61  ;;  %v3821_v14 = vstv %s3818_s11  ;;  %v3822_v50 = vstv %s3142_s1  ;;  %s3824_s1 = sld [smem:[#allocation41_spill]] }
 0x295   : > { %v1386_v46 = vpack.c.bf16 %v1168_v62, %v1168_v62  ;;  %v1387_v63 = vpack.c.bf16 %v1199_v44, %v1199_v44  ;;  %v1276_v10 = vadd.f32 %v1275_v7, %v1272_v31  ;;  %v1283_v18 = vmul.f32 %v3821_v14, %v3275_v38 }
 0x296   : > { %v1298_v55 = vmul.f32 %v3822_v50, %v3210_v8  ;;  %v1230_v26 = vadd.f32 %v1229_v25, %v1226_v41  ;;  %v1302_v33 = vmul.f32 %v1301_v20, %v3217_v22  ;;  %v3823_v57 = vstv %s3166_s26  ;;  %s3826_s26 = sld [smem:[#allocation49_spill]] }
 0x297   : > { %2196 = vmatmul.mubr.msk.bf16.vlgmr.msra.gmra.mrb[16].mxu0 %vm1049_vm3, %v1386_v46  ;;  %2202 = vmatmul.mubr.msk.bf16.vlgmr.msra.gmra.mrb[16].mxu1 %vm1049_vm3, %v1387_v63  ;;  %v1326_v32 = vmul.f32 %v3823_v57, %v3193_v23  ;;  %v1348_v54 = vstv %s3315_s4  ;;  %v1280_v29 = vadd.f32 %v1279_v51, %v1276_v10  ;;  %v3825_v5 = vstv %s3150_s6  ;;  %s3828_s6 = sld [smem:[#allocation50_spill]] }
 0x298   : > { %2206 = vmatpush3.bf16.msra.mxu0 %v3034_v28  ;;  %2212 = vmatpush3.bf16.msra.mxu1 %v3037_v52  ;;  %v1299_v60 = vadd.f32 %v1298_v55, %v1295_v59  ;;  %v1306_v13 = vmul.f32 %v3825_v5, %v3250_v11  ;;  %v1359_v53 = vstv %s3326_s0  ;;  %v1261_v28 = vadd.f32 %v1260_v21, %v1257_v35 }
 0x299   : > { %2207 = vmatprep.mubr.msk.bf16.mxu0 %vm2386_vm0, %v3744_v37  ;;  %2213 = vmatprep.mubr.msk.bf16.mxu1 %vm2386_vm0, %v3744_v37  ;;  %v3827_v52 = vstv %s3172_s19  ;;  %v1357_v56 = vmul.f32 %v1356_v0, %v3193_v23  ;;  %v1363_v48 = vstv %s3334_s12  ;;  %v1284_v3 = vadd.f32 %v1283_v18, %v1280_v29  ;;  %s3415_s19 = sld [smem:[#allocation4 + $0x386]] }
 0x29a   : > { %v1329_v20 = vmul.f32 %v3827_v52, %v3210_v8  ;;  %2217 = vmatprep.subr.bf16.mxu0 %v3744_v37  ;;  %2223 = vmatprep.subr.bf16.mxu1 %v3744_v37  ;;  %v3829_v2 = vstv %s3824_s1  ;;  %v1303_v49 = vadd.f32 %v1302_v33, %v1299_v60  ;;  %v1367_v27 = vstv %s3342_s18 }
 0x29b   : > { %v1287_v34 = vmul.f32 %v3829_v2, %v3297_v39  ;;  %v1388_v24 = vpack.c.bf16 %v1230_v26, %v1230_v26  ;;  %v3830_v45 = vstv %s3174_s10  ;;  %v3831_v9 = vstv %s3180_s29  ;;  %s3835_s10 = sld [smem:[#allocation54_spill]] }
 0x29c   : > { %v1330_v17 = vadd.f32 %v1329_v20, %v1326_v32  ;;  %v1333_v23 = vmul.f32 %v3830_v45, %v3217_v22  ;;  %v1337_v15 = vmul.f32 %v3831_v9, %v3250_v11  ;;  %v3832_v1 = vstv %s3826_s26 }
 0x29d   : > { %v1291_v40 = vmul.f32 %v3832_v1, %v3303_v4  ;;  %v1307_v25 = vadd.f32 %v1306_v13, %v1303_v49  ;;  %v3833_v47 = vstv %s3152_s16  ;;  %v3834_v7 = vstv %s3828_s6  ;;  %s3838_s16 = sld [smem:[#allocation11_spill]] }
 0x29e   : > { %v1310_v30 = vmul.f32 %v3833_v47, %v3253_v61  ;;  %v1314_v62 = vmul.f32 %v3834_v7, %v3275_v38  ;;  %v1389_v44 = vpack.c.bf16 %v1261_v28, %v1261_v28  ;;  %v1288_v41 = vadd.f32 %v1287_v34, %v1284_v3 }
 0x29f   : > { %v1334_v36 = vadd.f32 %v1333_v23, %v1330_v17  ;;  %v1360_v31 = vmul.f32 %v1359_v53, %v3210_v8  ;;  %v1341_v0 = vmul.f32 %v1340_v58, %v3253_v61  ;;  %v1345_v46 = vmul.f32 %v1344_v12, %v3275_v38  ;;  %2208 = vmatmul.mubr.msk.bf16.vlgmr.msra.gmra.mrb[20].mxu0 %vm1049_vm3, %v1388_v24 }
 0x2a0   : > { %v1311_v59 = vadd.f32 %v1310_v30, %v1307_v25  ;;  %v1364_v63 = vmul.f32 %v1363_v48, %v3217_v22  ;;  %2214 = vmatmul.mubr.msk.bf16.vlgmr.msra.gmra.mrb[20].mxu1 %vm1049_vm3, %v1389_v44  ;;  %v1368_v10 = vmul.f32 %v1367_v27, %v3250_v11  ;;  %v1371_v43 = vstv %s3373_s28  ;;  %2218 = vmatpush3.bf16.msra.mxu0 %v3040_v6 }
 0x2a1   : > { %v1338_v35 = vadd.f32 %v1337_v15, %v1334_v36  ;;  %v1361_v21 = vadd.f32 %v1360_v31, %v1357_v56  ;;  %2224 = vmatpush3.bf16.msra.mxu1 %v3043_v19  ;;  %v3836_v58 = vstv %s3835_s10  ;;  %v3837_v22 = vstv %s3164_s27  ;;  %2219 = vmatprep.mubr.msk.bf16.mxu0 %vm2386_vm0, %v3744_v37 }
 0x2a2   : > { %v1315_v8 = vadd.f32 %v1314_v62, %v1311_v59  ;;  %v1318_v12 = vmul.f32 %v3836_v58, %v3297_v39  ;;  %v1322_v51 = vmul.f32 %v3837_v22, %v3303_v4  ;;  %v1375_v14 = vstv %s3381_s25  ;;  %2225 = vmatprep.mubr.msk.bf16.mxu1 %vm2386_vm0, %v3744_v37  ;;  %2229 = vmatprep.subr.bf16.mxu0 %v3744_v37 }
 0x2a3   : > { %v1292_v11 = vadd.f32 %v1291_v40, %v1288_v41  ;;  %v1342_v6 = vadd.f32 %v1341_v0, %v1338_v35  ;;  %v1365_v18 = vadd.f32 %v1364_v63, %v1361_v21  ;;  %2235 = vmatprep.subr.bf16.mxu1 %v3744_v37  ;;  %v1349_v50 = vmul.f32 %v1348_v54, %v3297_v39  ;;  %s2112_s27 = sshll.u32 %s3838_s16, 5 }
 0x2a4   : > { %v1319_v19 = vadd.f32 %v1318_v12, %v1315_v8  ;;  %v1352_v55 = vstv %s3397_s3  ;;  %v1372_v57 = vmul.f32 %v1371_v43, %v3253_v61  ;;  %v1376_v32 = vmul.f32 %v1375_v14, %v3275_v38  ;;  %s3467_s2 = scalar_lea.vmem %s3839_s22, %s2112_s27 }
 0x2a5   : > { %v1346_v26 = vadd.f32 %v1345_v46, %v1342_v6  ;;  %v1369_v33 = vadd.f32 %v1368_v10, %v1365_v18  ;;  %v1379_v60 = vstv %s3415_s19  ;;  %v1383_v5 = vstv %s3417_s17 }
 0x2a6   : > { %v1323_v29 = vadd.f32 %v1322_v51, %v1319_v19  ;;  %v1390_v13 = vpack.c.bf16 %v1292_v11, %v1292_v11  ;;  %v1353_v28 = vmul.f32 %v1352_v55, %v3303_v4  ;;  %v1380_v56 = vmul.f32 %v1379_v60, %v3297_v39 }
 0x2a7   : > { %v1350_v53 = vadd.f32 %v1349_v50, %v1346_v26  ;;  %v1373_v52 = vadd.f32 %v1372_v57, %v1369_v33  ;;  %v1384_v48 = vmul.f32 %v1383_v5, %v3303_v4 }
 0x2a8   : > { %v1391_v20 = vpack.c.bf16 %v1323_v29, %v1323_v29  ;;  %2220 = vmatmul.mubr.msk.bf16.vlgmr.msra.gmra.mrb[24].mxu0 %vm1049_vm3, %v1390_v13 }
 0x2a9   : > { %v1377_v54 = vadd.f32 %v1376_v32, %v1373_v52  ;;  %2230 = vmatpush3.bf16.msra.mxu0 %v3046_v16  ;;  %2231 = vmatprep.mubr.msk.bf16.mxu0 %vm2386_vm0, %v3744_v37  ;;  %v1354_v61 = vadd.f32 %v1353_v28, %v1350_v53 }
 0x2aa   : > { %2226 = vmatmul.mubr.msk.bf16.vlgmr.msra.gmra.mrb[24].mxu1 %vm1049_vm3, %v1391_v20 }
 0x2ab   : > { %2236 = vmatpush3.bf16.msra.mxu1 %v3049_v42  ;;  %v1381_v38 = vadd.f32 %v1380_v56, %v1377_v54  ;;  %2237 = vmatprep.mubr.msk.bf16.mxu1 %vm2386_vm0, %v3744_v37  ;;  %v1392_v2 = vpack.c.bf16 %v1354_v61, %v1354_v61 }
 0x2ad   : > { %v1385_v3 = vadd.f32 %v1384_v48, %v1381_v38 }
 0x2af   : > { %v1393_v34 = vpack.c.bf16 %v1385_v3, %v1385_v3 }
 0x2b0   : > { %2232 = vmatmul.mubr.msk.bf16.vlgmr.msra.gmra.mrb[28].mxu0 %vm1049_vm3, %v1392_v2 }
 0x2b2   : > { %2238 = vmatmul.mubr.msk.bf16.vlgmr.msra.gmra.mrb[28].mxu1 %vm1049_vm3, %v1393_v34 }
 0x36a   : > { %v1435_v16 = vpop.f32.mrb[16].mxu0  ;;  %v1481_v42 = vpop.f32.mrb[16].mxu1 }
 0x36b   : > { %v1763_v39 = vpack.c.bf16 %v1435_v16, %v1435_v16  ;;  %v1764_v37 = vpack.c.bf16 %v1481_v42, %v1481_v42  ;;  %v2197_v4 = vpop.f32.mrb[17].mxu0  ;;  %v2203_v49 = vpop.f32.mrb[17].mxu1 }
 0x36c   : > { %v1438_v27 = vpop.f32.mrb[18].mxu0  ;;  %v1484_v24 = vpop.f32.mrb[18].mxu1 }
 0x36d   : > { %1772 = vst.msk [vmem:[%s3467_s2] sm:$0xf] %vm1771_vm5, %v1763_v39  ;;  %1773 = vst.msk [vmem:[%s3467_s2 + $0x4] sm:$0xf] %vm1771_vm5, %v1764_v37  ;;  %v2198_v17 = vpop.f32.mrb[19].mxu0  ;;  %v2204_v45 = vpop.f32.mrb[19].mxu1 }
 0x372   : > { %v1527_v23 = vpop.f32.mrb[20].mxu0 }
 0x373   : > { %v1573_v9 = vpop.f32.mrb[20].mxu1  ;;  %v1765_v15 = vpack.c.bf16 %v1527_v23, %v1527_v23  ;;  %v2209_v40 = vpop.f32.mrb[21].mxu0 }
 0x374   : > { %v1766_v1 = vpack.c.bf16 %v1573_v9, %v1573_v9  ;;  %v2215_v25 = vpop.f32.mrb[21].mxu1  ;;  %v1530_v47 = vpop.f32.mrb[22].mxu0 }
 0x375   : > { %v1576_v30 = vpop.f32.mrb[22].mxu1  ;;  %1774 = vst.msk [vmem:[%s3467_s2 + $0x8] sm:$0xf] %vm1771_vm5, %v1765_v15  ;;  %v2210_v7 = vpop.f32.mrb[23].mxu0 }
 0x376   : > { %1775 = vst.msk [vmem:[%s3467_s2 + $0xc] sm:$0xf] %vm1771_vm5, %v1766_v1  ;;  %v2216_v62 = vpop.f32.mrb[23].mxu1 }
 0x37b   : > { %v1619_v44 = vpop.f32.mrb[24].mxu0 }
 0x37c   : > { %v1767_v41 = vpack.c.bf16 %v1619_v44, %v1619_v44  ;;  %v2221_v31 = vpop.f32.mrb[25].mxu0 }
 0x37d   : > { %v1665_v36 = vpop.f32.mrb[24].mxu1  ;;  %v1622_v46 = vpop.f32.mrb[26].mxu0 }
 0x37e   : > { %v1768_v59 = vpack.c.bf16 %v1665_v36, %v1665_v36  ;;  %v2227_v0 = vpop.f32.mrb[25].mxu1  ;;  %1776 = vst.msk [vmem:[%s3467_s2 + $0x10] sm:$0xf] %vm1771_vm5, %v1767_v41  ;;  %v2222_v35 = vpop.f32.mrb[27].mxu0 }
 0x37f   : > { %v1668_v63 = vpop.f32.mrb[26].mxu1 }
 0x380   : > { %1777 = vst.msk [vmem:[%s3467_s2 + $0x14] sm:$0xf] %vm1771_vm5, %v1768_v59  ;;  %v2228_v21 = vpop.f32.mrb[27].mxu1 }
 0x383   : > { %v1711_v10 = vpop.f32.mrb[28].mxu0 }
 0x384   : > { %v1769_v43 = vpack.c.bf16 %v1711_v10, %v1711_v10  ;;  %v2233_v58 = vpop.f32.mrb[29].mxu0 }
 0x385   : > { %v1757_v8 = vpop.f32.mrb[28].mxu1  ;;  %v1714_v51 = vpop.f32.mrb[30].mxu0 }
 0x386   : > { %v1770_v12 = vpack.c.bf16 %v1757_v8, %v1757_v8  ;;  %v2239_v22 = vpop.f32.mrb[29].mxu1  ;;  %1778 = vst.msk [vmem:[%s3467_s2 + $0x18] sm:$0xf] %vm1771_vm5, %v1769_v43  ;;  %v2234_v11 = vpop.f32.mrb[31].mxu0 }
 0x387   : > { %v1760_v14 = vpop.f32.mrb[30].mxu1 }
 0x388   : > { %1779 = vst.msk [vmem:[%s3467_s2 + $0x1c] sm:$0xf] %vm1771_vm5, %v1770_v12  ;;  %v2240_v6 = vpop.f32.mrb[31].mxu1 }
 0x389 PF: > { %s3840_s20 = sld [smem:[#allocation9_spill]]  ;;  %s3841_s21 = sld [smem:[#allocation8_spill]] }
 0x38a   : > { %s3842_s22 = sld [smem:[#allocation10_spill]] }
 0x38f   : > { %s18_s23 = sadd.s32 1, %s3840_s20  }
 0x390   : > { %p15_p4 = scmp.ge.s32.totalorder %s18_s23, 4  }
 0x392   :  { %17 = sbr.rel (!%p15_p4) target bundleno = 11 (0xb), region = 92 }
 0x399   :  { %1807 = vsyncpa [#allocation3], 1 }
 0x39a   :  { %1809 = vsyncpa [#allocation3 + $0x1], 1 }
 0x39b   :  { %1810 = vsyncpa [#allocation5], 1 }

</bundles_post_ra>
